<compile_context>
chip_gen: v7x
topology: tpu7x:2x2x1
jax: 0.10.0
libtpu: 0.0.40
codegen_flags: <defaults>
</compile_context>

<pallas_src>
import jax
import jax.numpy as jnp
from jax import lax
from jax.experimental import pallas as pl
from jax.experimental.pallas import tpu as pltpu


# ----------------------------------------------------------------------------
# Fused kernel (Bt batch items per grid step)
# ----------------------------------------------------------------------------
def _make_rdmf_kernel(C, H, W, Bt):
    HW = H * W
    N = Bt * HW
    K25 = 25 * C

    def shift_lanes(x, s):
        # out[:, f] = x[:, (f + s) mod HW].  Explicit slice+concat on a live
        # value: lowers to XLU lane shuffles (same unit pltpu.roll uses) with
        # no VMEM round trip and no roll-direction ambiguity.
        k = s % HW
        if k == 0:
            return x
        return jnp.concatenate([x[:, k:], x[:, :k]], axis=1)

    col_shifts = []                       # over-h tree: multiples of W
    s = W
    while s < HW:
        col_shifts.append(s)
        s *= 2
    row_shifts = []                       # over-w tree: 1, 2, 4, ...
    s = 1
    while s < W:
        row_shifts.append(s)
        s *= 2

    def kernel(rf_ref, df_ref, w0_ref, selstart_ref, selh_ref, wc_ref,
               tmask_ref, out_ref, im_ref):
        # Bias row of the im2col buffer (row 25*C): folds the three conv
        # biases into the single fused matmul.
        im_ref[K25:K25 + 1, :] = jnp.ones((1, N), jnp.float32)

        w0 = w0_ref[...]                  # (C, C)
        selstart = selstart_ref[...]      # (HW, H): 1 at f == h*W
        selh = selh_ref[...]              # (H, HW): 1 at f // W == h
        tmask = tmask_ref[...]            # (25, HW) combined H/W boundary masks

        for bi in range(Bt):
            add = rf_ref[bi] + df_ref[bi]                     # (C, HW)

            # ---- column (over-h) max & mean, already broadcast over h:
            # shifting by multiples of W wraps through every row at fixed w.
            cmax = add
            csum = add
            for sh in col_shifts:
                cmax = jnp.maximum(cmax, shift_lanes(cmax, sh))
                csum = csum + shift_lanes(csum, sh)
            x_flat = cmax + csum * (1.0 / H)                  # attx broadcast

            # ---- row (over-w) max & mean: tree results are exact at the
            # row-start lanes f == h*W; extract + broadcast with tiny 0/1
            # matmuls (the "keep the selh matmul" path).
            rmax = add
            rsum = add
            for sh in row_shifts:
                rmax = jnp.maximum(rmax, shift_lanes(rmax, sh))
                rsum = rsum + shift_lanes(rsum, sh)
            row_stat = rmax + rsum * (1.0 / W)                # valid at f=h*W
            atty = jnp.dot(row_stat, selstart,
                           preferred_element_type=jnp.float32)   # (C, H)
            y_flat = jnp.dot(atty, selh,
                             preferred_element_type=jnp.float32) # (C, HW)

            # ---- 1x1 conv + channel softmax
            mix = jnp.dot(w0, x_flat * y_flat,
                          preferred_element_type=jnp.float32)    # (C, HW)
            m = jnp.max(mix, axis=0, keepdims=True)
            e = jnp.exp(mix - m)
            inv = 1.0 / jnp.sum(e, axis=0, keepdims=True)  # exact recip (tol)
            mix_f = (e * inv) * add + add                        # (C, HW)

            # ---- 25 shifted taps of mix_f -> im2col columns for image bi.
            # Lane wrap-around only reaches positions the mask zeroes, so no
            # halo buffer is needed; stores are sublane/lane aligned.
            for t in range(25):
                dh = t // 5 - 2
                dw = t % 5 - 2
                tap = shift_lanes(mix_f, dh * W + dw)
                if dh != 0 or dw != 0:
                    tap = tap * tmask[t:t + 1, :]
                im_ref[t * C:(t + 1) * C, bi * HW:(bi + 1) * HW] = tap

        # ---- one fused conv matmul: all 3 branches + bias, all Bt images.
        y = jnp.dot(wc_ref[...], im_ref[...],
                    preferred_element_type=jnp.float32)          # (3C, N)
        en = (jnp.maximum(y[0:C, :], 0.0)
              + jnp.maximum(y[C:2 * C, :], 0.0)
              + jnp.maximum(y[2 * C:3 * C, :], 0.0))             # (C, N)
        for bi in range(Bt):
            out_ref[bi, :, :] = en[:, bi * HW:(bi + 1) * HW]

    return kernel


# ----------------------------------------------------------------------------
# Wrapper
# ----------------------------------------------------------------------------
def rdmf_forward(r, d, params, *, batch_tile=None):
    """r, d: (B, C, H, W) float32 (NCHW, PyTorch convention)."""
    B, C, H, W = r.shape
    HW = H * W
    eps = 1e-5
    assert (H & (H - 1)) == 0 and (W & (W - 1)) == 0, (
        "shift-tree pooling assumes power-of-two H and W")
    # TODO(synk): selector-matmul fallback for non power-of-two H / W.

    if batch_tile is None:
        batch_tile = next(bt for bt in (8, 4, 2, 1) if B % bt == 0)
    Bt = batch_tile
    assert B % Bt == 0

    r = r.astype(jnp.float32)
    d = d.astype(jnp.float32)
    rf = r.reshape(B, C, HW)        # free views of the NCHW bytes
    df = d.reshape(B, C, HW)

    # fold inference-mode BatchNorm into conv weights / bias
    def fold(w, bn):
        gamma, beta, mean, var = bn
        s = gamma / jnp.sqrt(var + eps)
        return w * s[:, None, None, None], beta - mean * s

    w1f, b1 = fold(params["w1"], params["bn1"])     # (C,C,5,1)
    w2f, b2 = fold(params["w2"], params["bn2"])     # (C,C,1,5)
    w3f, b3 = fold(params["w3"], params["bn3"])     # (C,C,5,5)

    # pack the three branches into one (3C, 25C) weight with structural zeros:
    # conv1 (5,1) lives at stencil column kw==2, conv2 (1,5) at row kh==2.
    W1 = jnp.zeros((C, C, 5, 5), jnp.float32).at[:, :, :, 2].set(w1f[:, :, :, 0])
    W2 = jnp.zeros((C, C, 5, 5), jnp.float32).at[:, :, 2, :].set(w2f[:, :, 0, :])
    wall = jnp.stack([W1, W2, w3f], axis=0)                  # (3, Co, Ci, 5, 5)
    wc = jnp.transpose(wall, (0, 1, 3, 4, 2)).reshape(3 * C, 25 * C)
    bc = jnp.concatenate([b1, b2, b3]).reshape(3 * C, 1)
    wc_aug = jnp.concatenate([wc, bc], axis=1)               # (3C, 25C+1)

    w0m = params["w0"][:, :, 0, 0]                           # (C_out, C_in)

    # small exact 0/1 constants
    fidx = jnp.arange(HW)
    hofs = fidx // W
    wofs = fidx % W
    selh = (hofs[None, :] == jnp.arange(H)[:, None]).astype(jnp.float32)   # (H,HW)
    selstart = (fidx[:, None] ==
                (jnp.arange(H) * W)[None, :]).astype(jnp.float32)          # (HW,H)
    tmask = jnp.stack(
        [((hofs + (t // 5 - 2) >= 0) & (hofs + (t // 5 - 2) < H) &
          (wofs + (t % 5 - 2) >= 0) & (wofs + (t % 5 - 2) < W)
          ).astype(jnp.float32)
         for t in range(25)], axis=0)                                      # (25,HW)

    kernel = _make_rdmf_kernel(C, H, W, Bt)

    # explicit VMEM budget: double-buffered inputs/outputs + resident
    # constants + the im2col scratch (matters on v7x's 64 MiB VMEM).
    f32 = 4
    est = (3 * 2 * Bt * C * HW
           + 2 * (C * C + HW * H + H * HW + 3 * C * (25 * C + 1) + 25 * HW)
           + (25 * C + 8) * Bt * HW) * f32
    vmem_limit = int(min(max(2 * est, 8 << 20), 64 << 20))

    out_flat = pl.pallas_call(
        kernel,
        out_shape=jax.ShapeDtypeStruct((B, C, HW), jnp.float32),
        grid=(B // Bt,),
        in_specs=[
            pl.BlockSpec((Bt, C, HW), lambda g: (g, 0, 0)),        # r (lane-dense)
            pl.BlockSpec((Bt, C, HW), lambda g: (g, 0, 0)),        # d (lane-dense)
            pl.BlockSpec((C, C), lambda g: (0, 0)),                # w0 (1x1 conv)
            pl.BlockSpec((HW, H), lambda g: (0, 0)),               # row-start sel
            pl.BlockSpec((H, HW), lambda g: (0, 0)),               # selh broadcast
            pl.BlockSpec((3 * C, 25 * C + 1), lambda g: (0, 0)),   # conv wts + bias
            pl.BlockSpec((25, HW), lambda g: (0, 0)),              # tap masks
        ],
        out_specs=pl.BlockSpec((Bt, C, HW), lambda g: (g, 0, 0)),
        scratch_shapes=[
            pltpu.VMEM((25 * C + 1, Bt * HW), jnp.float32),        # im2col (+ones)
        ],
        compiler_params=pltpu.CompilerParams(
            dimension_semantics=("parallel",),
            vmem_limit_bytes=vmem_limit),
    )(rf, df, w0m, selstart, selh, wc_aug, tmask)

    return out_flat.reshape(B, C, H, W)


# ----------------------------------------------------------------------------
# Pure-JAX reference (mirrors the PyTorch forward, NCHW) for verification
# ----------------------------------------------------------------------------
def rdmf_reference(r, d, params):
    eps = 1e-5
    add = r + d
    att1 = jnp.max(add, axis=2, keepdims=True)
    att2 = jnp.max(add, axis=3, keepdims=True)
    att3 = jnp.mean(add, axis=2, keepdims=True)
    att4 = jnp.mean(add, axis=3, keepdims=True)
    attx = att1 + att3
    atty = att2 + att4
    dn = ("NCHW", "OIHW", "NCHW")
    mix = lax.conv_general_dilated(attx * atty, params["w0"], (1, 1),
                                   [(0, 0), (0, 0)], dimension_numbers=dn)
    mix_s = jax.nn.softmax(mix, axis=1)
    mix_f = mix_s * add + add

    def branch(x, w, bn, pad):
        gamma, beta, mean, var = bn
        y = lax.conv_general_dilated(x, w, (1, 1), pad, dimension_numbers=dn)
        y = (y - mean[None, :, None, None]) / jnp.sqrt(
            var[None, :, None, None] + eps)
        y = y * gamma[None, :, None, None] + beta[None, :, None, None]
        return jnp.maximum(y, 0.0)

    en1 = branch(mix_f, params["w1"], params["bn1"], [(2, 2), (0, 0)])
    en2 = branch(mix_f, params["w2"], params["bn2"], [(0, 0), (2, 2)])
    en3 = branch(mix_f, params["w3"], params["bn3"], [(2, 2), (2, 2)])
    return en1 + en2 + en3


if __name__ == "__main__":
    key = jax.random.PRNGKey(0)
    B, C, H, W = 2, 8, 16, 16
    ks = jax.random.split(key, 10)
    r = jax.random.normal(ks[0], (B, C, H, W), jnp.float32)
    d = jax.random.normal(ks[1], (B, C, H, W), jnp.float32)

    def bn_params(k):
        k1, k2, k3, k4 = jax.random.split(k, 4)
        gamma = 1.0 + 0.1 * jax.random.normal(k1, (C,), jnp.float32)
        beta = 0.1 * jax.random.normal(k2, (C,), jnp.float32)
        mean = 0.1 * jax.random.normal(k3, (C,), jnp.float32)
        var = 0.5 + jnp.abs(jax.random.normal(k4, (C,), jnp.float32))
        return (gamma, beta, mean, var)

    params = {
        "w0": 0.1 * jax.random.normal(ks[2], (C, C, 1, 1), jnp.float32),
        "w1": 0.1 * jax.random.normal(ks[3], (C, C, 5, 1), jnp.float32),
        "w2": 0.1 * jax.random.normal(ks[4], (C, C, 1, 5), jnp.float32),
        "w3": 0.1 * jax.random.normal(ks[5], (C, C, 5, 5), jnp.float32),
        "bn1": bn_params(ks[6]),
        "bn2": bn_params(ks[7]),
        "bn3": bn_params(ks[8]),
        # complex_weights exists in the module __init__ but is never used in
        # forward(); created here only for parameter-shape fidelity.
        "complex_weights": 0.02 * jax.random.normal(ks[9], (14, 8, C, 2),
                                                    jnp.float32),
    }

    out = jax.block_until_ready(rdmf_forward(r, d, params))
    ref = jax.block_until_ready(rdmf_reference(r, d, params))
    assert out.shape == (B, C, H, W)
    err = float(jnp.max(jnp.abs(out - ref)))
    assert jnp.allclose(out, ref, rtol=1e-4, atol=1e-4), err
    print("KERNEL_OK")
</pallas_src>

<mosaic_0001>
module attributes {stable_mosaic.version = 11 : i64} {
  func.func @kernel(%arg0: i32, %arg1: memref<2x8x256xf32, #tpu.memory_space<vmem>>, %arg2: memref<2x8x256xf32, #tpu.memory_space<vmem>>, %arg3: memref<8x8xf32, #tpu.memory_space<vmem>>, %arg4: memref<256x16xf32, #tpu.memory_space<vmem>>, %arg5: memref<16x256xf32, #tpu.memory_space<vmem>>, %arg6: memref<24x201xf32, #tpu.memory_space<vmem>>, %arg7: memref<25x256xf32, #tpu.memory_space<vmem>>, %arg8: memref<2x8x256xf32, #tpu.memory_space<vmem>>, %arg9: memref<201x512xf32, #tpu.memory_space<vmem>>) attributes {dimension_semantics = [#tpu.dimension_semantics<parallel>], iteration_bounds = array<i64: 1>, scalar_prefetch = 0 : i64, scratch_operands = 1 : i64, tpu.core_type = #tpu.core_type<tc>, window_params = [{transform_indices = @transform_0, window_bounds = array<i64: 2, 8, 256>}, {transform_indices = @transform_1, window_bounds = array<i64: 2, 8, 256>}, {pipeline_mode = #tpu.pipeline_mode<synchronous>, transform_indices = @transform_2, window_bounds = array<i64: 8, 8>}, {pipeline_mode = #tpu.pipeline_mode<synchronous>, transform_indices = @transform_3, window_bounds = array<i64: 256, 16>}, {pipeline_mode = #tpu.pipeline_mode<synchronous>, transform_indices = @transform_4, window_bounds = array<i64: 16, 256>}, {pipeline_mode = #tpu.pipeline_mode<synchronous>, transform_indices = @transform_5, window_bounds = array<i64: 24, 201>}, {pipeline_mode = #tpu.pipeline_mode<synchronous>, transform_indices = @transform_6, window_bounds = array<i64: 25, 256>}, {transform_indices = @transform_7, window_bounds = array<i64: 2, 8, 256>}]} {
    %cst = arith.constant 1.000000e+00 : f32
    %0 = vector.broadcast %cst : f32 to vector<1x512xf32>
    %c200 = arith.constant 200 : index
    %c0 = arith.constant 0 : index
    %1 = vector.load %arg9[%c200, %c0] : memref<201x512xf32, #tpu.memory_space<vmem>>, vector<1x512xf32>
    tpu.vector_store %arg9[%c200, %c0], %0 {strides = array<i32>} : memref<201x512xf32, #tpu.memory_space<vmem>>, vector<1x512xf32>,
    %c0_0 = arith.constant 0 : index
    %c0_1 = arith.constant 0 : index
    %2 = vector.load %arg3[%c0_0, %c0_1] : memref<8x8xf32, #tpu.memory_space<vmem>>, vector<8x8xf32>
    %c0_2 = arith.constant 0 : index
    %c0_3 = arith.constant 0 : index
    %3 = vector.load %arg4[%c0_2, %c0_3] : memref<256x16xf32, #tpu.memory_space<vmem>>, vector<256x16xf32>
    %c0_4 = arith.constant 0 : index
    %c0_5 = arith.constant 0 : index
    %4 = vector.load %arg5[%c0_4, %c0_5] : memref<16x256xf32, #tpu.memory_space<vmem>>, vector<16x256xf32>
    %c0_6 = arith.constant 0 : index
    %c0_7 = arith.constant 0 : index
    %5 = vector.load %arg7[%c0_6, %c0_7] : memref<25x256xf32, #tpu.memory_space<vmem>>, vector<25x256xf32>
    %c0_8 = arith.constant 0 : index
    %c0_9 = arith.constant 0 : index
    %c0_10 = arith.constant 0 : index
    %6 = vector.load %arg1[%c0_8, %c0_9, %c0_10] : memref<2x8x256xf32, #tpu.memory_space<vmem>>, vector<1x8x256xf32>
    %7 = vector.shape_cast %6 : vector<1x8x256xf32> to vector<8x256xf32>
    %c0_11 = arith.constant 0 : index
    %c0_12 = arith.constant 0 : index
    %c0_13 = arith.constant 0 : index
    %8 = vector.load %arg2[%c0_11, %c0_12, %c0_13] : memref<2x8x256xf32, #tpu.memory_space<vmem>>, vector<1x8x256xf32>
    %9 = vector.shape_cast %8 : vector<1x8x256xf32> to vector<8x256xf32>
    %10 = arith.addf %7, %9 : vector<8x256xf32>
    %11 = vector.extract_strided_slice %10 {offsets = [0, 16], sizes = [8, 240], strides = [1, 1]} : vector<8x256xf32> to vector<8x240xf32>
    %12 = vector.extract_strided_slice %10 {offsets = [0, 0], sizes = [8, 16], strides = [1, 1]} : vector<8x256xf32> to vector<8x16xf32>
    %13 = tpu.concatenate %11, %12 in 1 : vector<8x240xf32>, vector<8x16xf32> -> vector<8x256xf32>
    %14 = arith.maximumf %10, %13 : vector<8x256xf32>
    %15 = vector.extract_strided_slice %10 {offsets = [0, 16], sizes = [8, 240], strides = [1, 1]} : vector<8x256xf32> to vector<8x240xf32>
    %16 = vector.extract_strided_slice %10 {offsets = [0, 0], sizes = [8, 16], strides = [1, 1]} : vector<8x256xf32> to vector<8x16xf32>
    %17 = tpu.concatenate %15, %16 in 1 : vector<8x240xf32>, vector<8x16xf32> -> vector<8x256xf32>
    %18 = arith.addf %10, %17 : vector<8x256xf32>
    %19 = vector.extract_strided_slice %14 {offsets = [0, 32], sizes = [8, 224], strides = [1, 1]} : vector<8x256xf32> to vector<8x224xf32>
    %20 = vector.extract_strided_slice %14 {offsets = [0, 0], sizes = [8, 32], strides = [1, 1]} : vector<8x256xf32> to vector<8x32xf32>
    %21 = tpu.concatenate %19, %20 in 1 : vector<8x224xf32>, vector<8x32xf32> -> vector<8x256xf32>
    %22 = arith.maximumf %14, %21 : vector<8x256xf32>
    %23 = vector.extract_strided_slice %18 {offsets = [0, 32], sizes = [8, 224], strides = [1, 1]} : vector<8x256xf32> to vector<8x224xf32>
    %24 = vector.extract_strided_slice %18 {offsets = [0, 0], sizes = [8, 32], strides = [1, 1]} : vector<8x256xf32> to vector<8x32xf32>
    %25 = tpu.concatenate %23, %24 in 1 : vector<8x224xf32>, vector<8x32xf32> -> vector<8x256xf32>
    %26 = arith.addf %18, %25 : vector<8x256xf32>
    %27 = vector.extract_strided_slice %22 {offsets = [0, 64], sizes = [8, 192], strides = [1, 1]} : vector<8x256xf32> to vector<8x192xf32>
    %28 = vector.extract_strided_slice %22 {offsets = [0, 0], sizes = [8, 64], strides = [1, 1]} : vector<8x256xf32> to vector<8x64xf32>
    %29 = tpu.concatenate %27, %28 in 1 : vector<8x192xf32>, vector<8x64xf32> -> vector<8x256xf32>
    %30 = arith.maximumf %22, %29 : vector<8x256xf32>
    %31 = vector.extract_strided_slice %26 {offsets = [0, 64], sizes = [8, 192], strides = [1, 1]} : vector<8x256xf32> to vector<8x192xf32>
    %32 = vector.extract_strided_slice %26 {offsets = [0, 0], sizes = [8, 64], strides = [1, 1]} : vector<8x256xf32> to vector<8x64xf32>
    %33 = tpu.concatenate %31, %32 in 1 : vector<8x192xf32>, vector<8x64xf32> -> vector<8x256xf32>
    %34 = arith.addf %26, %33 : vector<8x256xf32>
    %35 = vector.extract_strided_slice %30 {offsets = [0, 128], sizes = [8, 128], strides = [1, 1]} : vector<8x256xf32> to vector<8x128xf32>
    %36 = vector.extract_strided_slice %30 {offsets = [0, 0], sizes = [8, 128], strides = [1, 1]} : vector<8x256xf32> to vector<8x128xf32>
    %37 = tpu.concatenate %35, %36 in 1 : vector<8x128xf32>, vector<8x128xf32> -> vector<8x256xf32>
    %38 = arith.maximumf %30, %37 : vector<8x256xf32>
    %39 = vector.extract_strided_slice %34 {offsets = [0, 128], sizes = [8, 128], strides = [1, 1]} : vector<8x256xf32> to vector<8x128xf32>
    %40 = vector.extract_strided_slice %34 {offsets = [0, 0], sizes = [8, 128], strides = [1, 1]} : vector<8x256xf32> to vector<8x128xf32>
    %41 = tpu.concatenate %39, %40 in 1 : vector<8x128xf32>, vector<8x128xf32> -> vector<8x256xf32>
    %42 = arith.addf %34, %41 : vector<8x256xf32>
    %cst_14 = arith.constant 6.250000e-02 : f32
    %43 = vector.broadcast %cst_14 : f32 to vector<8x256xf32>
    %44 = arith.mulf %42, %43 : vector<8x256xf32>
    %45 = arith.addf %38, %44 : vector<8x256xf32>
    %46 = vector.extract_strided_slice %10 {offsets = [0, 1], sizes = [8, 255], strides = [1, 1]} : vector<8x256xf32> to vector<8x255xf32>
    %47 = vector.extract_strided_slice %10 {offsets = [0, 0], sizes = [8, 1], strides = [1, 1]} : vector<8x256xf32> to vector<8x1xf32>
    %48 = tpu.concatenate %46, %47 in 1 : vector<8x255xf32>, vector<8x1xf32> -> vector<8x256xf32>
    %49 = arith.maximumf %10, %48 : vector<8x256xf32>
    %50 = vector.extract_strided_slice %10 {offsets = [0, 1], sizes = [8, 255], strides = [1, 1]} : vector<8x256xf32> to vector<8x255xf32>
    %51 = vector.extract_strided_slice %10 {offsets = [0, 0], sizes = [8, 1], strides = [1, 1]} : vector<8x256xf32> to vector<8x1xf32>
    %52 = tpu.concatenate %50, %51 in 1 : vector<8x255xf32>, vector<8x1xf32> -> vector<8x256xf32>
    %53 = arith.addf %10, %52 : vector<8x256xf32>
    %54 = vector.extract_strided_slice %49 {offsets = [0, 2], sizes = [8, 254], strides = [1, 1]} : vector<8x256xf32> to vector<8x254xf32>
    %55 = vector.extract_strided_slice %49 {offsets = [0, 0], sizes = [8, 2], strides = [1, 1]} : vector<8x256xf32> to vector<8x2xf32>
    %56 = tpu.concatenate %54, %55 in 1 : vector<8x254xf32>, vector<8x2xf32> -> vector<8x256xf32>
    %57 = arith.maximumf %49, %56 : vector<8x256xf32>
    %58 = vector.extract_strided_slice %53 {offsets = [0, 2], sizes = [8, 254], strides = [1, 1]} : vector<8x256xf32> to vector<8x254xf32>
    %59 = vector.extract_strided_slice %53 {offsets = [0, 0], sizes = [8, 2], strides = [1, 1]} : vector<8x256xf32> to vector<8x2xf32>
    %60 = tpu.concatenate %58, %59 in 1 : vector<8x254xf32>, vector<8x2xf32> -> vector<8x256xf32>
    %61 = arith.addf %53, %60 : vector<8x256xf32>
    %62 = vector.extract_strided_slice %57 {offsets = [0, 4], sizes = [8, 252], strides = [1, 1]} : vector<8x256xf32> to vector<8x252xf32>
    %63 = vector.extract_strided_slice %57 {offsets = [0, 0], sizes = [8, 4], strides = [1, 1]} : vector<8x256xf32> to vector<8x4xf32>
    %64 = tpu.concatenate %62, %63 in 1 : vector<8x252xf32>, vector<8x4xf32> -> vector<8x256xf32>
    %65 = arith.maximumf %57, %64 : vector<8x256xf32>
    %66 = vector.extract_strided_slice %61 {offsets = [0, 4], sizes = [8, 252], strides = [1, 1]} : vector<8x256xf32> to vector<8x252xf32>
    %67 = vector.extract_strided_slice %61 {offsets = [0, 0], sizes = [8, 4], strides = [1, 1]} : vector<8x256xf32> to vector<8x4xf32>
    %68 = tpu.concatenate %66, %67 in 1 : vector<8x252xf32>, vector<8x4xf32> -> vector<8x256xf32>
    %69 = arith.addf %61, %68 : vector<8x256xf32>
    %70 = vector.extract_strided_slice %65 {offsets = [0, 8], sizes = [8, 248], strides = [1, 1]} : vector<8x256xf32> to vector<8x248xf32>
    %71 = vector.extract_strided_slice %65 {offsets = [0, 0], sizes = [8, 8], strides = [1, 1]} : vector<8x256xf32> to vector<8x8xf32>
    %72 = tpu.concatenate %70, %71 in 1 : vector<8x248xf32>, vector<8x8xf32> -> vector<8x256xf32>
    %73 = arith.maximumf %65, %72 : vector<8x256xf32>
    %74 = vector.extract_strided_slice %69 {offsets = [0, 8], sizes = [8, 248], strides = [1, 1]} : vector<8x256xf32> to vector<8x248xf32>
    %75 = vector.extract_strided_slice %69 {offsets = [0, 0], sizes = [8, 8], strides = [1, 1]} : vector<8x256xf32> to vector<8x8xf32>
    %76 = tpu.concatenate %74, %75 in 1 : vector<8x248xf32>, vector<8x8xf32> -> vector<8x256xf32>
    %77 = arith.addf %69, %76 : vector<8x256xf32>
    %cst_15 = arith.constant 6.250000e-02 : f32
    %78 = vector.broadcast %cst_15 : f32 to vector<8x256xf32>
    %79 = arith.mulf %77, %78 : vector<8x256xf32>
    %80 = arith.addf %73, %79 : vector<8x256xf32>
    %cst_16 = arith.constant dense<0.000000e+00> : vector<8x16xf32>
    %81 = tpu.matmul %80, %3, %cst_16 {dimension_numbers = #tpu.dot_dimension_numbers<[1], [0], [0], [1], [0, 0, 1, 1], [], []>} : vector<8x256xf32>, vector<256x16xf32>, vector<8x16xf32> -> vector<8x16xf32>
    %cst_17 = arith.constant dense<0.000000e+00> : vector<8x256xf32>
    %82 = tpu.matmul %81, %4, %cst_17 {dimension_numbers = #tpu.dot_dimension_numbers<[1], [0], [0], [1], [0, 0, 1, 1], [], []>} : vector<8x16xf32>, vector<16x256xf32>, vector<8x256xf32> -> vector<8x256xf32>
    %83 = arith.mulf %45, %82 : vector<8x256xf32>
    %cst_18 = arith.constant dense<0.000000e+00> : vector<8x256xf32>
    %84 = tpu.matmul %2, %83, %cst_18 {dimension_numbers = #tpu.dot_dimension_numbers<[1], [0], [0], [1], [0, 0, 1, 1], [], []>} : vector<8x8xf32>, vector<8x256xf32>, vector<8x256xf32> -> vector<8x256xf32>
    %cst_19 = arith.constant dense<0xFF800000> : vector<256xf32>
    %85 = vector.multi_reduction <maximumf>, %84, %cst_19 [0] : vector<8x256xf32> to vector<256xf32>
    %86 = vector.shape_cast %85 : vector<256xf32> to vector<1x256xf32>
    %87 = vector.broadcast %86 : vector<1x256xf32> to vector<8x256xf32>
    %88 = arith.subf %84, %87 : vector<8x256xf32>
    %89 = math.exp %88 : vector<8x256xf32>
    %cst_20 = arith.constant dense<0.000000e+00> : vector<256xf32>
    %90 = vector.multi_reduction <add>, %89, %cst_20 [0] : vector<8x256xf32> to vector<256xf32>
    %91 = vector.shape_cast %90 : vector<256xf32> to vector<1x256xf32>
    %cst_21 = arith.constant 1.000000e+00 : f32
    %92 = vector.broadcast %cst_21 : f32 to vector<1x256xf32>
    %93 = arith.divf %92, %91 : vector<1x256xf32>
    %94 = vector.broadcast %93 : vector<1x256xf32> to vector<8x256xf32>
    %95 = arith.mulf %89, %94 : vector<8x256xf32>
    %96 = arith.mulf %95, %10 : vector<8x256xf32>
    %97 = arith.addf %96, %10 : vector<8x256xf32>
    %98 = vector.extract_strided_slice %97 {offsets = [0, 222], sizes = [8, 34], strides = [1, 1]} : vector<8x256xf32> to vector<8x34xf32>
    %99 = vector.extract_strided_slice %97 {offsets = [0, 0], sizes = [8, 222], strides = [1, 1]} : vector<8x256xf32> to vector<8x222xf32>
    %100 = tpu.concatenate %98, %99 in 1 : vector<8x34xf32>, vector<8x222xf32> -> vector<8x256xf32>
    %101 = vector.extract_strided_slice %5 {offsets = [0, 0], sizes = [1, 256], strides = [1, 1]} : vector<25x256xf32> to vector<1x256xf32>
    %102 = vector.broadcast %101 : vector<1x256xf32> to vector<8x256xf32>
    %103 = arith.mulf %100, %102 : vector<8x256xf32>
    %c0_22 = arith.constant 0 : index
    %c0_23 = arith.constant 0 : index
    %104 = vector.load %arg9[%c0_22, %c0_23] : memref<201x512xf32, #tpu.memory_space<vmem>>, vector<8x256xf32>
    tpu.vector_store %arg9[%c0_22, %c0_23], %103 {strides = array<i32>} : memref<201x512xf32, #tpu.memory_space<vmem>>, vector<8x256xf32>,
    %105 = vector.extract_strided_slice %97 {offsets = [0, 223], sizes = [8, 33], strides = [1, 1]} : vector<8x256xf32> to vector<8x33xf32>
    %106 = vector.extract_strided_slice %97 {offsets = [0, 0], sizes = [8, 223], strides = [1, 1]} : vector<8x256xf32> to vector<8x223xf32>
    %107 = tpu.concatenate %105, %106 in 1 : vector<8x33xf32>, vector<8x223xf32> -> vector<8x256xf32>
    %108 = vector.extract_strided_slice %5 {offsets = [1, 0], sizes = [1, 256], strides = [1, 1]} : vector<25x256xf32> to vector<1x256xf32>
    %109 = vector.broadcast %108 : vector<1x256xf32> to vector<8x256xf32>
    %110 = arith.mulf %107, %109 : vector<8x256xf32>
    %c8 = arith.constant 8 : index
    %c0_24 = arith.constant 0 : index
    %111 = vector.load %arg9[%c8, %c0_24] : memref<201x512xf32, #tpu.memory_space<vmem>>, vector<8x256xf32>
    tpu.vector_store %arg9[%c8, %c0_24], %110 {strides = array<i32>} : memref<201x512xf32, #tpu.memory_space<vmem>>, vector<8x256xf32>,
    %112 = vector.extract_strided_slice %97 {offsets = [0, 224], sizes = [8, 32], strides = [1, 1]} : vector<8x256xf32> to vector<8x32xf32>
    %113 = vector.extract_strided_slice %97 {offsets = [0, 0], sizes = [8, 224], strides = [1, 1]} : vector<8x256xf32> to vector<8x224xf32>
    %114 = tpu.concatenate %112, %113 in 1 : vector<8x32xf32>, vector<8x224xf32> -> vector<8x256xf32>
    %115 = vector.extract_strided_slice %5 {offsets = [2, 0], sizes = [1, 256], strides = [1, 1]} : vector<25x256xf32> to vector<1x256xf32>
    %116 = vector.broadcast %115 : vector<1x256xf32> to vector<8x256xf32>
    %117 = arith.mulf %114, %116 : vector<8x256xf32>
    %c16 = arith.constant 16 : index
    %c0_25 = arith.constant 0 : index
    %118 = vector.load %arg9[%c16, %c0_25] : memref<201x512xf32, #tpu.memory_space<vmem>>, vector<8x256xf32>
    tpu.vector_store %arg9[%c16, %c0_25], %117 {strides = array<i32>} : memref<201x512xf32, #tpu.memory_space<vmem>>, vector<8x256xf32>,
    %119 = vector.extract_strided_slice %97 {offsets = [0, 225], sizes = [8, 31], strides = [1, 1]} : vector<8x256xf32> to vector<8x31xf32>
    %120 = vector.extract_strided_slice %97 {offsets = [0, 0], sizes = [8, 225], strides = [1, 1]} : vector<8x256xf32> to vector<8x225xf32>
    %121 = tpu.concatenate %119, %120 in 1 : vector<8x31xf32>, vector<8x225xf32> -> vector<8x256xf32>
    %122 = vector.extract_strided_slice %5 {offsets = [3, 0], sizes = [1, 256], strides = [1, 1]} : vector<25x256xf32> to vector<1x256xf32>
    %123 = vector.broadcast %122 : vector<1x256xf32> to vector<8x256xf32>
    %124 = arith.mulf %121, %123 : vector<8x256xf32>
    %c24 = arith.constant 24 : index
    %c0_26 = arith.constant 0 : index
    %125 = vector.load %arg9[%c24, %c0_26] : memref<201x512xf32, #tpu.memory_space<vmem>>, vector<8x256xf32>
    tpu.vector_store %arg9[%c24, %c0_26], %124 {strides = array<i32>} : memref<201x512xf32, #tpu.memory_space<vmem>>, vector<8x256xf32>,
    %126 = vector.extract_strided_slice %97 {offsets = [0, 226], sizes = [8, 30], strides = [1, 1]} : vector<8x256xf32> to vector<8x30xf32>
    %127 = vector.extract_strided_slice %97 {offsets = [0, 0], sizes = [8, 226], strides = [1, 1]} : vector<8x256xf32> to vector<8x226xf32>
    %128 = tpu.concatenate %126, %127 in 1 : vector<8x30xf32>, vector<8x226xf32> -> vector<8x256xf32>
    %129 = vector.extract_strided_slice %5 {offsets = [4, 0], sizes = [1, 256], strides = [1, 1]} : vector<25x256xf32> to vector<1x256xf32>
    %130 = vector.broadcast %129 : vector<1x256xf32> to vector<8x256xf32>
    %131 = arith.mulf %128, %130 : vector<8x256xf32>
    %c32 = arith.constant 32 : index
    %c0_27 = arith.constant 0 : index
    %132 = vector.load %arg9[%c32, %c0_27] : memref<201x512xf32, #tpu.memory_space<vmem>>, vector<8x256xf32>
    tpu.vector_store %arg9[%c32, %c0_27], %131 {strides = array<i32>} : memref<201x512xf32, #tpu.memory_space<vmem>>, vector<8x256xf32>,
    %133 = vector.extract_strided_slice %97 {offsets = [0, 238], sizes = [8, 18], strides = [1, 1]} : vector<8x256xf32> to vector<8x18xf32>
    %134 = vector.extract_strided_slice %97 {offsets = [0, 0], sizes = [8, 238], strides = [1, 1]} : vector<8x256xf32> to vector<8x238xf32>
    %135 = tpu.concatenate %133, %134 in 1 : vector<8x18xf32>, vector<8x238xf32> -> vector<8x256xf32>
    %136 = vector.extract_strided_slice %5 {offsets = [5, 0], sizes = [1, 256], strides = [1, 1]} : vector<25x256xf32> to vector<1x256xf32>
    %137 = vector.broadcast %136 : vector<1x256xf32> to vector<8x256xf32>
    %138 = arith.mulf %135, %137 : vector<8x256xf32>
    %c40 = arith.constant 40 : index
    %c0_28 = arith.constant 0 : index
    %139 = vector.load %arg9[%c40, %c0_28] : memref<201x512xf32, #tpu.memory_space<vmem>>, vector<8x256xf32>
    tpu.vector_store %arg9[%c40, %c0_28], %138 {strides = array<i32>} : memref<201x512xf32, #tpu.memory_space<vmem>>, vector<8x256xf32>,
    %140 = vector.extract_strided_slice %97 {offsets = [0, 239], sizes = [8, 17], strides = [1, 1]} : vector<8x256xf32> to vector<8x17xf32>
    %141 = vector.extract_strided_slice %97 {offsets = [0, 0], sizes = [8, 239], strides = [1, 1]} : vector<8x256xf32> to vector<8x239xf32>
    %142 = tpu.concatenate %140, %141 in 1 : vector<8x17xf32>, vector<8x239xf32> -> vector<8x256xf32>
    %143 = vector.extract_strided_slice %5 {offsets = [6, 0], sizes = [1, 256], strides = [1, 1]} : vector<25x256xf32> to vector<1x256xf32>
    %144 = vector.broadcast %143 : vector<1x256xf32> to vector<8x256xf32>
    %145 = arith.mulf %142, %144 : vector<8x256xf32>
    %c48 = arith.constant 48 : index
    %c0_29 = arith.constant 0 : index
    %146 = vector.load %arg9[%c48, %c0_29] : memref<201x512xf32, #tpu.memory_space<vmem>>, vector<8x256xf32>
    tpu.vector_store %arg9[%c48, %c0_29], %145 {strides = array<i32>} : memref<201x512xf32, #tpu.memory_space<vmem>>, vector<8x256xf32>,
    %147 = vector.extract_strided_slice %97 {offsets = [0, 240], sizes = [8, 16], strides = [1, 1]} : vector<8x256xf32> to vector<8x16xf32>
    %148 = vector.extract_strided_slice %97 {offsets = [0, 0], sizes = [8, 240], strides = [1, 1]} : vector<8x256xf32> to vector<8x240xf32>
    %149 = tpu.concatenate %147, %148 in 1 : vector<8x16xf32>, vector<8x240xf32> -> vector<8x256xf32>
    %150 = vector.extract_strided_slice %5 {offsets = [7, 0], sizes = [1, 256], strides = [1, 1]} : vector<25x256xf32> to vector<1x256xf32>
    %151 = vector.broadcast %150 : vector<1x256xf32> to vector<8x256xf32>
    %152 = arith.mulf %149, %151 : vector<8x256xf32>
    %c56 = arith.constant 56 : index
    %c0_30 = arith.constant 0 : index
    %153 = vector.load %arg9[%c56, %c0_30] : memref<201x512xf32, #tpu.memory_space<vmem>>, vector<8x256xf32>
    tpu.vector_store %arg9[%c56, %c0_30], %152 {strides = array<i32>} : memref<201x512xf32, #tpu.memory_space<vmem>>, vector<8x256xf32>,
    %154 = vector.extract_strided_slice %97 {offsets = [0, 241], sizes = [8, 15], strides = [1, 1]} : vector<8x256xf32> to vector<8x15xf32>
    %155 = vector.extract_strided_slice %97 {offsets = [0, 0], sizes = [8, 241], strides = [1, 1]} : vector<8x256xf32> to vector<8x241xf32>
    %156 = tpu.concatenate %154, %155 in 1 : vector<8x15xf32>, vector<8x241xf32> -> vector<8x256xf32>
    %157 = vector.extract_strided_slice %5 {offsets = [8, 0], sizes = [1, 256], strides = [1, 1]} : vector<25x256xf32> to vector<1x256xf32>
    %158 = vector.broadcast %157 : vector<1x256xf32> to vector<8x256xf32>
    %159 = arith.mulf %156, %158 : vector<8x256xf32>
    %c64 = arith.constant 64 : index
    %c0_31 = arith.constant 0 : index
    %160 = vector.load %arg9[%c64, %c0_31] : memref<201x512xf32, #tpu.memory_space<vmem>>, vector<8x256xf32>
    tpu.vector_store %arg9[%c64, %c0_31], %159 {strides = array<i32>} : memref<201x512xf32, #tpu.memory_space<vmem>>, vector<8x256xf32>,
    %161 = vector.extract_strided_slice %97 {offsets = [0, 242], sizes = [8, 14], strides = [1, 1]} : vector<8x256xf32> to vector<8x14xf32>
    %162 = vector.extract_strided_slice %97 {offsets = [0, 0], sizes = [8, 242], strides = [1, 1]} : vector<8x256xf32> to vector<8x242xf32>
    %163 = tpu.concatenate %161, %162 in 1 : vector<8x14xf32>, vector<8x242xf32> -> vector<8x256xf32>
    %164 = vector.extract_strided_slice %5 {offsets = [9, 0], sizes = [1, 256], strides = [1, 1]} : vector<25x256xf32> to vector<1x256xf32>
    %165 = vector.broadcast %164 : vector<1x256xf32> to vector<8x256xf32>
    %166 = arith.mulf %163, %165 : vector<8x256xf32>
    %c72 = arith.constant 72 : index
    %c0_32 = arith.constant 0 : index
    %167 = vector.load %arg9[%c72, %c0_32] : memref<201x512xf32, #tpu.memory_space<vmem>>, vector<8x256xf32>
    tpu.vector_store %arg9[%c72, %c0_32], %166 {strides = array<i32>} : memref<201x512xf32, #tpu.memory_space<vmem>>, vector<8x256xf32>,
    %168 = vector.extract_strided_slice %97 {offsets = [0, 254], sizes = [8, 2], strides = [1, 1]} : vector<8x256xf32> to vector<8x2xf32>
    %169 = vector.extract_strided_slice %97 {offsets = [0, 0], sizes = [8, 254], strides = [1, 1]} : vector<8x256xf32> to vector<8x254xf32>
    %170 = tpu.concatenate %168, %169 in 1 : vector<8x2xf32>, vector<8x254xf32> -> vector<8x256xf32>
    %171 = vector.extract_strided_slice %5 {offsets = [10, 0], sizes = [1, 256], strides = [1, 1]} : vector<25x256xf32> to vector<1x256xf32>
    %172 = vector.broadcast %171 : vector<1x256xf32> to vector<8x256xf32>
    %173 = arith.mulf %170, %172 : vector<8x256xf32>
    %c80 = arith.constant 80 : index
    %c0_33 = arith.constant 0 : index
    %174 = vector.load %arg9[%c80, %c0_33] : memref<201x512xf32, #tpu.memory_space<vmem>>, vector<8x256xf32>
    tpu.vector_store %arg9[%c80, %c0_33], %173 {strides = array<i32>} : memref<201x512xf32, #tpu.memory_space<vmem>>, vector<8x256xf32>,
    %175 = vector.extract_strided_slice %97 {offsets = [0, 255], sizes = [8, 1], strides = [1, 1]} : vector<8x256xf32> to vector<8x1xf32>
    %176 = vector.extract_strided_slice %97 {offsets = [0, 0], sizes = [8, 255], strides = [1, 1]} : vector<8x256xf32> to vector<8x255xf32>
    %177 = tpu.concatenate %175, %176 in 1 : vector<8x1xf32>, vector<8x255xf32> -> vector<8x256xf32>
    %178 = vector.extract_strided_slice %5 {offsets = [11, 0], sizes = [1, 256], strides = [1, 1]} : vector<25x256xf32> to vector<1x256xf32>
    %179 = vector.broadcast %178 : vector<1x256xf32> to vector<8x256xf32>
    %180 = arith.mulf %177, %179 : vector<8x256xf32>
    %c88 = arith.constant 88 : index
    %c0_34 = arith.constant 0 : index
    %181 = vector.load %arg9[%c88, %c0_34] : memref<201x512xf32, #tpu.memory_space<vmem>>, vector<8x256xf32>
    tpu.vector_store %arg9[%c88, %c0_34], %180 {strides = array<i32>} : memref<201x512xf32, #tpu.memory_space<vmem>>, vector<8x256xf32>,
    %c96 = arith.constant 96 : index
    %c0_35 = arith.constant 0 : index
    %182 = vector.load %arg9[%c96, %c0_35] : memref<201x512xf32, #tpu.memory_space<vmem>>, vector<8x256xf32>
    tpu.vector_store %arg9[%c96, %c0_35], %97 {strides = array<i32>} : memref<201x512xf32, #tpu.memory_space<vmem>>, vector<8x256xf32>,
    %183 = vector.extract_strided_slice %97 {offsets = [0, 1], sizes = [8, 255], strides = [1, 1]} : vector<8x256xf32> to vector<8x255xf32>
    %184 = vector.extract_strided_slice %97 {offsets = [0, 0], sizes = [8, 1], strides = [1, 1]} : vector<8x256xf32> to vector<8x1xf32>
    %185 = tpu.concatenate %183, %184 in 1 : vector<8x255xf32>, vector<8x1xf32> -> vector<8x256xf32>
    %186 = vector.extract_strided_slice %5 {offsets = [13, 0], sizes = [1, 256], strides = [1, 1]} : vector<25x256xf32> to vector<1x256xf32>
    %187 = vector.broadcast %186 : vector<1x256xf32> to vector<8x256xf32>
    %188 = arith.mulf %185, %187 : vector<8x256xf32>
    %c104 = arith.constant 104 : index
    %c0_36 = arith.constant 0 : index
    %189 = vector.load %arg9[%c104, %c0_36] : memref<201x512xf32, #tpu.memory_space<vmem>>, vector<8x256xf32>
    tpu.vector_store %arg9[%c104, %c0_36], %188 {strides = array<i32>} : memref<201x512xf32, #tpu.memory_space<vmem>>, vector<8x256xf32>,
    %190 = vector.extract_strided_slice %97 {offsets = [0, 2], sizes = [8, 254], strides = [1, 1]} : vector<8x256xf32> to vector<8x254xf32>
    %191 = vector.extract_strided_slice %97 {offsets = [0, 0], sizes = [8, 2], strides = [1, 1]} : vector<8x256xf32> to vector<8x2xf32>
    %192 = tpu.concatenate %190, %191 in 1 : vector<8x254xf32>, vector<8x2xf32> -> vector<8x256xf32>
    %193 = vector.extract_strided_slice %5 {offsets = [14, 0], sizes = [1, 256], strides = [1, 1]} : vector<25x256xf32> to vector<1x256xf32>
    %194 = vector.broadcast %193 : vector<1x256xf32> to vector<8x256xf32>
    %195 = arith.mulf %192, %194 : vector<8x256xf32>
    %c112 = arith.constant 112 : index
    %c0_37 = arith.constant 0 : index
    %196 = vector.load %arg9[%c112, %c0_37] : memref<201x512xf32, #tpu.memory_space<vmem>>, vector<8x256xf32>
    tpu.vector_store %arg9[%c112, %c0_37], %195 {strides = array<i32>} : memref<201x512xf32, #tpu.memory_space<vmem>>, vector<8x256xf32>,
    %197 = vector.extract_strided_slice %97 {offsets = [0, 14], sizes = [8, 242], strides = [1, 1]} : vector<8x256xf32> to vector<8x242xf32>
    %198 = vector.extract_strided_slice %97 {offsets = [0, 0], sizes = [8, 14], strides = [1, 1]} : vector<8x256xf32> to vector<8x14xf32>
    %199 = tpu.concatenate %197, %198 in 1 : vector<8x242xf32>, vector<8x14xf32> -> vector<8x256xf32>
    %200 = vector.extract_strided_slice %5 {offsets = [15, 0], sizes = [1, 256], strides = [1, 1]} : vector<25x256xf32> to vector<1x256xf32>
    %201 = vector.broadcast %200 : vector<1x256xf32> to vector<8x256xf32>
    %202 = arith.mulf %199, %201 : vector<8x256xf32>
    %c120 = arith.constant 120 : index
    %c0_38 = arith.constant 0 : index
    %203 = vector.load %arg9[%c120, %c0_38] : memref<201x512xf32, #tpu.memory_space<vmem>>, vector<8x256xf32>
    tpu.vector_store %arg9[%c120, %c0_38], %202 {strides = array<i32>} : memref<201x512xf32, #tpu.memory_space<vmem>>, vector<8x256xf32>,
    %204 = vector.extract_strided_slice %97 {offsets = [0, 15], sizes = [8, 241], strides = [1, 1]} : vector<8x256xf32> to vector<8x241xf32>
    %205 = vector.extract_strided_slice %97 {offsets = [0, 0], sizes = [8, 15], strides = [1, 1]} : vector<8x256xf32> to vector<8x15xf32>
    %206 = tpu.concatenate %204, %205 in 1 : vector<8x241xf32>, vector<8x15xf32> -> vector<8x256xf32>
    %207 = vector.extract_strided_slice %5 {offsets = [16, 0], sizes = [1, 256], strides = [1, 1]} : vector<25x256xf32> to vector<1x256xf32>
    %208 = vector.broadcast %207 : vector<1x256xf32> to vector<8x256xf32>
    %209 = arith.mulf %206, %208 : vector<8x256xf32>
    %c128 = arith.constant 128 : index
    %c0_39 = arith.constant 0 : index
    %210 = vector.load %arg9[%c128, %c0_39] : memref<201x512xf32, #tpu.memory_space<vmem>>, vector<8x256xf32>
    tpu.vector_store %arg9[%c128, %c0_39], %209 {strides = array<i32>} : memref<201x512xf32, #tpu.memory_space<vmem>>, vector<8x256xf32>,
    %211 = vector.extract_strided_slice %97 {offsets = [0, 16], sizes = [8, 240], strides = [1, 1]} : vector<8x256xf32> to vector<8x240xf32>
    %212 = vector.extract_strided_slice %97 {offsets = [0, 0], sizes = [8, 16], strides = [1, 1]} : vector<8x256xf32> to vector<8x16xf32>
    %213 = tpu.concatenate %211, %212 in 1 : vector<8x240xf32>, vector<8x16xf32> -> vector<8x256xf32>
    %214 = vector.extract_strided_slice %5 {offsets = [17, 0], sizes = [1, 256], strides = [1, 1]} : vector<25x256xf32> to vector<1x256xf32>
    %215 = vector.broadcast %214 : vector<1x256xf32> to vector<8x256xf32>
    %216 = arith.mulf %213, %215 : vector<8x256xf32>
    %c136 = arith.constant 136 : index
    %c0_40 = arith.constant 0 : index
    %217 = vector.load %arg9[%c136, %c0_40] : memref<201x512xf32, #tpu.memory_space<vmem>>, vector<8x256xf32>
    tpu.vector_store %arg9[%c136, %c0_40], %216 {strides = array<i32>} : memref<201x512xf32, #tpu.memory_space<vmem>>, vector<8x256xf32>,
    %218 = vector.extract_strided_slice %97 {offsets = [0, 17], sizes = [8, 239], strides = [1, 1]} : vector<8x256xf32> to vector<8x239xf32>
    %219 = vector.extract_strided_slice %97 {offsets = [0, 0], sizes = [8, 17], strides = [1, 1]} : vector<8x256xf32> to vector<8x17xf32>
    %220 = tpu.concatenate %218, %219 in 1 : vector<8x239xf32>, vector<8x17xf32> -> vector<8x256xf32>
    %221 = vector.extract_strided_slice %5 {offsets = [18, 0], sizes = [1, 256], strides = [1, 1]} : vector<25x256xf32> to vector<1x256xf32>
    %222 = vector.broadcast %221 : vector<1x256xf32> to vector<8x256xf32>
    %223 = arith.mulf %220, %222 : vector<8x256xf32>
    %c144 = arith.constant 144 : index
    %c0_41 = arith.constant 0 : index
    %224 = vector.load %arg9[%c144, %c0_41] : memref<201x512xf32, #tpu.memory_space<vmem>>, vector<8x256xf32>
    tpu.vector_store %arg9[%c144, %c0_41], %223 {strides = array<i32>} : memref<201x512xf32, #tpu.memory_space<vmem>>, vector<8x256xf32>,
    %225 = vector.extract_strided_slice %97 {offsets = [0, 18], sizes = [8, 238], strides = [1, 1]} : vector<8x256xf32> to vector<8x238xf32>
    %226 = vector.extract_strided_slice %97 {offsets = [0, 0], sizes = [8, 18], strides = [1, 1]} : vector<8x256xf32> to vector<8x18xf32>
    %227 = tpu.concatenate %225, %226 in 1 : vector<8x238xf32>, vector<8x18xf32> -> vector<8x256xf32>
    %228 = vector.extract_strided_slice %5 {offsets = [19, 0], sizes = [1, 256], strides = [1, 1]} : vector<25x256xf32> to vector<1x256xf32>
    %229 = vector.broadcast %228 : vector<1x256xf32> to vector<8x256xf32>
    %230 = arith.mulf %227, %229 : vector<8x256xf32>
    %c152 = arith.constant 152 : index
    %c0_42 = arith.constant 0 : index
    %231 = vector.load %arg9[%c152, %c0_42] : memref<201x512xf32, #tpu.memory_space<vmem>>, vector<8x256xf32>
    tpu.vector_store %arg9[%c152, %c0_42], %230 {strides = array<i32>} : memref<201x512xf32, #tpu.memory_space<vmem>>, vector<8x256xf32>,
    %232 = vector.extract_strided_slice %97 {offsets = [0, 30], sizes = [8, 226], strides = [1, 1]} : vector<8x256xf32> to vector<8x226xf32>
    %233 = vector.extract_strided_slice %97 {offsets = [0, 0], sizes = [8, 30], strides = [1, 1]} : vector<8x256xf32> to vector<8x30xf32>
    %234 = tpu.concatenate %232, %233 in 1 : vector<8x226xf32>, vector<8x30xf32> -> vector<8x256xf32>
    %235 = vector.extract_strided_slice %5 {offsets = [20, 0], sizes = [1, 256], strides = [1, 1]} : vector<25x256xf32> to vector<1x256xf32>
    %236 = vector.broadcast %235 : vector<1x256xf32> to vector<8x256xf32>
    %237 = arith.mulf %234, %236 : vector<8x256xf32>
    %c160 = arith.constant 160 : index
    %c0_43 = arith.constant 0 : index
    %238 = vector.load %arg9[%c160, %c0_43] : memref<201x512xf32, #tpu.memory_space<vmem>>, vector<8x256xf32>
    tpu.vector_store %arg9[%c160, %c0_43], %237 {strides = array<i32>} : memref<201x512xf32, #tpu.memory_space<vmem>>, vector<8x256xf32>,
    %239 = vector.extract_strided_slice %97 {offsets = [0, 31], sizes = [8, 225], strides = [1, 1]} : vector<8x256xf32> to vector<8x225xf32>
    %240 = vector.extract_strided_slice %97 {offsets = [0, 0], sizes = [8, 31], strides = [1, 1]} : vector<8x256xf32> to vector<8x31xf32>
    %241 = tpu.concatenate %239, %240 in 1 : vector<8x225xf32>, vector<8x31xf32> -> vector<8x256xf32>
    %242 = vector.extract_strided_slice %5 {offsets = [21, 0], sizes = [1, 256], strides = [1, 1]} : vector<25x256xf32> to vector<1x256xf32>
    %243 = vector.broadcast %242 : vector<1x256xf32> to vector<8x256xf32>
    %244 = arith.mulf %241, %243 : vector<8x256xf32>
    %c168 = arith.constant 168 : index
    %c0_44 = arith.constant 0 : index
    %245 = vector.load %arg9[%c168, %c0_44] : memref<201x512xf32, #tpu.memory_space<vmem>>, vector<8x256xf32>
    tpu.vector_store %arg9[%c168, %c0_44], %244 {strides = array<i32>} : memref<201x512xf32, #tpu.memory_space<vmem>>, vector<8x256xf32>,
    %246 = vector.extract_strided_slice %97 {offsets = [0, 32], sizes = [8, 224], strides = [1, 1]} : vector<8x256xf32> to vector<8x224xf32>
    %247 = vector.extract_strided_slice %97 {offsets = [0, 0], sizes = [8, 32], strides = [1, 1]} : vector<8x256xf32> to vector<8x32xf32>
    %248 = tpu.concatenate %246, %247 in 1 : vector<8x224xf32>, vector<8x32xf32> -> vector<8x256xf32>
    %249 = vector.extract_strided_slice %5 {offsets = [22, 0], sizes = [1, 256], strides = [1, 1]} : vector<25x256xf32> to vector<1x256xf32>
    %250 = vector.broadcast %249 : vector<1x256xf32> to vector<8x256xf32>
    %251 = arith.mulf %248, %250 : vector<8x256xf32>
    %c176 = arith.constant 176 : index
    %c0_45 = arith.constant 0 : index
    %252 = vector.load %arg9[%c176, %c0_45] : memref<201x512xf32, #tpu.memory_space<vmem>>, vector<8x256xf32>
    tpu.vector_store %arg9[%c176, %c0_45], %251 {strides = array<i32>} : memref<201x512xf32, #tpu.memory_space<vmem>>, vector<8x256xf32>,
    %253 = vector.extract_strided_slice %97 {offsets = [0, 33], sizes = [8, 223], strides = [1, 1]} : vector<8x256xf32> to vector<8x223xf32>
    %254 = vector.extract_strided_slice %97 {offsets = [0, 0], sizes = [8, 33], strides = [1, 1]} : vector<8x256xf32> to vector<8x33xf32>
    %255 = tpu.concatenate %253, %254 in 1 : vector<8x223xf32>, vector<8x33xf32> -> vector<8x256xf32>
    %256 = vector.extract_strided_slice %5 {offsets = [23, 0], sizes = [1, 256], strides = [1, 1]} : vector<25x256xf32> to vector<1x256xf32>
    %257 = vector.broadcast %256 : vector<1x256xf32> to vector<8x256xf32>
    %258 = arith.mulf %255, %257 : vector<8x256xf32>
    %c184 = arith.constant 184 : index
    %c0_46 = arith.constant 0 : index
    %259 = vector.load %arg9[%c184, %c0_46] : memref<201x512xf32, #tpu.memory_space<vmem>>, vector<8x256xf32>
    tpu.vector_store %arg9[%c184, %c0_46], %258 {strides = array<i32>} : memref<201x512xf32, #tpu.memory_space<vmem>>, vector<8x256xf32>,
    %260 = vector.extract_strided_slice %97 {offsets = [0, 34], sizes = [8, 222], strides = [1, 1]} : vector<8x256xf32> to vector<8x222xf32>
    %261 = vector.extract_strided_slice %97 {offsets = [0, 0], sizes = [8, 34], strides = [1, 1]} : vector<8x256xf32> to vector<8x34xf32>
    %262 = tpu.concatenate %260, %261 in 1 : vector<8x222xf32>, vector<8x34xf32> -> vector<8x256xf32>
    %263 = vector.extract_strided_slice %5 {offsets = [24, 0], sizes = [1, 256], strides = [1, 1]} : vector<25x256xf32> to vector<1x256xf32>
    %264 = vector.broadcast %263 : vector<1x256xf32> to vector<8x256xf32>
    %265 = arith.mulf %262, %264 : vector<8x256xf32>
    %c192 = arith.constant 192 : index
    %c0_47 = arith.constant 0 : index
    %266 = vector.load %arg9[%c192, %c0_47] : memref<201x512xf32, #tpu.memory_space<vmem>>, vector<8x256xf32>
    tpu.vector_store %arg9[%c192, %c0_47], %265 {strides = array<i32>} : memref<201x512xf32, #tpu.memory_space<vmem>>, vector<8x256xf32>,
    %c1 = arith.constant 1 : index
    %c0_48 = arith.constant 0 : index
    %c0_49 = arith.constant 0 : index
    %267 = vector.load %arg1[%c1, %c0_48, %c0_49] : memref<2x8x256xf32, #tpu.memory_space<vmem>>, vector<1x8x256xf32>
    %268 = vector.shape_cast %267 : vector<1x8x256xf32> to vector<8x256xf32>
    %c1_50 = arith.constant 1 : index
    %c0_51 = arith.constant 0 : index
    %c0_52 = arith.constant 0 : index
    %269 = vector.load %arg2[%c1_50, %c0_51, %c0_52] : memref<2x8x256xf32, #tpu.memory_space<vmem>>, vector<1x8x256xf32>
    %270 = vector.shape_cast %269 : vector<1x8x256xf32> to vector<8x256xf32>
    %271 = arith.addf %268, %270 : vector<8x256xf32>
    %272 = vector.extract_strided_slice %271 {offsets = [0, 16], sizes = [8, 240], strides = [1, 1]} : vector<8x256xf32> to vector<8x240xf32>
    %273 = vector.extract_strided_slice %271 {offsets = [0, 0], sizes = [8, 16], strides = [1, 1]} : vector<8x256xf32> to vector<8x16xf32>
    %274 = tpu.concatenate %272, %273 in 1 : vector<8x240xf32>, vector<8x16xf32> -> vector<8x256xf32>
    %275 = arith.maximumf %271, %274 : vector<8x256xf32>
    %276 = vector.extract_strided_slice %271 {offsets = [0, 16], sizes = [8, 240], strides = [1, 1]} : vector<8x256xf32> to vector<8x240xf32>
    %277 = vector.extract_strided_slice %271 {offsets = [0, 0], sizes = [8, 16], strides = [1, 1]} : vector<8x256xf32> to vector<8x16xf32>
    %278 = tpu.concatenate %276, %277 in 1 : vector<8x240xf32>, vector<8x16xf32> -> vector<8x256xf32>
    %279 = arith.addf %271, %278 : vector<8x256xf32>
    %280 = vector.extract_strided_slice %275 {offsets = [0, 32], sizes = [8, 224], strides = [1, 1]} : vector<8x256xf32> to vector<8x224xf32>
    %281 = vector.extract_strided_slice %275 {offsets = [0, 0], sizes = [8, 32], strides = [1, 1]} : vector<8x256xf32> to vector<8x32xf32>
    %282 = tpu.concatenate %280, %281 in 1 : vector<8x224xf32>, vector<8x32xf32> -> vector<8x256xf32>
    %283 = arith.maximumf %275, %282 : vector<8x256xf32>
    %284 = vector.extract_strided_slice %279 {offsets = [0, 32], sizes = [8, 224], strides = [1, 1]} : vector<8x256xf32> to vector<8x224xf32>
    %285 = vector.extract_strided_slice %279 {offsets = [0, 0], sizes = [8, 32], strides = [1, 1]} : vector<8x256xf32> to vector<8x32xf32>
    %286 = tpu.concatenate %284, %285 in 1 : vector<8x224xf32>, vector<8x32xf32> -> vector<8x256xf32>
    %287 = arith.addf %279, %286 : vector<8x256xf32>
    %288 = vector.extract_strided_slice %283 {offsets = [0, 64], sizes = [8, 192], strides = [1, 1]} : vector<8x256xf32> to vector<8x192xf32>
    %289 = vector.extract_strided_slice %283 {offsets = [0, 0], sizes = [8, 64], strides = [1, 1]} : vector<8x256xf32> to vector<8x64xf32>
    %290 = tpu.concatenate %288, %289 in 1 : vector<8x192xf32>, vector<8x64xf32> -> vector<8x256xf32>
    %291 = arith.maximumf %283, %290 : vector<8x256xf32>
    %292 = vector.extract_strided_slice %287 {offsets = [0, 64], sizes = [8, 192], strides = [1, 1]} : vector<8x256xf32> to vector<8x192xf32>
    %293 = vector.extract_strided_slice %287 {offsets = [0, 0], sizes = [8, 64], strides = [1, 1]} : vector<8x256xf32> to vector<8x64xf32>
    %294 = tpu.concatenate %292, %293 in 1 : vector<8x192xf32>, vector<8x64xf32> -> vector<8x256xf32>
    %295 = arith.addf %287, %294 : vector<8x256xf32>
    %296 = vector.extract_strided_slice %291 {offsets = [0, 128], sizes = [8, 128], strides = [1, 1]} : vector<8x256xf32> to vector<8x128xf32>
    %297 = vector.extract_strided_slice %291 {offsets = [0, 0], sizes = [8, 128], strides = [1, 1]} : vector<8x256xf32> to vector<8x128xf32>
    %298 = tpu.concatenate %296, %297 in 1 : vector<8x128xf32>, vector<8x128xf32> -> vector<8x256xf32>
    %299 = arith.maximumf %291, %298 : vector<8x256xf32>
    %300 = vector.extract_strided_slice %295 {offsets = [0, 128], sizes = [8, 128], strides = [1, 1]} : vector<8x256xf32> to vector<8x128xf32>
    %301 = vector.extract_strided_slice %295 {offsets = [0, 0], sizes = [8, 128], strides = [1, 1]} : vector<8x256xf32> to vector<8x128xf32>
    %302 = tpu.concatenate %300, %301 in 1 : vector<8x128xf32>, vector<8x128xf32> -> vector<8x256xf32>
    %303 = arith.addf %295, %302 : vector<8x256xf32>
    %cst_53 = arith.constant 6.250000e-02 : f32
    %304 = vector.broadcast %cst_53 : f32 to vector<8x256xf32>
    %305 = arith.mulf %303, %304 : vector<8x256xf32>
    %306 = arith.addf %299, %305 : vector<8x256xf32>
    %307 = vector.extract_strided_slice %271 {offsets = [0, 1], sizes = [8, 255], strides = [1, 1]} : vector<8x256xf32> to vector<8x255xf32>
    %308 = vector.extract_strided_slice %271 {offsets = [0, 0], sizes = [8, 1], strides = [1, 1]} : vector<8x256xf32> to vector<8x1xf32>
    %309 = tpu.concatenate %307, %308 in 1 : vector<8x255xf32>, vector<8x1xf32> -> vector<8x256xf32>
    %310 = arith.maximumf %271, %309 : vector<8x256xf32>
    %311 = vector.extract_strided_slice %271 {offsets = [0, 1], sizes = [8, 255], strides = [1, 1]} : vector<8x256xf32> to vector<8x255xf32>
    %312 = vector.extract_strided_slice %271 {offsets = [0, 0], sizes = [8, 1], strides = [1, 1]} : vector<8x256xf32> to vector<8x1xf32>
    %313 = tpu.concatenate %311, %312 in 1 : vector<8x255xf32>, vector<8x1xf32> -> vector<8x256xf32>
    %314 = arith.addf %271, %313 : vector<8x256xf32>
    %315 = vector.extract_strided_slice %310 {offsets = [0, 2], sizes = [8, 254], strides = [1, 1]} : vector<8x256xf32> to vector<8x254xf32>
    %316 = vector.extract_strided_slice %310 {offsets = [0, 0], sizes = [8, 2], strides = [1, 1]} : vector<8x256xf32> to vector<8x2xf32>
    %317 = tpu.concatenate %315, %316 in 1 : vector<8x254xf32>, vector<8x2xf32> -> vector<8x256xf32>
    %318 = arith.maximumf %310, %317 : vector<8x256xf32>
    %319 = vector.extract_strided_slice %314 {offsets = [0, 2], sizes = [8, 254], strides = [1, 1]} : vector<8x256xf32> to vector<8x254xf32>
    %320 = vector.extract_strided_slice %314 {offsets = [0, 0], sizes = [8, 2], strides = [1, 1]} : vector<8x256xf32> to vector<8x2xf32>
    %321 = tpu.concatenate %319, %320 in 1 : vector<8x254xf32>, vector<8x2xf32> -> vector<8x256xf32>
    %322 = arith.addf %314, %321 : vector<8x256xf32>
    %323 = vector.extract_strided_slice %318 {offsets = [0, 4], sizes = [8, 252], strides = [1, 1]} : vector<8x256xf32> to vector<8x252xf32>
    %324 = vector.extract_strided_slice %318 {offsets = [0, 0], sizes = [8, 4], strides = [1, 1]} : vector<8x256xf32> to vector<8x4xf32>
    %325 = tpu.concatenate %323, %324 in 1 : vector<8x252xf32>, vector<8x4xf32> -> vector<8x256xf32>
    %326 = arith.maximumf %318, %325 : vector<8x256xf32>
    %327 = vector.extract_strided_slice %322 {offsets = [0, 4], sizes = [8, 252], strides = [1, 1]} : vector<8x256xf32> to vector<8x252xf32>
    %328 = vector.extract_strided_slice %322 {offsets = [0, 0], sizes = [8, 4], strides = [1, 1]} : vector<8x256xf32> to vector<8x4xf32>
    %329 = tpu.concatenate %327, %328 in 1 : vector<8x252xf32>, vector<8x4xf32> -> vector<8x256xf32>
    %330 = arith.addf %322, %329 : vector<8x256xf32>
    %331 = vector.extract_strided_slice %326 {offsets = [0, 8], sizes = [8, 248], strides = [1, 1]} : vector<8x256xf32> to vector<8x248xf32>
    %332 = vector.extract_strided_slice %326 {offsets = [0, 0], sizes = [8, 8], strides = [1, 1]} : vector<8x256xf32> to vector<8x8xf32>
    %333 = tpu.concatenate %331, %332 in 1 : vector<8x248xf32>, vector<8x8xf32> -> vector<8x256xf32>
    %334 = arith.maximumf %326, %333 : vector<8x256xf32>
    %335 = vector.extract_strided_slice %330 {offsets = [0, 8], sizes = [8, 248], strides = [1, 1]} : vector<8x256xf32> to vector<8x248xf32>
    %336 = vector.extract_strided_slice %330 {offsets = [0, 0], sizes = [8, 8], strides = [1, 1]} : vector<8x256xf32> to vector<8x8xf32>
    %337 = tpu.concatenate %335, %336 in 1 : vector<8x248xf32>, vector<8x8xf32> -> vector<8x256xf32>
    %338 = arith.addf %330, %337 : vector<8x256xf32>
    %cst_54 = arith.constant 6.250000e-02 : f32
    %339 = vector.broadcast %cst_54 : f32 to vector<8x256xf32>
    %340 = arith.mulf %338, %339 : vector<8x256xf32>
    %341 = arith.addf %334, %340 : vector<8x256xf32>
    %cst_55 = arith.constant dense<0.000000e+00> : vector<8x16xf32>
    %342 = tpu.matmul %341, %3, %cst_55 {dimension_numbers = #tpu.dot_dimension_numbers<[1], [0], [0], [1], [0, 0, 1, 1], [], []>} : vector<8x256xf32>, vector<256x16xf32>, vector<8x16xf32> -> vector<8x16xf32>
    %cst_56 = arith.constant dense<0.000000e+00> : vector<8x256xf32>
    %343 = tpu.matmul %342, %4, %cst_56 {dimension_numbers = #tpu.dot_dimension_numbers<[1], [0], [0], [1], [0, 0, 1, 1], [], []>} : vector<8x16xf32>, vector<16x256xf32>, vector<8x256xf32> -> vector<8x256xf32>
    %344 = arith.mulf %306, %343 : vector<8x256xf32>
    %cst_57 = arith.constant dense<0.000000e+00> : vector<8x256xf32>
    %345 = tpu.matmul %2, %344, %cst_57 {dimension_numbers = #tpu.dot_dimension_numbers<[1], [0], [0], [1], [0, 0, 1, 1], [], []>} : vector<8x8xf32>, vector<8x256xf32>, vector<8x256xf32> -> vector<8x256xf32>
    %cst_58 = arith.constant dense<0xFF800000> : vector<256xf32>
    %346 = vector.multi_reduction <maximumf>, %345, %cst_58 [0] : vector<8x256xf32> to vector<256xf32>
    %347 = vector.shape_cast %346 : vector<256xf32> to vector<1x256xf32>
    %348 = vector.broadcast %347 : vector<1x256xf32> to vector<8x256xf32>
    %349 = arith.subf %345, %348 : vector<8x256xf32>
    %350 = math.exp %349 : vector<8x256xf32>
    %cst_59 = arith.constant dense<0.000000e+00> : vector<256xf32>
    %351 = vector.multi_reduction <add>, %350, %cst_59 [0] : vector<8x256xf32> to vector<256xf32>
    %352 = vector.shape_cast %351 : vector<256xf32> to vector<1x256xf32>
    %cst_60 = arith.constant 1.000000e+00 : f32
    %353 = vector.broadcast %cst_60 : f32 to vector<1x256xf32>
    %354 = arith.divf %353, %352 : vector<1x256xf32>
    %355 = vector.broadcast %354 : vector<1x256xf32> to vector<8x256xf32>
    %356 = arith.mulf %350, %355 : vector<8x256xf32>
    %357 = arith.mulf %356, %271 : vector<8x256xf32>
    %358 = arith.addf %357, %271 : vector<8x256xf32>
    %359 = vector.extract_strided_slice %358 {offsets = [0, 222], sizes = [8, 34], strides = [1, 1]} : vector<8x256xf32> to vector<8x34xf32>
    %360 = vector.extract_strided_slice %358 {offsets = [0, 0], sizes = [8, 222], strides = [1, 1]} : vector<8x256xf32> to vector<8x222xf32>
    %361 = tpu.concatenate %359, %360 in 1 : vector<8x34xf32>, vector<8x222xf32> -> vector<8x256xf32>
    %362 = vector.extract_strided_slice %5 {offsets = [0, 0], sizes = [1, 256], strides = [1, 1]} : vector<25x256xf32> to vector<1x256xf32>
    %363 = vector.broadcast %362 : vector<1x256xf32> to vector<8x256xf32>
    %364 = arith.mulf %361, %363 : vector<8x256xf32>
    %c0_61 = arith.constant 0 : index
    %c256 = arith.constant 256 : index
    %365 = vector.load %arg9[%c0_61, %c256] : memref<201x512xf32, #tpu.memory_space<vmem>>, vector<8x256xf32>
    tpu.vector_store %arg9[%c0_61, %c256], %364 {strides = array<i32>} : memref<201x512xf32, #tpu.memory_space<vmem>>, vector<8x256xf32>,
    %366 = vector.extract_strided_slice %358 {offsets = [0, 223], sizes = [8, 33], strides = [1, 1]} : vector<8x256xf32> to vector<8x33xf32>
    %367 = vector.extract_strided_slice %358 {offsets = [0, 0], sizes = [8, 223], strides = [1, 1]} : vector<8x256xf32> to vector<8x223xf32>
    %368 = tpu.concatenate %366, %367 in 1 : vector<8x33xf32>, vector<8x223xf32> -> vector<8x256xf32>
    %369 = vector.extract_strided_slice %5 {offsets = [1, 0], sizes = [1, 256], strides = [1, 1]} : vector<25x256xf32> to vector<1x256xf32>
    %370 = vector.broadcast %369 : vector<1x256xf32> to vector<8x256xf32>
    %371 = arith.mulf %368, %370 : vector<8x256xf32>
    %c8_62 = arith.constant 8 : index
    %c256_63 = arith.constant 256 : index
    %372 = vector.load %arg9[%c8_62, %c256_63] : memref<201x512xf32, #tpu.memory_space<vmem>>, vector<8x256xf32>
    tpu.vector_store %arg9[%c8_62, %c256_63], %371 {strides = array<i32>} : memref<201x512xf32, #tpu.memory_space<vmem>>, vector<8x256xf32>,
    %373 = vector.extract_strided_slice %358 {offsets = [0, 224], sizes = [8, 32], strides = [1, 1]} : vector<8x256xf32> to vector<8x32xf32>
    %374 = vector.extract_strided_slice %358 {offsets = [0, 0], sizes = [8, 224], strides = [1, 1]} : vector<8x256xf32> to vector<8x224xf32>
    %375 = tpu.concatenate %373, %374 in 1 : vector<8x32xf32>, vector<8x224xf32> -> vector<8x256xf32>
    %376 = vector.extract_strided_slice %5 {offsets = [2, 0], sizes = [1, 256], strides = [1, 1]} : vector<25x256xf32> to vector<1x256xf32>
    %377 = vector.broadcast %376 : vector<1x256xf32> to vector<8x256xf32>
    %378 = arith.mulf %375, %377 : vector<8x256xf32>
    %c16_64 = arith.constant 16 : index
    %c256_65 = arith.constant 256 : index
    %379 = vector.load %arg9[%c16_64, %c256_65] : memref<201x512xf32, #tpu.memory_space<vmem>>, vector<8x256xf32>
    tpu.vector_store %arg9[%c16_64, %c256_65], %378 {strides = array<i32>} : memref<201x512xf32, #tpu.memory_space<vmem>>, vector<8x256xf32>,
    %380 = vector.extract_strided_slice %358 {offsets = [0, 225], sizes = [8, 31], strides = [1, 1]} : vector<8x256xf32> to vector<8x31xf32>
    %381 = vector.extract_strided_slice %358 {offsets = [0, 0], sizes = [8, 225], strides = [1, 1]} : vector<8x256xf32> to vector<8x225xf32>
    %382 = tpu.concatenate %380, %381 in 1 : vector<8x31xf32>, vector<8x225xf32> -> vector<8x256xf32>
    %383 = vector.extract_strided_slice %5 {offsets = [3, 0], sizes = [1, 256], strides = [1, 1]} : vector<25x256xf32> to vector<1x256xf32>
    %384 = vector.broadcast %383 : vector<1x256xf32> to vector<8x256xf32>
    %385 = arith.mulf %382, %384 : vector<8x256xf32>
    %c24_66 = arith.constant 24 : index
    %c256_67 = arith.constant 256 : index
    %386 = vector.load %arg9[%c24_66, %c256_67] : memref<201x512xf32, #tpu.memory_space<vmem>>, vector<8x256xf32>
    tpu.vector_store %arg9[%c24_66, %c256_67], %385 {strides = array<i32>} : memref<201x512xf32, #tpu.memory_space<vmem>>, vector<8x256xf32>,
    %387 = vector.extract_strided_slice %358 {offsets = [0, 226], sizes = [8, 30], strides = [1, 1]} : vector<8x256xf32> to vector<8x30xf32>
    %388 = vector.extract_strided_slice %358 {offsets = [0, 0], sizes = [8, 226], strides = [1, 1]} : vector<8x256xf32> to vector<8x226xf32>
    %389 = tpu.concatenate %387, %388 in 1 : vector<8x30xf32>, vector<8x226xf32> -> vector<8x256xf32>
    %390 = vector.extract_strided_slice %5 {offsets = [4, 0], sizes = [1, 256], strides = [1, 1]} : vector<25x256xf32> to vector<1x256xf32>
    %391 = vector.broadcast %390 : vector<1x256xf32> to vector<8x256xf32>
    %392 = arith.mulf %389, %391 : vector<8x256xf32>
    %c32_68 = arith.constant 32 : index
    %c256_69 = arith.constant 256 : index
    %393 = vector.load %arg9[%c32_68, %c256_69] : memref<201x512xf32, #tpu.memory_space<vmem>>, vector<8x256xf32>
    tpu.vector_store %arg9[%c32_68, %c256_69], %392 {strides = array<i32>} : memref<201x512xf32, #tpu.memory_space<vmem>>, vector<8x256xf32>,
    %394 = vector.extract_strided_slice %358 {offsets = [0, 238], sizes = [8, 18], strides = [1, 1]} : vector<8x256xf32> to vector<8x18xf32>
    %395 = vector.extract_strided_slice %358 {offsets = [0, 0], sizes = [8, 238], strides = [1, 1]} : vector<8x256xf32> to vector<8x238xf32>
    %396 = tpu.concatenate %394, %395 in 1 : vector<8x18xf32>, vector<8x238xf32> -> vector<8x256xf32>
    %397 = vector.extract_strided_slice %5 {offsets = [5, 0], sizes = [1, 256], strides = [1, 1]} : vector<25x256xf32> to vector<1x256xf32>
    %398 = vector.broadcast %397 : vector<1x256xf32> to vector<8x256xf32>
    %399 = arith.mulf %396, %398 : vector<8x256xf32>
    %c40_70 = arith.constant 40 : index
    %c256_71 = arith.constant 256 : index
    %400 = vector.load %arg9[%c40_70, %c256_71] : memref<201x512xf32, #tpu.memory_space<vmem>>, vector<8x256xf32>
    tpu.vector_store %arg9[%c40_70, %c256_71], %399 {strides = array<i32>} : memref<201x512xf32, #tpu.memory_space<vmem>>, vector<8x256xf32>,
    %401 = vector.extract_strided_slice %358 {offsets = [0, 239], sizes = [8, 17], strides = [1, 1]} : vector<8x256xf32> to vector<8x17xf32>
    %402 = vector.extract_strided_slice %358 {offsets = [0, 0], sizes = [8, 239], strides = [1, 1]} : vector<8x256xf32> to vector<8x239xf32>
    %403 = tpu.concatenate %401, %402 in 1 : vector<8x17xf32>, vector<8x239xf32> -> vector<8x256xf32>
    %404 = vector.extract_strided_slice %5 {offsets = [6, 0], sizes = [1, 256], strides = [1, 1]} : vector<25x256xf32> to vector<1x256xf32>
    %405 = vector.broadcast %404 : vector<1x256xf32> to vector<8x256xf32>
    %406 = arith.mulf %403, %405 : vector<8x256xf32>
    %c48_72 = arith.constant 48 : index
    %c256_73 = arith.constant 256 : index
    %407 = vector.load %arg9[%c48_72, %c256_73] : memref<201x512xf32, #tpu.memory_space<vmem>>, vector<8x256xf32>
    tpu.vector_store %arg9[%c48_72, %c256_73], %406 {strides = array<i32>} : memref<201x512xf32, #tpu.memory_space<vmem>>, vector<8x256xf32>,
    %408 = vector.extract_strided_slice %358 {offsets = [0, 240], sizes = [8, 16], strides = [1, 1]} : vector<8x256xf32> to vector<8x16xf32>
    %409 = vector.extract_strided_slice %358 {offsets = [0, 0], sizes = [8, 240], strides = [1, 1]} : vector<8x256xf32> to vector<8x240xf32>
    %410 = tpu.concatenate %408, %409 in 1 : vector<8x16xf32>, vector<8x240xf32> -> vector<8x256xf32>
    %411 = vector.extract_strided_slice %5 {offsets = [7, 0], sizes = [1, 256], strides = [1, 1]} : vector<25x256xf32> to vector<1x256xf32>
    %412 = vector.broadcast %411 : vector<1x256xf32> to vector<8x256xf32>
    %413 = arith.mulf %410, %412 : vector<8x256xf32>
    %c56_74 = arith.constant 56 : index
    %c256_75 = arith.constant 256 : index
    %414 = vector.load %arg9[%c56_74, %c256_75] : memref<201x512xf32, #tpu.memory_space<vmem>>, vector<8x256xf32>
    tpu.vector_store %arg9[%c56_74, %c256_75], %413 {strides = array<i32>} : memref<201x512xf32, #tpu.memory_space<vmem>>, vector<8x256xf32>,
    %415 = vector.extract_strided_slice %358 {offsets = [0, 241], sizes = [8, 15], strides = [1, 1]} : vector<8x256xf32> to vector<8x15xf32>
    %416 = vector.extract_strided_slice %358 {offsets = [0, 0], sizes = [8, 241], strides = [1, 1]} : vector<8x256xf32> to vector<8x241xf32>
    %417 = tpu.concatenate %415, %416 in 1 : vector<8x15xf32>, vector<8x241xf32> -> vector<8x256xf32>
    %418 = vector.extract_strided_slice %5 {offsets = [8, 0], sizes = [1, 256], strides = [1, 1]} : vector<25x256xf32> to vector<1x256xf32>
    %419 = vector.broadcast %418 : vector<1x256xf32> to vector<8x256xf32>
    %420 = arith.mulf %417, %419 : vector<8x256xf32>
    %c64_76 = arith.constant 64 : index
    %c256_77 = arith.constant 256 : index
    %421 = vector.load %arg9[%c64_76, %c256_77] : memref<201x512xf32, #tpu.memory_space<vmem>>, vector<8x256xf32>
    tpu.vector_store %arg9[%c64_76, %c256_77], %420 {strides = array<i32>} : memref<201x512xf32, #tpu.memory_space<vmem>>, vector<8x256xf32>,
    %422 = vector.extract_strided_slice %358 {offsets = [0, 242], sizes = [8, 14], strides = [1, 1]} : vector<8x256xf32> to vector<8x14xf32>
    %423 = vector.extract_strided_slice %358 {offsets = [0, 0], sizes = [8, 242], strides = [1, 1]} : vector<8x256xf32> to vector<8x242xf32>
    %424 = tpu.concatenate %422, %423 in 1 : vector<8x14xf32>, vector<8x242xf32> -> vector<8x256xf32>
    %425 = vector.extract_strided_slice %5 {offsets = [9, 0], sizes = [1, 256], strides = [1, 1]} : vector<25x256xf32> to vector<1x256xf32>
    %426 = vector.broadcast %425 : vector<1x256xf32> to vector<8x256xf32>
    %427 = arith.mulf %424, %426 : vector<8x256xf32>
    %c72_78 = arith.constant 72 : index
    %c256_79 = arith.constant 256 : index
    %428 = vector.load %arg9[%c72_78, %c256_79] : memref<201x512xf32, #tpu.memory_space<vmem>>, vector<8x256xf32>
    tpu.vector_store %arg9[%c72_78, %c256_79], %427 {strides = array<i32>} : memref<201x512xf32, #tpu.memory_space<vmem>>, vector<8x256xf32>,
    %429 = vector.extract_strided_slice %358 {offsets = [0, 254], sizes = [8, 2], strides = [1, 1]} : vector<8x256xf32> to vector<8x2xf32>
    %430 = vector.extract_strided_slice %358 {offsets = [0, 0], sizes = [8, 254], strides = [1, 1]} : vector<8x256xf32> to vector<8x254xf32>
    %431 = tpu.concatenate %429, %430 in 1 : vector<8x2xf32>, vector<8x254xf32> -> vector<8x256xf32>
    %432 = vector.extract_strided_slice %5 {offsets = [10, 0], sizes = [1, 256], strides = [1, 1]} : vector<25x256xf32> to vector<1x256xf32>
    %433 = vector.broadcast %432 : vector<1x256xf32> to vector<8x256xf32>
    %434 = arith.mulf %431, %433 : vector<8x256xf32>
    %c80_80 = arith.constant 80 : index
    %c256_81 = arith.constant 256 : index
    %435 = vector.load %arg9[%c80_80, %c256_81] : memref<201x512xf32, #tpu.memory_space<vmem>>, vector<8x256xf32>
    tpu.vector_store %arg9[%c80_80, %c256_81], %434 {strides = array<i32>} : memref<201x512xf32, #tpu.memory_space<vmem>>, vector<8x256xf32>,
    %436 = vector.extract_strided_slice %358 {offsets = [0, 255], sizes = [8, 1], strides = [1, 1]} : vector<8x256xf32> to vector<8x1xf32>
    %437 = vector.extract_strided_slice %358 {offsets = [0, 0], sizes = [8, 255], strides = [1, 1]} : vector<8x256xf32> to vector<8x255xf32>
    %438 = tpu.concatenate %436, %437 in 1 : vector<8x1xf32>, vector<8x255xf32> -> vector<8x256xf32>
    %439 = vector.extract_strided_slice %5 {offsets = [11, 0], sizes = [1, 256], strides = [1, 1]} : vector<25x256xf32> to vector<1x256xf32>
    %440 = vector.broadcast %439 : vector<1x256xf32> to vector<8x256xf32>
    %441 = arith.mulf %438, %440 : vector<8x256xf32>
    %c88_82 = arith.constant 88 : index
    %c256_83 = arith.constant 256 : index
    %442 = vector.load %arg9[%c88_82, %c256_83] : memref<201x512xf32, #tpu.memory_space<vmem>>, vector<8x256xf32>
    tpu.vector_store %arg9[%c88_82, %c256_83], %441 {strides = array<i32>} : memref<201x512xf32, #tpu.memory_space<vmem>>, vector<8x256xf32>,
    %c96_84 = arith.constant 96 : index
    %c256_85 = arith.constant 256 : index
    %443 = vector.load %arg9[%c96_84, %c256_85] : memref<201x512xf32, #tpu.memory_space<vmem>>, vector<8x256xf32>
    tpu.vector_store %arg9[%c96_84, %c256_85], %358 {strides = array<i32>} : memref<201x512xf32, #tpu.memory_space<vmem>>, vector<8x256xf32>,
    %444 = vector.extract_strided_slice %358 {offsets = [0, 1], sizes = [8, 255], strides = [1, 1]} : vector<8x256xf32> to vector<8x255xf32>
    %445 = vector.extract_strided_slice %358 {offsets = [0, 0], sizes = [8, 1], strides = [1, 1]} : vector<8x256xf32> to vector<8x1xf32>
    %446 = tpu.concatenate %444, %445 in 1 : vector<8x255xf32>, vector<8x1xf32> -> vector<8x256xf32>
    %447 = vector.extract_strided_slice %5 {offsets = [13, 0], sizes = [1, 256], strides = [1, 1]} : vector<25x256xf32> to vector<1x256xf32>
    %448 = vector.broadcast %447 : vector<1x256xf32> to vector<8x256xf32>
    %449 = arith.mulf %446, %448 : vector<8x256xf32>
    %c104_86 = arith.constant 104 : index
    %c256_87 = arith.constant 256 : index
    %450 = vector.load %arg9[%c104_86, %c256_87] : memref<201x512xf32, #tpu.memory_space<vmem>>, vector<8x256xf32>
    tpu.vector_store %arg9[%c104_86, %c256_87], %449 {strides = array<i32>} : memref<201x512xf32, #tpu.memory_space<vmem>>, vector<8x256xf32>,
    %451 = vector.extract_strided_slice %358 {offsets = [0, 2], sizes = [8, 254], strides = [1, 1]} : vector<8x256xf32> to vector<8x254xf32>
    %452 = vector.extract_strided_slice %358 {offsets = [0, 0], sizes = [8, 2], strides = [1, 1]} : vector<8x256xf32> to vector<8x2xf32>
    %453 = tpu.concatenate %451, %452 in 1 : vector<8x254xf32>, vector<8x2xf32> -> vector<8x256xf32>
    %454 = vector.extract_strided_slice %5 {offsets = [14, 0], sizes = [1, 256], strides = [1, 1]} : vector<25x256xf32> to vector<1x256xf32>
    %455 = vector.broadcast %454 : vector<1x256xf32> to vector<8x256xf32>
    %456 = arith.mulf %453, %455 : vector<8x256xf32>
    %c112_88 = arith.constant 112 : index
    %c256_89 = arith.constant 256 : index
    %457 = vector.load %arg9[%c112_88, %c256_89] : memref<201x512xf32, #tpu.memory_space<vmem>>, vector<8x256xf32>
    tpu.vector_store %arg9[%c112_88, %c256_89], %456 {strides = array<i32>} : memref<201x512xf32, #tpu.memory_space<vmem>>, vector<8x256xf32>,
    %458 = vector.extract_strided_slice %358 {offsets = [0, 14], sizes = [8, 242], strides = [1, 1]} : vector<8x256xf32> to vector<8x242xf32>
    %459 = vector.extract_strided_slice %358 {offsets = [0, 0], sizes = [8, 14], strides = [1, 1]} : vector<8x256xf32> to vector<8x14xf32>
    %460 = tpu.concatenate %458, %459 in 1 : vector<8x242xf32>, vector<8x14xf32> -> vector<8x256xf32>
    %461 = vector.extract_strided_slice %5 {offsets = [15, 0], sizes = [1, 256], strides = [1, 1]} : vector<25x256xf32> to vector<1x256xf32>
    %462 = vector.broadcast %461 : vector<1x256xf32> to vector<8x256xf32>
    %463 = arith.mulf %460, %462 : vector<8x256xf32>
    %c120_90 = arith.constant 120 : index
    %c256_91 = arith.constant 256 : index
    %464 = vector.load %arg9[%c120_90, %c256_91] : memref<201x512xf32, #tpu.memory_space<vmem>>, vector<8x256xf32>
    tpu.vector_store %arg9[%c120_90, %c256_91], %463 {strides = array<i32>} : memref<201x512xf32, #tpu.memory_space<vmem>>, vector<8x256xf32>,
    %465 = vector.extract_strided_slice %358 {offsets = [0, 15], sizes = [8, 241], strides = [1, 1]} : vector<8x256xf32> to vector<8x241xf32>
    %466 = vector.extract_strided_slice %358 {offsets = [0, 0], sizes = [8, 15], strides = [1, 1]} : vector<8x256xf32> to vector<8x15xf32>
    %467 = tpu.concatenate %465, %466 in 1 : vector<8x241xf32>, vector<8x15xf32> -> vector<8x256xf32>
    %468 = vector.extract_strided_slice %5 {offsets = [16, 0], sizes = [1, 256], strides = [1, 1]} : vector<25x256xf32> to vector<1x256xf32>
    %469 = vector.broadcast %468 : vector<1x256xf32> to vector<8x256xf32>
    %470 = arith.mulf %467, %469 : vector<8x256xf32>
    %c128_92 = arith.constant 128 : index
    %c256_93 = arith.constant 256 : index
    %471 = vector.load %arg9[%c128_92, %c256_93] : memref<201x512xf32, #tpu.memory_space<vmem>>, vector<8x256xf32>
    tpu.vector_store %arg9[%c128_92, %c256_93], %470 {strides = array<i32>} : memref<201x512xf32, #tpu.memory_space<vmem>>, vector<8x256xf32>,
    %472 = vector.extract_strided_slice %358 {offsets = [0, 16], sizes = [8, 240], strides = [1, 1]} : vector<8x256xf32> to vector<8x240xf32>
    %473 = vector.extract_strided_slice %358 {offsets = [0, 0], sizes = [8, 16], strides = [1, 1]} : vector<8x256xf32> to vector<8x16xf32>
    %474 = tpu.concatenate %472, %473 in 1 : vector<8x240xf32>, vector<8x16xf32> -> vector<8x256xf32>
    %475 = vector.extract_strided_slice %5 {offsets = [17, 0], sizes = [1, 256], strides = [1, 1]} : vector<25x256xf32> to vector<1x256xf32>
    %476 = vector.broadcast %475 : vector<1x256xf32> to vector<8x256xf32>
    %477 = arith.mulf %474, %476 : vector<8x256xf32>
    %c136_94 = arith.constant 136 : index
    %c256_95 = arith.constant 256 : index
    %478 = vector.load %arg9[%c136_94, %c256_95] : memref<201x512xf32, #tpu.memory_space<vmem>>, vector<8x256xf32>
    tpu.vector_store %arg9[%c136_94, %c256_95], %477 {strides = array<i32>} : memref<201x512xf32, #tpu.memory_space<vmem>>, vector<8x256xf32>,
    %479 = vector.extract_strided_slice %358 {offsets = [0, 17], sizes = [8, 239], strides = [1, 1]} : vector<8x256xf32> to vector<8x239xf32>
    %480 = vector.extract_strided_slice %358 {offsets = [0, 0], sizes = [8, 17], strides = [1, 1]} : vector<8x256xf32> to vector<8x17xf32>
    %481 = tpu.concatenate %479, %480 in 1 : vector<8x239xf32>, vector<8x17xf32> -> vector<8x256xf32>
    %482 = vector.extract_strided_slice %5 {offsets = [18, 0], sizes = [1, 256], strides = [1, 1]} : vector<25x256xf32> to vector<1x256xf32>
    %483 = vector.broadcast %482 : vector<1x256xf32> to vector<8x256xf32>
    %484 = arith.mulf %481, %483 : vector<8x256xf32>
    %c144_96 = arith.constant 144 : index
    %c256_97 = arith.constant 256 : index
    %485 = vector.load %arg9[%c144_96, %c256_97] : memref<201x512xf32, #tpu.memory_space<vmem>>, vector<8x256xf32>
    tpu.vector_store %arg9[%c144_96, %c256_97], %484 {strides = array<i32>} : memref<201x512xf32, #tpu.memory_space<vmem>>, vector<8x256xf32>,
    %486 = vector.extract_strided_slice %358 {offsets = [0, 18], sizes = [8, 238], strides = [1, 1]} : vector<8x256xf32> to vector<8x238xf32>
    %487 = vector.extract_strided_slice %358 {offsets = [0, 0], sizes = [8, 18], strides = [1, 1]} : vector<8x256xf32> to vector<8x18xf32>
    %488 = tpu.concatenate %486, %487 in 1 : vector<8x238xf32>, vector<8x18xf32> -> vector<8x256xf32>
    %489 = vector.extract_strided_slice %5 {offsets = [19, 0], sizes = [1, 256], strides = [1, 1]} : vector<25x256xf32> to vector<1x256xf32>
    %490 = vector.broadcast %489 : vector<1x256xf32> to vector<8x256xf32>
    %491 = arith.mulf %488, %490 : vector<8x256xf32>
    %c152_98 = arith.constant 152 : index
    %c256_99 = arith.constant 256 : index
    %492 = vector.load %arg9[%c152_98, %c256_99] : memref<201x512xf32, #tpu.memory_space<vmem>>, vector<8x256xf32>
    tpu.vector_store %arg9[%c152_98, %c256_99], %491 {strides = array<i32>} : memref<201x512xf32, #tpu.memory_space<vmem>>, vector<8x256xf32>,
    %493 = vector.extract_strided_slice %358 {offsets = [0, 30], sizes = [8, 226], strides = [1, 1]} : vector<8x256xf32> to vector<8x226xf32>
    %494 = vector.extract_strided_slice %358 {offsets = [0, 0], sizes = [8, 30], strides = [1, 1]} : vector<8x256xf32> to vector<8x30xf32>
    %495 = tpu.concatenate %493, %494 in 1 : vector<8x226xf32>, vector<8x30xf32> -> vector<8x256xf32>
    %496 = vector.extract_strided_slice %5 {offsets = [20, 0], sizes = [1, 256], strides = [1, 1]} : vector<25x256xf32> to vector<1x256xf32>
    %497 = vector.broadcast %496 : vector<1x256xf32> to vector<8x256xf32>
    %498 = arith.mulf %495, %497 : vector<8x256xf32>
    %c160_100 = arith.constant 160 : index
    %c256_101 = arith.constant 256 : index
    %499 = vector.load %arg9[%c160_100, %c256_101] : memref<201x512xf32, #tpu.memory_space<vmem>>, vector<8x256xf32>
    tpu.vector_store %arg9[%c160_100, %c256_101], %498 {strides = array<i32>} : memref<201x512xf32, #tpu.memory_space<vmem>>, vector<8x256xf32>,
    %500 = vector.extract_strided_slice %358 {offsets = [0, 31], sizes = [8, 225], strides = [1, 1]} : vector<8x256xf32> to vector<8x225xf32>
    %501 = vector.extract_strided_slice %358 {offsets = [0, 0], sizes = [8, 31], strides = [1, 1]} : vector<8x256xf32> to vector<8x31xf32>
    %502 = tpu.concatenate %500, %501 in 1 : vector<8x225xf32>, vector<8x31xf32> -> vector<8x256xf32>
    %503 = vector.extract_strided_slice %5 {offsets = [21, 0], sizes = [1, 256], strides = [1, 1]} : vector<25x256xf32> to vector<1x256xf32>
    %504 = vector.broadcast %503 : vector<1x256xf32> to vector<8x256xf32>
    %505 = arith.mulf %502, %504 : vector<8x256xf32>
    %c168_102 = arith.constant 168 : index
    %c256_103 = arith.constant 256 : index
    %506 = vector.load %arg9[%c168_102, %c256_103] : memref<201x512xf32, #tpu.memory_space<vmem>>, vector<8x256xf32>
    tpu.vector_store %arg9[%c168_102, %c256_103], %505 {strides = array<i32>} : memref<201x512xf32, #tpu.memory_space<vmem>>, vector<8x256xf32>,
    %507 = vector.extract_strided_slice %358 {offsets = [0, 32], sizes = [8, 224], strides = [1, 1]} : vector<8x256xf32> to vector<8x224xf32>
    %508 = vector.extract_strided_slice %358 {offsets = [0, 0], sizes = [8, 32], strides = [1, 1]} : vector<8x256xf32> to vector<8x32xf32>
    %509 = tpu.concatenate %507, %508 in 1 : vector<8x224xf32>, vector<8x32xf32> -> vector<8x256xf32>
    %510 = vector.extract_strided_slice %5 {offsets = [22, 0], sizes = [1, 256], strides = [1, 1]} : vector<25x256xf32> to vector<1x256xf32>
    %511 = vector.broadcast %510 : vector<1x256xf32> to vector<8x256xf32>
    %512 = arith.mulf %509, %511 : vector<8x256xf32>
    %c176_104 = arith.constant 176 : index
    %c256_105 = arith.constant 256 : index
    %513 = vector.load %arg9[%c176_104, %c256_105] : memref<201x512xf32, #tpu.memory_space<vmem>>, vector<8x256xf32>
    tpu.vector_store %arg9[%c176_104, %c256_105], %512 {strides = array<i32>} : memref<201x512xf32, #tpu.memory_space<vmem>>, vector<8x256xf32>,
    %514 = vector.extract_strided_slice %358 {offsets = [0, 33], sizes = [8, 223], strides = [1, 1]} : vector<8x256xf32> to vector<8x223xf32>
    %515 = vector.extract_strided_slice %358 {offsets = [0, 0], sizes = [8, 33], strides = [1, 1]} : vector<8x256xf32> to vector<8x33xf32>
    %516 = tpu.concatenate %514, %515 in 1 : vector<8x223xf32>, vector<8x33xf32> -> vector<8x256xf32>
    %517 = vector.extract_strided_slice %5 {offsets = [23, 0], sizes = [1, 256], strides = [1, 1]} : vector<25x256xf32> to vector<1x256xf32>
    %518 = vector.broadcast %517 : vector<1x256xf32> to vector<8x256xf32>
    %519 = arith.mulf %516, %518 : vector<8x256xf32>
    %c184_106 = arith.constant 184 : index
    %c256_107 = arith.constant 256 : index
    %520 = vector.load %arg9[%c184_106, %c256_107] : memref<201x512xf32, #tpu.memory_space<vmem>>, vector<8x256xf32>
    tpu.vector_store %arg9[%c184_106, %c256_107], %519 {strides = array<i32>} : memref<201x512xf32, #tpu.memory_space<vmem>>, vector<8x256xf32>,
    %521 = vector.extract_strided_slice %358 {offsets = [0, 34], sizes = [8, 222], strides = [1, 1]} : vector<8x256xf32> to vector<8x222xf32>
    %522 = vector.extract_strided_slice %358 {offsets = [0, 0], sizes = [8, 34], strides = [1, 1]} : vector<8x256xf32> to vector<8x34xf32>
    %523 = tpu.concatenate %521, %522 in 1 : vector<8x222xf32>, vector<8x34xf32> -> vector<8x256xf32>
    %524 = vector.extract_strided_slice %5 {offsets = [24, 0], sizes = [1, 256], strides = [1, 1]} : vector<25x256xf32> to vector<1x256xf32>
    %525 = vector.broadcast %524 : vector<1x256xf32> to vector<8x256xf32>
    %526 = arith.mulf %523, %525 : vector<8x256xf32>
    %c192_108 = arith.constant 192 : index
    %c256_109 = arith.constant 256 : index
    %527 = vector.load %arg9[%c192_108, %c256_109] : memref<201x512xf32, #tpu.memory_space<vmem>>, vector<8x256xf32>
    tpu.vector_store %arg9[%c192_108, %c256_109], %526 {strides = array<i32>} : memref<201x512xf32, #tpu.memory_space<vmem>>, vector<8x256xf32>,
    %c0_110 = arith.constant 0 : index
    %c0_111 = arith.constant 0 : index
    %528 = vector.load %arg6[%c0_110, %c0_111] : memref<24x201xf32, #tpu.memory_space<vmem>>, vector<24x201xf32>
    %c0_112 = arith.constant 0 : index
    %c0_113 = arith.constant 0 : index
    %529 = vector.load %arg9[%c0_112, %c0_113] : memref<201x512xf32, #tpu.memory_space<vmem>>, vector<201x512xf32>
    %cst_114 = arith.constant dense<0.000000e+00> : vector<24x512xf32>
    %530 = tpu.matmul %528, %529, %cst_114 {dimension_numbers = #tpu.dot_dimension_numbers<[1], [0], [0], [1], [0, 0, 1, 1], [], []>} : vector<24x201xf32>, vector<201x512xf32>, vector<24x512xf32> -> vector<24x512xf32>
    %531 = vector.extract_strided_slice %530 {offsets = [0, 0], sizes = [8, 512], strides = [1, 1]} : vector<24x512xf32> to vector<8x512xf32>
    %cst_115 = arith.constant 0.000000e+00 : f32
    %532 = vector.broadcast %cst_115 : f32 to vector<8x512xf32>
    %533 = arith.maximumf %531, %532 : vector<8x512xf32>
    %534 = vector.extract_strided_slice %530 {offsets = [8, 0], sizes = [8, 512], strides = [1, 1]} : vector<24x512xf32> to vector<8x512xf32>
    %cst_116 = arith.constant 0.000000e+00 : f32
    %535 = vector.broadcast %cst_116 : f32 to vector<8x512xf32>
    %536 = arith.maximumf %534, %535 : vector<8x512xf32>
    %537 = arith.addf %533, %536 : vector<8x512xf32>
    %538 = vector.extract_strided_slice %530 {offsets = [16, 0], sizes = [8, 512], strides = [1, 1]} : vector<24x512xf32> to vector<8x512xf32>
    %cst_117 = arith.constant 0.000000e+00 : f32
    %539 = vector.broadcast %cst_117 : f32 to vector<8x512xf32>
    %540 = arith.maximumf %538, %539 : vector<8x512xf32>
    %541 = arith.addf %537, %540 : vector<8x512xf32>
    %542 = vector.extract_strided_slice %541 {offsets = [0, 0], sizes = [8, 256], strides = [1, 1]} : vector<8x512xf32> to vector<8x256xf32>
    %c0_118 = arith.constant 0 : index
    %c0_119 = arith.constant 0 : index
    %c0_120 = arith.constant 0 : index
    %543 = vector.load %arg8[%c0_118, %c0_119, %c0_120] : memref<2x8x256xf32, #tpu.memory_space<vmem>>, vector<1x8x256xf32>
    %544 = vector.shape_cast %543 : vector<1x8x256xf32> to vector<8x256xf32>
    %545 = vector.shape_cast %542 : vector<8x256xf32> to vector<1x8x256xf32>
    tpu.vector_store %arg8[%c0_118, %c0_119, %c0_120], %545 {strides = array<i32>} : memref<2x8x256xf32, #tpu.memory_space<vmem>>, vector<1x8x256xf32>,
    %546 = vector.extract_strided_slice %541 {offsets = [0, 256], sizes = [8, 256], strides = [1, 1]} : vector<8x512xf32> to vector<8x256xf32>
    %c1_121 = arith.constant 1 : index
    %c0_122 = arith.constant 0 : index
    %c0_123 = arith.constant 0 : index
    %547 = vector.load %arg8[%c1_121, %c0_122, %c0_123] : memref<2x8x256xf32, #tpu.memory_space<vmem>>, vector<1x8x256xf32>
    %548 = vector.shape_cast %547 : vector<1x8x256xf32> to vector<8x256xf32>
    %549 = vector.shape_cast %546 : vector<8x256xf32> to vector<1x8x256xf32>
    tpu.vector_store %arg8[%c1_121, %c0_122, %c0_123], %549 {strides = array<i32>} : memref<2x8x256xf32, #tpu.memory_space<vmem>>, vector<1x8x256xf32>,
    return
  }
  func.func @transform_0(%arg0: i32) -> (i32, i32, i32) {
    %c0_i32 = arith.constant 0 : i32
    %c0_i32_0 = arith.constant 0 : i32
    %c0_i32_1 = arith.constant 0 : i32
    return %arg0, %c0_i32, %c0_i32_0 : i32, i32, i32
  }
  func.func @transform_1(%arg0: i32) -> (i32, i32, i32) {
    %c0_i32 = arith.constant 0 : i32
    %c0_i32_0 = arith.constant 0 : i32
    %c0_i32_1 = arith.constant 0 : i32
    return %arg0, %c0_i32, %c0_i32_0 : i32, i32, i32
  }
  func.func @transform_2(%arg0: i32) -> (i32, i32) {
    %c0_i32 = arith.constant 0 : i32
    %c0_i32_0 = arith.constant 0 : i32
    %c0_i32_1 = arith.constant 0 : i32
    return %c0_i32, %c0_i32_0 : i32, i32
  }
  func.func @transform_3(%arg0: i32) -> (i32, i32) {
    %c0_i32 = arith.constant 0 : i32
    %c0_i32_0 = arith.constant 0 : i32
    %c0_i32_1 = arith.constant 0 : i32
    return %c0_i32, %c0_i32_0 : i32, i32
  }
  func.func @transform_4(%arg0: i32) -> (i32, i32) {
    %c0_i32 = arith.constant 0 : i32
    %c0_i32_0 = arith.constant 0 : i32
    %c0_i32_1 = arith.constant 0 : i32
    return %c0_i32, %c0_i32_0 : i32, i32
  }
  func.func @transform_5(%arg0: i32) -> (i32, i32) {
    %c0_i32 = arith.constant 0 : i32
    %c0_i32_0 = arith.constant 0 : i32
    %c0_i32_1 = arith.constant 0 : i32
    return %c0_i32, %c0_i32_0 : i32, i32
  }
  func.func @transform_6(%arg0: i32) -> (i32, i32) {
    %c0_i32 = arith.constant 0 : i32
    %c0_i32_0 = arith.constant 0 : i32
    %c0_i32_1 = arith.constant 0 : i32
    return %c0_i32, %c0_i32_0 : i32, i32
  }
  func.func @transform_7(%arg0: i32) -> (i32, i32, i32) {
    %c0_i32 = arith.constant 0 : i32
    %c0_i32_0 = arith.constant 0 : i32
    %c0_i32_1 = arith.constant 0 : i32
    return %arg0, %c0_i32, %c0_i32_0 : i32, i32, i32
  }
}

</mosaic_0001>

<bundles_post_ra>
// kernel: tpu_custom_call.1
= control target key start
LH: loop header
LB: loop body
LE: loop exit
PB: predicated region body
PF: predicated region fallthrough
CT: control target
= control target key end

     0   :  { %s3894_s0 = inlined_call_operand.vmem [shape: f32[2,8,256], index: 0, kind: input, shape index: {}]   ;;  %s3895_s1 = inlined_call_operand.vmem [shape: f32[2,8,256], index: 1, kind: input, shape index: {}]   ;;  %s3896_s2 = inlined_call_operand.vmem [shape: f32[8,8], index: 2, kind: input, shape index: {}]   ;;  %s3897_s3 = inlined_call_operand.vmem [shape: f32[256,16], index: 3, kind: input, shape index: {}]   ;;  %s3898_s4 = inlined_call_operand.vmem [shape: f32[16,256], index: 4, kind: input, shape index: {}]   ;;  %s3899_s5 = inlined_call_operand.vmem [shape: f32[24,201], index: 5, kind: input, shape index: {}]   ;;  %s3900_s6 = inlined_call_operand.vmem [shape: f32[25,256], index: 6, kind: input, shape index: {}]   ;;  %s3901_s7 = inlined_call_operand.hbm [shape: f32[2,8,256], index: 7, kind: output, shape index: {}]  }
   0x1   :  { %v79_v0 = vld [vmem:[%s3894_s0] sm:$0xff]  ;;  %v80_v2 = vld [vmem:[%s3894_s0 + $0x8] sm:$0xff] }
   0x2   :  { %v81_v1 = vld [vmem:[%s3895_s1] sm:$0xff]  ;;  %v82_v4 = vld [vmem:[%s3895_s1 + $0x8] sm:$0xff] }
   0x3   :  { %v2557_v3 = vadd.f32 %v81_v1, %v79_v0 }
   0x4   :  { %12 = vsyncpa [#allocation4], 0  ;;  %s2476_s9 = smov 127   ;;  %v2564_v5 = vadd.f32 %v82_v4, %v80_v2  ;;  %vm163_vm0 = vcmask 1039360   ;;  %s2477_s10 = smov 126   ;;  %vm179_vm1 = vcmask 1031168  }
   0x5   :  { %159 = vrot.lane.b32.xlu0 %v2557_v3, %s2476_s9  ;;  %s2478_s11 = smov 124   ;;  %v51_v26 = vld [vmem:[%s3897_s3 + $0x80] sm:$0xff]  ;;  %v52_v27 = vld [vmem:[%s3897_s3 + $0x88] sm:$0xff]  ;;  %v53_v31 = vld [vmem:[%s3897_s3 + $0x90] sm:$0xff]  ;;  %vm206_vm2 = vcmask 1014784   ;;  %s2479_s16 = smov 120  }
   0x6   :  { %v35_v28 = vld [vmem:[%s3897_s3] sm:$0xff]  ;;  %v2603_v29 = vpack.c.bf16 %v52_v27, %v51_v26  ;;  %v36_v30 = vld [vmem:[%s3897_s3 + $0x8] sm:$0xff]  ;;  %v54_v32 = vld [vmem:[%s3897_s3 + $0x98] sm:$0xff]  ;;  %vm233_vm3 = vcmask 982016   ;;  %vm3936_vm4 = vcmask 916480   ;;  %vm3929_vm5 = vcmask 785408  }
   0x7   :  { %v2618_v33 = vpack.c.bf16 %v36_v30, %v35_v28  ;;  %v2620_v34 = vpack.c.bf16 %v54_v32, %v53_v31  ;;  %v37_v35 = vld [vmem:[%s3897_s3 + $0x10] sm:$0xff]  ;;  %v38_v36 = vld [vmem:[%s3897_s3 + $0x18] sm:$0xff]  ;;  %v55_v37 = vld [vmem:[%s3897_s3 + $0xa0] sm:$0xff]  ;;  %vm328_vm6 = vcmask 130048   ;;  %vm134_vm7 = vcmask 523264   ;;  %s2485_s13 = smov 33  }
   0x8   :  { %2225 = vmatprep.subr.bf16.mxu0 %v2603_v29  ;;  %v56_v38 = vld [vmem:[%s3897_s3 + $0xa8] sm:$0xff]  ;;  %v2636_v39 = vpack.c.bf16 %v38_v36, %v37_v35  ;;  %v39_v41 = vld [vmem:[%s3897_s3 + $0x20] sm:$0xff]  ;;  %v57_v43 = vld [vmem:[%s3897_s3 + $0xb0] sm:$0xff]  ;;  %vm405_vm8 = vcmask 64512   ;;  %s2486_s14 = smov 114   ;;  %s2487_s15 = smov 32  }
   0x9   :  { %161 = vrot.lane.b32.xlu0 %v2564_v5, %s2476_s9  ;;  %2227 = vmatpush3.bf16.msra.mxu0 %v2618_v33  ;;  %v2639_v40 = vpack.c.bf16 %v56_v38, %v55_v37  ;;  %v40_v42 = vld [vmem:[%s3897_s3 + $0x28] sm:$0xff]  ;;  %v58_v44 = vld [vmem:[%s3897_s3 + $0xb8] sm:$0xff]  ;;  %v41_v47 = vld [vmem:[%s3897_s3 + $0x30] sm:$0xff]  ;;  %s2490_s17 = smov 30   ;;  %s2491_s18 = smov 111   ;;  %vm527_vm9 = vcmask 277504  }
   0xa   :  { %2229 = vmatprep.subr.bf16.mxu0 %v2620_v34  ;;  %v2654_v45 = vpack.c.bf16 %v40_v42, %v39_v41  ;;  %v2657_v46 = vpack.c.bf16 %v58_v44, %v57_v43  ;;  %v42_v48 = vld [vmem:[%s3897_s3 + $0x38] sm:$0xff]  ;;  %v59_v49 = vld [vmem:[%s3897_s3 + $0xc0] sm:$0xff]  ;;  %v60_v50 = vld [vmem:[%s3897_s3 + $0xc8] sm:$0xff]  ;;  %s2492_s19 = smov 18   ;;  %s2493_s20 = smov 110   ;;  %vm549_vm10 = vcmask 269312  }
   0xb   :  { %v2672_v51 = vpack.c.bf16 %v42_v48, %v41_v47  ;;  %v2675_v52 = vpack.c.bf16 %v60_v50, %v59_v49  ;;  %v43_v53 = vld [vmem:[%s3897_s3 + $0x40] sm:$0xff]  ;;  %v44_v54 = vld [vmem:[%s3897_s3 + $0x48] sm:$0xff]  ;;  %v61_v55 = vld [vmem:[%s3897_s3 + $0xd0] sm:$0xff]  ;;  %s2494_s21 = smov 17   ;;  %s2495_s22 = smov 98   ;;  %vm571_vm11 = vcmask 261120  }
   0xc   :  { %v62_v56 = vld [vmem:[%s3897_s3 + $0xd8] sm:$0xff]  ;;  %v2690_v57 = vpack.c.bf16 %v44_v54, %v43_v53  ;;  %v45_v59 = vld [vmem:[%s3897_s3 + $0x50] sm:$0xff]  ;;  %v63_v62 = vld [vmem:[%s3897_s3 + $0xe0] sm:$0xff]  ;;  %s2496_s23 = smov 16   ;;  %s2497_s24 = smov 97   ;;  %vm593_vm12 = vcmask 252928  }
   0xd   :  { %2231 = vmatpush3.bf16.msra.mxu0 %v2636_v39  ;;  %v2693_v58 = vpack.c.bf16 %v62_v56, %v61_v55  ;;  %v46_v60 = vld [vmem:[%s3897_s3 + $0x58] sm:$0xff]  ;;  %v64_v63 = vld [vmem:[%s3897_s3 + $0xe8] sm:$0xff]  ;;  %v47_v1 = vld [vmem:[%s3897_s3 + $0x60] sm:$0xff]  ;;  %s2498_s25 = smov 15   ;;  %s2499_s26 = smov 14   ;;  %vm615_vm13 = vcmask 244736  }
   0xe   :  { %2233 = vmatprep.subr.bf16.mxu0 %v2639_v40  ;;  %v2703_v61 = vpack.c.bf16 %v46_v60, %v45_v59  ;;  %v2712_v0 = vpack.c.bf16 %v64_v63, %v63_v62  ;;  %v48_v2 = vld [vmem:[%s3897_s3 + $0x68] sm:$0xff]  ;;  %v2140_v27 = vld [vmem:[%s3895_s1 + $0x10] sm:$0xff]  ;;  %s2500_s27 = smov 2   ;;  %s2501_s28 = smov 1   ;;  %vm3943_vm14 = vcmask 932864   ;;  %vm637_vm15 = vcmask 146432  }
   0xf   :  { %v2720_v4 = vpack.c.bf16 %v48_v2, %v47_v1 }
  0x11   :  { %2235 = vmatpush3.bf16.msra.mxu0 %v2654_v45 }
  0x12   :  { %2237 = vmatprep.subr.bf16.mxu0 %v2657_v46 }
  0x15   :  { %2239 = vmatpush3.bf16.msra.mxu0 %v2672_v51 }
  0x16   :  { %2241 = vmatprep.subr.bf16.mxu0 %v2675_v52 }
  0x19   :  { %2243 = vmatpush3.bf16.msra.mxu0 %v2690_v57 }
  0x1a   :  { %2245 = vmatprep.subr.bf16.mxu0 %v2693_v58 }
  0x1d   :  { %2247 = vmatpush3.bf16.msra.mxu0 %v2703_v61 }
  0x1e   :  { %2249 = vmatprep.subr.bf16.mxu0 %v2712_v0 }
  0x21   :  { %2251 = vmatpush3.bf16.msra.mxu0 %v2720_v4 }
  0x77   :  { %v160_v6 = vpop.permute.xlu0 %159 }
  0x7b   :  { %v162_v7 = vpop.permute.xlu0 %161 }
  0x7c   :  { %v164_v8 = vsel %vm163_vm0, %v160_v6, %v162_v7  ;;  %v168_v11 = vsel %vm163_vm0, %v162_v7, %v160_v6  ;;  %v65_v6 = vld [vmem:[%s3897_s3 + $0xf0] sm:$0xff]  ;;  %v66_v7 = vld [vmem:[%s3897_s3 + $0xf8] sm:$0xff] }
  0x7d   :  { %v171_v9 = vadd.f32 %v164_v8, %v2557_v3  ;;  %v169_v10 = vmax.f32 %v2557_v3, %v164_v8  ;;  %v172_v12 = vadd.f32 %v168_v11, %v2564_v5  ;;  %v170_v13 = vmax.f32 %v2564_v5, %v168_v11 }
  0x7e   :  { %v2730_v8 = vpack.c.bf16 %v66_v7, %v65_v6 }
  0x7f   :  { %189 = vrot.lane.b32.xlu1 %v171_v9, %s2477_s10  ;;  %175 = vrot.lane.b32.xlu0 %v169_v10, %s2477_s10 }
  0x80   :  { %2253 = vmatprep.subr.bf16.mxu0 %v2730_v8 }
  0x83   :  { %191 = vrot.lane.b32.xlu1 %v172_v12, %s2477_s10 }
  0x87   :  { %177 = vrot.lane.b32.xlu1 %v170_v13, %s2477_s10 }
  0xf1   :  { %v190_v14 = vpop.permute.xlu1 %189  ;;  %v176_v20 = vpop.permute.xlu0 %175 }
  0xf5   :  { %v192_v15 = vpop.permute.xlu1 %191 }
  0xf6   :  { %v193_v16 = vsel %vm179_vm1, %v190_v14, %v192_v15  ;;  %v197_v17 = vsel %vm179_vm1, %v192_v15, %v190_v14 }
  0xf7   :  { %v2580_v18 = vadd.f32 %v197_v17, %v172_v12  ;;  %v2582_v19 = vadd.f32 %v193_v16, %v171_v9  ;;  %v49_v9 = vld [vmem:[%s3897_s3 + $0x70] sm:$0xff] }
  0xf9   :  { %218 = vrot.lane.b32.xlu1 %v2580_v18, %s2478_s11  ;;  %v178_v21 = vpop.permute.xlu1 %177  ;;  %216 = vrot.lane.b32.xlu0 %v2582_v19, %s2478_s11 }
  0xfa   :  { %v180_v22 = vsel %vm179_vm1, %v176_v20, %v178_v21  ;;  %v184_v23 = vsel %vm179_vm1, %v178_v21, %v176_v20 }
  0xfb   :  { %v2590_v24 = vmax.f32 %v170_v13, %v184_v23  ;;  %v2592_v25 = vmax.f32 %v169_v10, %v180_v22  ;;  %v50_v10 = vld [vmem:[%s3897_s3 + $0x78] sm:$0xff]  ;;  %s2489_s3 = smov 31  }
  0xfc   :  { %v2738_v11 = vpack.c.bf16 %v50_v10, %v49_v9  ;;  %v2139_v22 = vld [vmem:[%s3894_s0 + $0x18] sm:$0xff] }
  0xfd   :  { %204 = vrot.lane.b32.xlu1 %v2590_v24, %s2478_s11  ;;  %202 = vrot.lane.b32.xlu0 %v2592_v25, %s2478_s11 }
  0xfe   :  { %2255 = vmatpush3.bf16.msra.mxu0 %v2738_v11 }
 0x16b   :  { %v219_v12 = vpop.permute.xlu1 %218  ;;  %v217_v13 = vpop.permute.xlu0 %216 }
 0x16c   :  { %v220_v14 = vsel %vm206_vm2, %v217_v13, %v219_v12  ;;  %v224_v15 = vsel %vm206_vm2, %v219_v12, %v217_v13 }
 0x16d   :  { %v226_v16 = vadd.f32 %v224_v15, %v2580_v18  ;;  %v225_v17 = vadd.f32 %v220_v14, %v2582_v19  ;;  %v2141_v18 = vld [vmem:[%s3895_s1 + $0x18] sm:$0xff]  ;;  %v2138_v19 = vld [vmem:[%s3894_s0 + $0x10] sm:$0xff]  ;;  %s2480_s0 = smov 112   ;;  %s2481_s1 = smov 96  }
 0x16e   :  { %v2766_v31 = vadd.f32 %v2141_v18, %v2139_v22  ;;  %v2768_v32 = vadd.f32 %v2140_v27, %v2138_v19  ;;  %v69_v22 = vld [vmem:[%s3898_s4 + $0x10] sm:$0xff] }
 0x16f   :  { %v205_v20 = vpop.permute.xlu1 %204  ;;  %245 = vrot.lane.b32.xlu1 %v226_v16, %s2479_s16  ;;  %243 = vrot.lane.b32.xlu0 %v225_v17, %s2479_s16  ;;  %v203_v21 = vpop.permute.xlu0 %202 }
 0x170   :  { %v207_v23 = vsel %vm206_vm2, %v203_v21, %v205_v20  ;;  %v211_v26 = vsel %vm206_vm2, %v205_v20, %v203_v21  ;;  %3956 = vst [vmem:[#allocation6_spill] sm:$0xff] %v2766_v31  ;;  %3957 = vst [vmem:[#allocation7_spill] sm:$0xff] %v2768_v32  ;;  %v67_v21 = vld [vmem:[%s3898_s4] sm:$0xff] }
 0x171   :  { %v213_v28 = vmax.f32 %v2590_v24, %v211_v26  ;;  %v212_v30 = vmax.f32 %v2592_v25, %v207_v23  ;;  %v2258_v23 = vpack.c.bf16 %v69_v22, %v67_v21  ;;  %v2482_v26 = vmov 0.0  }
 0x172   :  { %396 = vmatprep.mubr.f32.mxu1 %v2482_v26 }
 0x173   :  { %231 = vrot.lane.b32.xlu1 %v213_v28, %s2479_s16  ;;  %229 = vrot.lane.b32.xlu0 %v212_v30, %s2479_s16 }
 0x177   :  { %1128 = vrot.lane.b32.xlu1 %v2766_v31, %s2476_s9  ;;  %1126 = vrot.lane.b32.xlu0 %v2768_v32, %s2476_s9 }
 0x17b   :  { %89 = vrot.lane.b32.xlu1 %v2564_v5, %s2480_s0  ;;  %87 = vrot.lane.b32.xlu0 %v2557_v3, %s2480_s0 }
 0x1e1   :  { %v246_v24 = vpop.permute.xlu1 %245  ;;  %v244_v25 = vpop.permute.xlu0 %243 }
 0x1e2   :  { %v247_v35 = vsel %vm233_vm3, %v244_v25, %v246_v24  ;;  %v251_v36 = vsel %vm233_vm3, %v246_v24, %v244_v25 }
 0x1e3   :  { %v252_v37 = vadd.f32 %v247_v35, %v225_v17  ;;  %v253_v38 = vadd.f32 %v251_v36, %v226_v16  ;;  %v68_v16 = vld [vmem:[%s3898_s4 + $0x8] sm:$0xff]  ;;  %v70_v17 = vld [vmem:[%s3898_s4 + $0x18] sm:$0xff]  ;;  %s2483_s4 = smov 64  }
 0x1e4   :  { %v2256_v20 = vpack.c.bf16 %v70_v17, %v68_v16 }
 0x1e5   :  { %v232_v41 = vpop.permute.xlu1 %231  ;;  %v230_v42 = vpop.permute.xlu0 %229  ;;  %v254_v47 = vmul.f32 0.0625, %v252_v37  ;;  %v255_v50 = vmul.f32 0.0625, %v253_v38 }
 0x1e6   :  { %v234_v43 = vsel %vm233_vm3, %v230_v42, %v232_v41  ;;  %v238_v44 = vsel %vm233_vm3, %v232_v41, %v230_v42  ;;  %2257 = vmatprep.subr.bf16.mxu1 %v2256_v20  ;;  %2293 = vmatprep.subr.bf16.mxu0 %v2256_v20 }
 0x1e7   :  { %v239_v48 = vmax.f32 %v212_v30, %v234_v43  ;;  %v240_v49 = vmax.f32 %v213_v28, %v238_v44  ;;  %2259 = vmatpush1.bf16.msra.mxu1 %v2258_v23 }
 0x1e9   :  { %v1129_v53 = vpop.permute.xlu1 %1128  ;;  %v1127_v54 = vpop.permute.xlu0 %1126  ;;  %v257_v55 = vadd.f32 %v255_v50, %v240_v49  ;;  %v256_v56 = vadd.f32 %v254_v47, %v239_v48 }
 0x1ea   :  { %v1130_v59 = vsel %vm163_vm0, %v1127_v54, %v1129_v53  ;;  %v1134_v60 = vsel %vm163_vm0, %v1129_v53, %v1127_v54 }
 0x1eb   :  { %322 = vmatprep.mubr.f32.mxu0 %v257_v55  ;;  %v1138_v62 = vadd.f32 %v1134_v60, %v2766_v31  ;;  %v1137_v63 = vadd.f32 %v1130_v59, %v2768_v32  ;;  %v1136_v2 = vmax.f32 %v2766_v31, %v1134_v60  ;;  %v1135_v6 = vmax.f32 %v2768_v32, %v1130_v59 }
 0x1ec   :  { %323 = vmatmul.mubr.f32.vlgmr.msra.gmra.mrb[0].mxu0 %v256_v56 }
 0x1ed   :  { %1156 = vrot.lane.b32.xlu1 %v1138_v62, %s2477_s10  ;;  %1154 = vrot.lane.b32.xlu0 %v1137_v63, %s2477_s10  ;;  %v90_v1 = vpop.permute.xlu1 %89  ;;  %v88_v7 = vpop.permute.xlu0 %87 }
 0x1ee   :  { %v92_v9 = vsel %vm3936_vm4, %v88_v7, %v90_v1  ;;  %v96_v10 = vsel %vm3936_vm4, %v90_v1, %v88_v7  ;;  %2295 = vmatpush1.bf16.msra.mxu0 %v2258_v23  ;;  %1358 = vmatprep.mubr.f32.mxu0 %v2482_v26 }
 0x1ef   :  { %v100_v12 = vadd.f32 %v96_v10, %v2564_v5  ;;  %v99_v13 = vadd.f32 %v92_v9, %v2557_v3  ;;  %v98_v14 = vmax.f32 %v2564_v5, %v96_v10  ;;  %v97_v15 = vmax.f32 %v2557_v3, %v92_v9 }
 0x1f1   :  { %1143 = vrot.lane.b32.xlu1 %v1136_v2, %s2477_s10  ;;  %1141 = vrot.lane.b32.xlu0 %v1135_v6, %s2477_s10 }
 0x1f5   :  { %119 = vrot.lane.b32.xlu1 %v100_v12, %s2481_s1  ;;  %117 = vrot.lane.b32.xlu0 %v99_v13, %s2481_s1 }
 0x1f9   :  { %105 = vrot.lane.b32.xlu1 %v98_v14, %s2481_s1  ;;  %103 = vrot.lane.b32.xlu0 %v97_v15, %s2481_s1 }
 0x25f   :  { %v1157_v18 = vpop.permute.xlu1 %1156  ;;  %v1155_v19 = vpop.permute.xlu0 %1154 }
 0x260   :  { %v1158_v27 = vsel %vm179_vm1, %v1155_v19, %v1157_v18  ;;  %v1162_v28 = vsel %vm179_vm1, %v1157_v18, %v1155_v19 }
 0x261   :  { %v1164_v30 = vadd.f32 %v1162_v28, %v1138_v62  ;;  %v1163_v24 = vadd.f32 %v1158_v27, %v1137_v63 }
 0x263   :  { %v1144_v25 = vpop.permute.xlu1 %1143  ;;  %1182 = vrot.lane.b32.xlu1 %v1164_v30, %s2478_s11  ;;  %1180 = vrot.lane.b32.xlu0 %v1163_v24, %s2478_s11  ;;  %v1142_v35 = vpop.permute.xlu0 %1141 }
 0x264   :  { %v1145_v36 = vsel %vm179_vm1, %v1142_v35, %v1144_v25  ;;  %v1149_v37 = vsel %vm179_vm1, %v1144_v25, %v1142_v35 }
 0x265   :  { %v1151_v38 = vmax.f32 %v1136_v2, %v1149_v37  ;;  %v1150_v41 = vmax.f32 %v1135_v6, %v1145_v36 }
 0x267   :  { %v120_v42 = vpop.permute.xlu1 %119  ;;  %1169 = vrot.lane.b32.xlu1 %v1151_v38, %s2478_s11  ;;  %1167 = vrot.lane.b32.xlu0 %v1150_v41, %s2478_s11  ;;  %v118_v43 = vpop.permute.xlu0 %117 }
 0x268   :  { %v121_v44 = vsel %vm3929_vm5, %v118_v43, %v120_v42  ;;  %v125_v47 = vsel %vm3929_vm5, %v120_v42, %v118_v43 }
 0x269   :  { %v2826_v48 = vadd.f32 %v125_v47, %v100_v12  ;;  %v126_v49 = vadd.f32 %v121_v44, %v99_v13 }
 0x26b   :  { %v106_v50 = vpop.permute.xlu1 %105  ;;  %146 = vrot.lane.b32.xlu1 %v2826_v48, %s2483_s4  ;;  %144 = vrot.lane.b32.xlu0 %v126_v49, %s2483_s4  ;;  %v104_v53 = vpop.permute.xlu0 %103 }
 0x26c   :  { %v108_v54 = vsel %vm3929_vm5, %v104_v53, %v106_v50  ;;  %v112_v55 = vsel %vm3929_vm5, %v106_v50, %v104_v53 }
 0x26d   :  { %v114_v56 = vmax.f32 %v98_v14, %v112_v55  ;;  %v113_v59 = vmax.f32 %v97_v15, %v108_v54 }
 0x26f   :  { %132 = vrot.lane.b32.xlu1 %v114_v56, %s2483_s4  ;;  %130 = vrot.lane.b32.xlu0 %v113_v59, %s2483_s4 }
 0x2bf   :  { %v2186_v60 = vpop.f32.mrb[0].mxu0 }
 0x2c0   :  { %v2187_v62 = vpop.f32.mrb[1].mxu0 }
 0x2c1   :  { %v2188_v63 = vadd.f32 %v2187_v62, %v2186_v60 }
 0x2c3   :  { %2134 = vmatmul.mubr.msk.f32.vlgmr.msra.gmra.mrb[0].mxu1 %vm328_vm6, %v2188_v63 }
 0x2c4   :  { %473 = vmatprep.mubr.f32.mxu1 %v2482_v26 }
 0x2d5   :  { %v1183_v1 = vpop.permute.xlu1 %1182  ;;  %v1181_v2 = vpop.permute.xlu0 %1180 }
 0x2d6   :  { %v1184_v6 = vsel %vm206_vm2, %v1181_v2, %v1183_v1  ;;  %v1188_v7 = vsel %vm206_vm2, %v1183_v1, %v1181_v2 }
 0x2d7   :  { %v1190_v9 = vadd.f32 %v1188_v7, %v1164_v30  ;;  %v2839_v10 = vadd.f32 %v1184_v6, %v1163_v24 }
 0x2d9   :  { %v1170_v12 = vpop.permute.xlu1 %1169  ;;  %1208 = vrot.lane.b32.xlu1 %v1190_v9, %s2479_s16  ;;  %1206 = vrot.lane.b32.xlu0 %v2839_v10, %s2479_s16  ;;  %v1168_v13 = vpop.permute.xlu0 %1167 }
 0x2da   :  { %v1171_v14 = vsel %vm206_vm2, %v1168_v13, %v1170_v12  ;;  %v1175_v15 = vsel %vm206_vm2, %v1170_v12, %v1168_v13  ;;  %vm3930_vm2 = vcmask 924672  }
 0x2db   :  { %v1177_v16 = vmax.f32 %v1151_v38, %v1175_v15  ;;  %v2846_v17 = vmax.f32 %v1150_v41, %v1171_v14 }
 0x2dd   :  { %1195 = vrot.lane.b32.xlu1 %v1177_v16, %s2479_s16  ;;  %1193 = vrot.lane.b32.xlu0 %v2846_v17, %s2479_s16  ;;  %v147_v20 = vpop.permute.xlu1 %146  ;;  %v145_v21 = vpop.permute.xlu0 %144  ;;  %s2488_s16 = smov 113  }
 0x2de   :  { %v148_v42 = vsel %vm134_vm7, %v145_v21, %v147_v20  ;;  %v152_v43 = vsel %vm134_vm7, %v147_v20, %v145_v21 }
 0x2df   :  { %v153_v50 = vadd.f32 %v148_v42, %v126_v49  ;;  %v154_v53 = vadd.f32 %v152_v43, %v2826_v48  ;;  %v2887_v48 = vld [vmem:[%s3896_s2] sm:$0xff]  ;;  %s2484_s2 = smov 34  }
 0x2e1   :  { %1059 = vrot.lane.b32.xlu1 %v2766_v31, %s2480_s0  ;;  %1057 = vrot.lane.b32.xlu0 %v2768_v32, %s2480_s0  ;;  %v133_v22 = vpop.permute.xlu1 %132  ;;  %v131_v23 = vpop.permute.xlu0 %130  ;;  %v156_v60 = vadd.f32 %v154_v53, %v153_v50 }
 0x2e2   :  { %v135_v44 = vsel %vm134_vm7, %v131_v23, %v133_v22  ;;  %v139_v47 = vsel %vm134_vm7, %v133_v22, %v131_v23 }
 0x2e3   :  { %v140_v54 = vmax.f32 %v113_v59, %v135_v44  ;;  %v141_v55 = vmax.f32 %v114_v56, %v139_v47  ;;  %v157_v2 = vmul.f32 0.0625, %v156_v60 }
 0x2e5   :  { %v155_v63 = vmax.f32 %v140_v54, %v141_v55 }
 0x2e7   :  { %v158_v7 = vadd.f32 %v157_v2, %v155_v63 }
 0x34b   :  { %v1209_v18 = vpop.permute.xlu1 %1208  ;;  %v1207_v19 = vpop.permute.xlu0 %1206 }
 0x34c   :  { %v1214_v62 = vsel %vm233_vm3, %v1209_v18, %v1207_v19 }
 0x34d   :  { %v1216_v6 = vadd.f32 %v1214_v62, %v1190_v9 }
 0x34f   :  { %v1196_v27 = vpop.permute.xlu1 %1195  ;;  %v1194_v28 = vpop.permute.xlu0 %1193  ;;  %v1218_v20 = vmul.f32 0.0625, %v1216_v6 }
 0x350   :  { %v1201_v1 = vsel %vm233_vm3, %v1196_v27, %v1194_v28 }
 0x351   :  { %v1203_v13 = vmax.f32 %v1177_v16, %v1201_v1 }
 0x353   :  { %v1060_v30 = vpop.permute.xlu1 %1059  ;;  %v1058_v24 = vpop.permute.xlu0 %1057  ;;  %v1220_v49 = vadd.f32 %v1218_v20, %v1203_v13 }
 0x354   :  { %v1061_v25 = vsel %vm3936_vm4, %v1058_v24, %v1060_v30  ;;  %v1065_v35 = vsel %vm3936_vm4, %v1060_v30, %v1058_v24 }
 0x355   :  { %v2858_v36 = vadd.f32 %v1065_v35, %v2766_v31  ;;  %v2861_v37 = vadd.f32 %v1061_v25, %v2768_v32  ;;  %v2868_v38 = vmax.f32 %v2766_v31, %v1065_v35  ;;  %v2871_v41 = vmax.f32 %v2768_v32, %v1061_v25 }
 0x357   :  { %1087 = vrot.lane.b32.xlu1 %v2858_v36, %s2481_s1  ;;  %1085 = vrot.lane.b32.xlu0 %v2861_v37, %s2481_s1 }
 0x35b   :  { %1074 = vrot.lane.b32.xlu1 %v2868_v38, %s2481_s1  ;;  %1072 = vrot.lane.b32.xlu0 %v2871_v41, %s2481_s1 }
 0x396   :  { %v398_v12 = vpop.f32.mrb[0].mxu1 }
 0x397   :  { %v400_v14 = vpop.f32.mrb[1].mxu1  ;;  %v403_v21 = vmul.f32 %v398_v12, %v158_v7 }
 0x398   :  { %v404_v15 = vmul.f32 %v400_v14, %v158_v7 }
 0x39a   :  { %409 = vmatprep.subr.mxu1 %v404_v15 }
 0x39b   :  { %410 = vmatpush1.msra.mxu1 %v403_v21 }
 0x39c   :  { %2135 = vmatmul.mubr.msk.f32.vlgmr.msra.gmra.mrb[2].mxu1 %vm405_vm8, %v2887_v48  ;;  %2261 = vmatprep.subr.bf16.mxu1 %v2603_v29  ;;  %v1210_v29 = vsel %vm233_vm3, %v1207_v19, %v1209_v18 }
 0x39d   :  { %2263 = vmatpush3.bf16.msra.mxu1 %v2618_v33  ;;  %1285 = vmatprep.mubr.f32.mxu1 %v1220_v49  ;;  %v1197_v33 = vsel %vm233_vm3, %v1194_v28, %v1196_v27  ;;  %vm659_vm3 = vcmask 138240  }
 0x39e   :  { %2265 = vmatprep.subr.bf16.mxu1 %v2620_v34  ;;  %v1215_v34 = vadd.f32 %v1210_v29, %v2839_v10 }
 0x3a1   :  { %2267 = vmatpush3.bf16.msra.mxu1 %v2636_v39  ;;  %v1202_v39 = vmax.f32 %v2846_v17, %v1197_v33 }
 0x3a2   :  { %2269 = vmatprep.subr.bf16.mxu1 %v2639_v40  ;;  %v1217_v40 = vmul.f32 0.0625, %v1215_v34 }
 0x3a5   :  { %2271 = vmatpush3.bf16.msra.mxu1 %v2654_v45  ;;  %v1219_v45 = vadd.f32 %v1217_v40, %v1202_v39 }
 0x3a6   :  { %2273 = vmatprep.subr.bf16.mxu1 %v2657_v46 }
 0x3a9   :  { %2275 = vmatpush3.bf16.msra.mxu1 %v2672_v51 }
 0x3aa   :  { %2277 = vmatprep.subr.bf16.mxu1 %v2675_v52 }
 0x3ad   :  { %2279 = vmatpush3.bf16.msra.mxu1 %v2690_v57 }
 0x3ae   :  { %2281 = vmatprep.subr.bf16.mxu1 %v2693_v58 }
 0x3b1   :  { %2283 = vmatpush3.bf16.msra.mxu1 %v2703_v61 }
 0x3b2   :  { %2285 = vmatprep.subr.bf16.mxu1 %v2712_v0 }
 0x3b5   :  { %2287 = vmatpush3.bf16.msra.mxu1 %v2720_v4 }
 0x3b6   :  { %2289 = vmatprep.subr.bf16.mxu1 %v2730_v8 }
 0x3b9   :  { %2291 = vmatpush3.bf16.msra.mxu1 %v2738_v11 }
 0x3bc   :  { %1286 = vmatmul.mubr.f32.vlgmr.msra.gmra.mrb[4].mxu1 %v1219_v45 }
 0x3c9   :  { %v1088_v46 = vpop.permute.xlu1 %1087  ;;  %v1086_v51 = vpop.permute.xlu0 %1085 }
 0x3ca   :  { %v1089_v52 = vsel %vm3929_vm5, %v1086_v51, %v1088_v46  ;;  %v1093_v57 = vsel %vm3929_vm5, %v1088_v46, %v1086_v51 }
 0x3cb   :  { %v2914_v58 = vadd.f32 %v1093_v57, %v2858_v36  ;;  %v2917_v61 = vadd.f32 %v1089_v52, %v2861_v37 }
 0x3cd   :  { %v1075_v0 = vpop.permute.xlu1 %1074  ;;  %1113 = vrot.lane.b32.xlu1 %v2914_v58, %s2483_s4  ;;  %1111 = vrot.lane.b32.xlu0 %v2917_v61, %s2483_s4  ;;  %v1073_v4 = vpop.permute.xlu0 %1072 }
 0x3ce   :  { %v1076_v8 = vsel %vm3929_vm5, %v1073_v4, %v1075_v0  ;;  %v1080_v11 = vsel %vm3929_vm5, %v1075_v0, %v1073_v4  ;;  %vm3942_vm5 = vcmask 908288  }
 0x3cf   :  { %v2926_v56 = vmax.f32 %v2868_v38, %v1080_v11  ;;  %v2929_v59 = vmax.f32 %v2871_v41, %v1076_v8 }
 0x3d1   :  { %1100 = vrot.lane.b32.xlu1 %v2926_v56, %s2483_s4  ;;  %1098 = vrot.lane.b32.xlu0 %v2929_v59, %s2483_s4 }
 0x46f   :  { %v475_v9 = vpop.f32.mrb[2].mxu1 }
 0x470   :  { %v480_v10 = vrot.slane %v475_v9, 4  ;;  %v477_v16 = vpop.f32.mrb[3].mxu1 }
 0x471   :  { %v486_v17 = vrot.slane %v477_v16, 4 }
 0x472   :  { %v481_v22 = vmax.f32 %v475_v9, %v480_v10 }
 0x473   :  { %v487_v23 = vmax.f32 %v477_v16, %v486_v17 }
 0x474   :  { %v482_v18 = vrot.slane %v481_v22, 2 }
 0x475   :  { %v488_v19 = vrot.slane %v487_v23, 2 }
 0x476   :  { %v483_v27 = vmax.f32 %v481_v22, %v482_v18 }
 0x477   :  { %v489_v28 = vmax.f32 %v487_v23, %v488_v19 }
 0x478   :  { %v484_v30 = vrot.slane %v483_v27, 1 }
 0x479   :  { %v490_v24 = vrot.slane %v489_v28, 1 }
 0x47a   :  { %v485_v25 = vmax.f32 %v483_v27, %v484_v30  ;;  %v3074_v30 = vld [vmem:[%s3900_s6 + $0x8] sm:$0xff] }
 0x47b   :  { %v491_v35 = vmax.f32 %v489_v28, %v490_v24  ;;  %v3069_v28 = vld [vmem:[%s3900_s6] sm:$0xff] }
 0x47c   :  { %v492_v36 = vsub.f32 %v475_v9, %v485_v25 }
 0x47d   :  { %v493_v37 = vsub.f32 %v477_v16, %v491_v35  ;;  %v3902_v16 = vlaneseq }
 0x47e   :  { %v494_v38 = vmul.f32 1.442695, %v492_v36 }
 0x47f   :  { %v496_v41 = vmul.f32 1.442695, %v493_v37  ;;  %v533_v23 = vshrl.u32 %v3902_v16, 7 }
 0x480   :  { %2436 = vpow2.f32 %v494_v38 }
 0x481   :  { %2438 = vpow2.f32 %v496_v41  ;;  %v3064_v27 = vsub.s32 0, %v533_v23  ;;  %v3088_v37 = vsub.s32 1, %v533_v23 }
 0x483   :  { %v3082_v35 = vrot.slane %v3069_v28, %v3064_v27  ;;  %v3086_v36 = vrot.slane %v3074_v30, %v3064_v27 }
 0x485   :  { %3960 = vst [vmem:[#allocation10_spill] sm:$0xff] %v3082_v35  ;;  %3961 = vst [vmem:[#allocation11_spill] sm:$0xff] %v3086_v36 }
 0x48a   :  { %v2437_v42 = vpop.eup %2436 }
 0x48b   :  { %v2439_v43 = vpop.eup %2438  ;;  %v498_v44 = vrot.slane %v2437_v42, 4 }
 0x48c   :  { %v504_v47 = vrot.slane %v2439_v43, 4 }
 0x48d   :  { %v499_v50 = vadd.f32 %v2437_v42, %v498_v44  ;;  %v3094_v44 = vsub.s32 2, %v533_v23 }
 0x48e   :  { %v505_v53 = vadd.f32 %v2439_v43, %v504_v47 }
 0x48f   :  { %v500_v54 = vrot.slane %v499_v50, 2  ;;  %v2221_v55 = vpop.f32.mrb[4].mxu1 }
 0x490   :  { %v506_v60 = vrot.slane %v505_v53, 2  ;;  %v2222_v62 = vpop.f32.mrb[5].mxu1 }
 0x491   :  { %v501_v63 = vadd.f32 %v500_v54, %v499_v50  ;;  %v2223_v1 = vadd.f32 %v2222_v62, %v2221_v55  ;;  %v3108_v54 = vrot.slane %v3074_v30, %v3088_v37  ;;  %v3112_v62 = vsub.s32 5, %v533_v23 }
 0x492   :  { %v507_v2 = vadd.f32 %v506_v60, %v505_v53  ;;  %v3104_v53 = vrot.slane %v3069_v28, %v3088_v37 }
 0x493   :  { %v502_v6 = vrot.slane %v501_v63, 1  ;;  %2142 = vmatmul.mubr.msk.f32.vlgmr.msra.gmra.mrb[2].mxu0 %vm328_vm6, %v2223_v1  ;;  %3963 = vst [vmem:[#allocation13_spill] sm:$0xff] %v3108_v54 }
 0x494   :  { %v508_v7 = vrot.slane %v507_v2, 1  ;;  %1431 = vmatprep.mubr.f32.mxu0 %v2482_v26  ;;  %3962 = vst [vmem:[#allocation12_spill] sm:$0xff] %v3104_v53 }
 0x495   :  { %v503_v12 = vadd.f32 %v502_v6, %v501_v63  ;;  %v3123_v6 = vld [vmem:[%s3900_s6 + $0x10] sm:$0xff] }
 0x496   :  { %v509_v13 = vadd.f32 %v508_v7, %v507_v2  ;;  %v3118_v2 = vrot.slane %v3069_v28, %v3094_v44 }
 0x497   :  { %2440 = vrcp.f32 %v503_v12 }
 0x498   :  { %2442 = vrcp.f32 %v509_v13  ;;  %3964 = vst [vmem:[#allocation14_spill] sm:$0xff] %v3118_v2  ;;  %v3133_v13 = vrot.slane %v3074_v30, %v3094_v44 }
 0x49a   :  { %3965 = vst [vmem:[#allocation15_spill] sm:$0xff] %v3133_v13 }
 0x4a1   :  { %v2441_v14 = vpop.eup %2440 }
 0x4a2   :  { %v2443_v15 = vpop.eup %2442  ;;  %v514_v20 = vmul.f32 %v2441_v14, %v2437_v42  ;;  %v3138_v14 = vld [vmem:[%s3900_s6 + $0x18] sm:$0xff] }
 0x4a3   :  { %v515_v21 = vmul.f32 %v2443_v15, %v2439_v43  ;;  %v3140_v15 = vsub.s32 3, %v533_v23 }
 0x4a4   :  { %v516_v49 = vmul.f32 %v514_v20, %v2557_v3  ;;  %v3142_v20 = vsub.s32 6, %v533_v23 }
 0x4a5   :  { %v517_v29 = vmul.f32 %v515_v21, %v2564_v5 }
 0x4a6   :  { %v2940_v33 = vadd.f32 %v516_v49, %v2557_v3  ;;  %v3029_v3 = vpop.permute.xlu1 %1113  ;;  %3966 = vst [vmem:[#allocation16_spill] sm:$0xff] %v3142_v20 }
 0x4a7   :  { %v2943_v34 = vadd.f32 %v517_v29, %v2564_v5  ;;  %v3031_v5 = vpop.permute.xlu0 %1111  ;;  %v3148_v29 = vrot.slane %v3123_v6, %v3112_v62 }
 0x4a8   :  { %3958 = vst [vmem:[#allocation8_spill] sm:$0xff] %v2940_v33  ;;  %787 = vrot.lane.b32.xlu0 %v2940_v33, %s2476_s9  ;;  %525 = vrot.lane.b32.xlu1 %v2940_v33, %s2484_s2 }
 0x4a9   :  { %3959 = vst [vmem:[#allocation9_spill] sm:$0xff] %v2943_v34  ;;  %3967 = vst [vmem:[#allocation17_spill] sm:$0xff] %v3148_v29 }
 0x4aa   :  { %v3033_v26 = vpop.permute.xlu1 %1100 }
 0x4ab   :  { %v3035_v39 = vpop.permute.xlu0 %1098 }
 0x4ac   :  { %808 = vrot.lane.b32.xlu0 %v2940_v33, %s2477_s10  ;;  %547 = vrot.lane.b32.xlu1 %v2940_v33, %s2485_s13 }
 0x4b0   :  { %829 = vrot.lane.b32.xlu0 %v2940_v33, %s2486_s14  ;;  %569 = vrot.lane.b32.xlu1 %v2940_v33, %s2487_s15 }
 0x4b4   :  { %851 = vrot.lane.b32.xlu0 %v2940_v33, %s2488_s16  ;;  %591 = vrot.lane.b32.xlu1 %v2940_v33, %s2489_s3 }
 0x4b8   :  { %873 = vrot.lane.b32.xlu0 %v2940_v33, %s2480_s0  ;;  %613 = vrot.lane.b32.xlu1 %v2940_v33, %s2490_s17 }
 0x4bc   :  { %894 = vrot.lane.b32.xlu0 %v2940_v33, %s2491_s18  ;;  %635 = vrot.lane.b32.xlu1 %v2940_v33, %s2492_s19 }
 0x4c0   :  { %916 = vrot.lane.b32.xlu0 %v2940_v33, %s2493_s20  ;;  %657 = vrot.lane.b32.xlu1 %v2940_v33, %s2494_s21 }
 0x4c4   :  { %938 = vrot.lane.b32.xlu0 %v2940_v33, %s2495_s22  ;;  %679 = vrot.lane.b32.xlu1 %v2940_v33, %s2496_s23 }
 0x4c8   :  { %960 = vrot.lane.b32.xlu0 %v2940_v33, %s2497_s24  ;;  %700 = vrot.lane.b32.xlu1 %v2940_v33, %s2498_s25 }
 0x4cc   :  { %722 = vrot.lane.b32.xlu1 %v2940_v33, %s2499_s26  ;;  %521 = vrot.lane.b32.xlu0 %v2943_v34, %s2484_s2 }
 0x4d0   :  { %744 = vrot.lane.b32.xlu1 %v2940_v33, %s2500_s27  ;;  %544 = vrot.lane.b32.xlu0 %v2943_v34, %s2485_s13 }
 0x4d4   :  { %766 = vrot.lane.b32.xlu1 %v2940_v33, %s2501_s28  ;;  %566 = vrot.lane.b32.xlu0 %v2943_v34, %s2487_s15 }
 0x4d8   :  { %789 = vrot.lane.b32.xlu1 %v2943_v34, %s2476_s9  ;;  %588 = vrot.lane.b32.xlu0 %v2943_v34, %s2489_s3 }
 0x4dc   :  { %810 = vrot.lane.b32.xlu1 %v2943_v34, %s2477_s10  ;;  %610 = vrot.lane.b32.xlu0 %v2943_v34, %s2490_s17 }
 0x4e0   :  { %831 = vrot.lane.b32.xlu1 %v2943_v34, %s2486_s14  ;;  %632 = vrot.lane.b32.xlu0 %v2943_v34, %s2492_s19 }
 0x4e4   :  { %853 = vrot.lane.b32.xlu1 %v2943_v34, %s2488_s16  ;;  %654 = vrot.lane.b32.xlu0 %v2943_v34, %s2494_s21 }
 0x4e8   :  { %875 = vrot.lane.b32.xlu1 %v2943_v34, %s2480_s0  ;;  %676 = vrot.lane.b32.xlu0 %v2943_v34, %s2496_s23 }
 0x4ec   :  { %896 = vrot.lane.b32.xlu1 %v2943_v34, %s2491_s18  ;;  %697 = vrot.lane.b32.xlu0 %v2943_v34, %s2498_s25 }
 0x4f0   :  { %918 = vrot.lane.b32.xlu1 %v2943_v34, %s2493_s20  ;;  %719 = vrot.lane.b32.xlu0 %v2943_v34, %s2499_s26 }
 0x4f4   :  { %940 = vrot.lane.b32.xlu1 %v2943_v34, %s2495_s22  ;;  %741 = vrot.lane.b32.xlu0 %v2943_v34, %s2500_s27 }
 0x4f8   :  { %962 = vrot.lane.b32.xlu1 %v2943_v34, %s2497_s24  ;;  %763 = vrot.lane.b32.xlu0 %v2943_v34, %s2501_s28 }
 0x51a   :  { %v3037_v40 = vpop.permute.xlu0 %787  ;;  %v526_v45 = vpop.permute.xlu1 %525 }
 0x51e   :  { %v3039_v46 = vpop.permute.xlu0 %808  ;;  %v548_v51 = vpop.permute.xlu1 %547 }
 0x522   :  { %v3041_v52 = vpop.permute.xlu0 %829  ;;  %v570_v57 = vpop.permute.xlu1 %569 }
 0x526   :  { %v3043_v0 = vpop.permute.xlu0 %851  ;;  %v3045_v4 = vpop.permute.xlu1 %591 }
 0x52a   :  { %v3047_v8 = vpop.permute.xlu0 %873  ;;  %v3049_v11 = vpop.permute.xlu1 %613 }
 0x52e   :  { %v3051_v9 = vpop.permute.xlu0 %894  ;;  %v3053_v10 = vpop.permute.xlu1 %635 }
 0x532   :  { %v3055_v17 = vpop.permute.xlu0 %916  ;;  %v3057_v22 = vpop.permute.xlu1 %657 }
 0x536   :  { %v3060_v18 = vpop.permute.xlu0 %938  ;;  %v3062_v19 = vpop.permute.xlu1 %679 }
 0x53a   :  { %v3076_v24 = vpop.permute.xlu0 %960  ;;  %v3078_v25 = vpop.permute.xlu1 %700 }
 0x53e   :  { %v3090_v38 = vpop.permute.xlu1 %722  ;;  %v522_v41 = vpop.permute.xlu0 %521 }
 0x53f   :  { %v528_v42 = vsel %vm527_vm9, %v526_v45, %v522_v41  ;;  %v531_v43 = vsel %vm527_vm9, %v522_v41, %v526_v45  ;;  %v3150_v45 = vsub.s32 4, %v533_v23 }
 0x540   :  { %v3097_v47 = vmul.f32 %v3082_v35, %v531_v43  ;;  %v3100_v50 = vmul.f32 %v3086_v36, %v528_v42  ;;  %v3156_v42 = vrot.slane %v3138_v14, %v3112_v62 }
 0x542   :  { %v3110_v55 = vpop.permute.xlu1 %744  ;;  %v545_v60 = vpop.permute.xlu0 %544  ;;  %3968 = vst [vmem:[#allocation18_spill] sm:$0xff] %v3156_v42 }
 0x543   :  { %v550_v63 = vsel %vm549_vm10, %v548_v51, %v545_v60  ;;  %v553_v1 = vsel %vm549_vm10, %v545_v60, %v548_v51 }
 0x544   :  { %v3126_v7 = vmul.f32 %v3104_v53, %v553_v1  ;;  %v3129_v12 = vmul.f32 %v3108_v54, %v550_v63  ;;  %v3166_v63 = vrot.slane %v3069_v28, %v3140_v15  ;;  %v3170_v1 = vrot.slane %v3074_v30, %v3140_v15 }
 0x546   :  { %v3144_v21 = vpop.permute.xlu1 %766  ;;  %v567_v49 = vpop.permute.xlu0 %566  ;;  %3969 = vst [vmem:[#allocation19_spill] sm:$0xff] %v3166_v63  ;;  %3970 = vst [vmem:[#allocation20_spill] sm:$0xff] %v3170_v1 }
 0x547   :  { %v572_v51 = vsel %vm571_vm11, %v570_v57, %v567_v49  ;;  %v575_v41 = vsel %vm571_vm11, %v567_v49, %v570_v57  ;;  %v3174_v57 = vrot.slane %v3123_v6, %v3142_v20  ;;  %v3176_v49 = vsub.s32 7, %v533_v23 }
 0x548   :  { %v3159_v43 = vmul.f32 %v3118_v2, %v575_v41  ;;  %v3162_v60 = vmul.f32 %v3133_v13, %v572_v51  ;;  %v3180_v51 = vrot.slane %v3138_v14, %v3142_v20  ;;  %v3184_v13 = vrot.slane %v3069_v28, %v3150_v45 }
 0x549   :  { %3971 = vst [vmem:[#allocation21_spill] sm:$0xff] %v3174_v57  ;;  %3972 = vst [vmem:[#allocation22_spill] sm:$0xff] %v3176_v49  ;;  %v3188_v2 = vrot.slane %v3074_v30, %v3150_v45 }
 0x54a   :  { %v790_v16 = vpop.permute.xlu1 %789  ;;  %v589_v41 = vpop.permute.xlu0 %588  ;;  %3973 = vst [vmem:[#allocation23_spill] sm:$0xff] %v3180_v51  ;;  %3974 = vst [vmem:[#allocation24_spill] sm:$0xff] %v3184_v13 }
 0x54b   :  { %3975 = vst [vmem:[#allocation25_spill] sm:$0xff] %v3188_v2  ;;  %v791_v54 = vsel %vm163_vm0, %v3037_v40, %v790_v16  ;;  %v795_v23 = vsel %vm163_vm0, %v790_v16, %v3037_v40  ;;  %v594_v53 = vsel %vm593_vm12, %v3045_v4, %v589_v41  ;;  %v597_v36 = vsel %vm593_vm12, %v589_v41, %v3045_v4 }
 0x54c   :  { %v3199_v35 = vmul.f32 %v3148_v29, %v791_v54  ;;  %v3202_v31 = vmul.f32 %v3156_v42, %v795_v23  ;;  %v3205_v32 = vmul.f32 %v3166_v63, %v597_v36  ;;  %v3208_v33 = vmul.f32 %v3170_v1, %v594_v53  ;;  %v3248_v63 = vld [vmem:[%s3900_s6 + $0x28] sm:$0xff] }
 0x54d   :  { %v1115_v40 = vsel %vm134_vm7, %v3031_v5, %v3029_v3  ;;  %v1119_v4 = vsel %vm134_vm7, %v3029_v3, %v3031_v5  ;;  %v3218_v16 = vrot.slane %v3123_v6, %v3176_v49  ;;  %v3222_v36 = vrot.slane %v3138_v14, %v3176_v49  ;;  %v3235_v3 = vld [vmem:[%s3900_s6 + $0x20] sm:$0xff]  ;;  %3981 = vst [vmem:[#allocation31_spill] sm:$0xff] %v3248_v63 }
 0x54e   :  { %3976 = vst [vmem:[#allocation26_spill] sm:$0xff] %v3199_v35  ;;  %3977 = vst [vmem:[#allocation27_spill] sm:$0xff] %v3202_v31  ;;  %v811_v54 = vpop.permute.xlu1 %810  ;;  %v611_v41 = vpop.permute.xlu0 %610  ;;  %v3226_v53 = vrot.slane %v3069_v28, %v3112_v62  ;;  %v3230_v23 = vrot.slane %v3074_v30, %v3112_v62 }
 0x54f   :  { %3978 = vst [vmem:[#allocation28_spill] sm:$0xff] %v3218_v16  ;;  %3979 = vst [vmem:[#allocation29_spill] sm:$0xff] %v3222_v36  ;;  %v812_v5 = vsel %vm179_vm1, %v3039_v46, %v811_v54  ;;  %v816_v42 = vsel %vm179_vm1, %v811_v54, %v3039_v46  ;;  %v616_v29 = vsel %vm615_vm13, %v3049_v11, %v611_v41 }
 0x550   :  { %3980 = vst [vmem:[#allocation30_spill] sm:$0xff] %v3235_v3  ;;  %v619_v1 = vsel %vm615_vm13, %v611_v41, %v3049_v11  ;;  %v3251_v35 = vmul.f32 %v3174_v57, %v812_v5  ;;  %v3254_v31 = vmul.f32 %v3180_v51, %v816_v42  ;;  %v3260_v46 = vmul.f32 %v3188_v2, %v616_v29 }
 0x551   :  { %v3257_v34 = vmul.f32 %v3184_v13, %v619_v1  ;;  %v1120_v54 = vadd.f32 %v1115_v40, %v2917_v61  ;;  %v1121_v11 = vadd.f32 %v1119_v4, %v2914_v58  ;;  %v3266_v41 = vrot.slane %v3235_v3, %v3064_v27 }
 0x552   :  { %3982 = vst [vmem:[#allocation32_spill] sm:$0xff] %v3251_v35  ;;  %3983 = vst [vmem:[#allocation33_spill] sm:$0xff] %v3254_v31  ;;  %v832_v5 = vpop.permute.xlu1 %831  ;;  %v633_v57 = vpop.permute.xlu0 %632  ;;  %v3270_v42 = vrot.slane %v3248_v63, %v3064_v27  ;;  %v3274_v29 = vrot.slane %v3069_v28, %v3142_v20  ;;  %v3278_v61 = vrot.slane %v3074_v30, %v3142_v20 }
 0x553   :  { %3984 = vst [vmem:[#allocation34_spill] sm:$0xff] %v3266_v41  ;;  %v834_v58 = vsel %vm3943_vm14, %v3041_v52, %v832_v5  ;;  %v838_v1 = vsel %vm3943_vm14, %v832_v5, %v3041_v52  ;;  %v638_v40 = vsel %vm637_vm15, %v3053_v10, %v633_v57  ;;  %v641_v4 = vsel %vm637_vm15, %v633_v57, %v3053_v10 }
 0x554   :  { %3985 = vst [vmem:[#allocation35_spill] sm:$0xff] %v3270_v42  ;;  %3986 = vst [vmem:[#allocation36_spill] sm:$0xff] %v3274_v29  ;;  %v3289_v51 = vmul.f32 %v3218_v16, %v834_v58  ;;  %v3292_v2 = vmul.f32 %v3222_v36, %v838_v1  ;;  %v3295_v20 = vmul.f32 %v3226_v53, %v641_v4  ;;  %vm746_vm14 = vcmask 15360  }
 0x555   :  { %3987 = vst [vmem:[#allocation37_spill] sm:$0xff] %v3278_v61  ;;  %v3298_v13 = vmul.f32 %v3230_v23, %v638_v40  ;;  %v1123_v35 = vadd.f32 %v1121_v11, %v1120_v54  ;;  %v3302_v31 = vrot.slane %v3235_v3, %v3088_v37  ;;  %v3306_v10 = vrot.slane %v3248_v63, %v3088_v37 }
 0x556   :  { %v854_v52 = vpop.permute.xlu1 %853  ;;  %v655_v5 = vpop.permute.xlu0 %654  ;;  %v3310_v57 = vrot.slane %v3069_v28, %v3176_v49  ;;  %v3314_v58 = vrot.slane %v3074_v30, %v3176_v49 }
 0x557   :  { %3988 = vst [vmem:[#allocation38_spill] sm:$0xff] %v3302_v31  ;;  %3989 = vst [vmem:[#allocation39_spill] sm:$0xff] %v3306_v10  ;;  %v856_v54 = vsel %vm3930_vm2, %v3043_v0, %v854_v52  ;;  %v860_v11 = vsel %vm3930_vm2, %v854_v52, %v3043_v0  ;;  %v660_v1 = vsel %vm659_vm3, %v3057_v22, %v655_v5  ;;  %vm702_vm2 = vcmask 121856  }
 0x558   :  { %3990 = vst [vmem:[#allocation40_spill] sm:$0xff] %v3310_v57  ;;  %3991 = vst [vmem:[#allocation41_spill] sm:$0xff] %v3314_v58  ;;  %v663_v40 = vsel %vm659_vm3, %v655_v5, %v3057_v22  ;;  %v3325_v4 = vmul.f32 %v3266_v41, %v856_v54  ;;  %v3328_v28 = vmul.f32 %v3270_v42, %v860_v11 }
 0x559   :  { %v3331_v30 = vmul.f32 %v3274_v29, %v663_v40  ;;  %v3334_v49 = vmul.f32 %v3278_v61, %v660_v1  ;;  %v1102_v0 = vsel %vm134_vm7, %v3035_v39, %v3033_v26  ;;  %v1106_v22 = vsel %vm134_vm7, %v3033_v26, %v3035_v39 }
 0x55a   :  { %v3344_v52 = vrot.slane %v3235_v3, %v3094_v44  ;;  %v876_v5 = vpop.permute.xlu1 %875  ;;  %v677_v54 = vpop.permute.xlu0 %676  ;;  %v3348_v11 = vrot.slane %v3248_v63, %v3094_v44  ;;  %v3352_v1 = vrot.slane %v3123_v6, %v3064_v27  ;;  %v3356_v40 = vrot.slane %v3138_v14, %v3064_v27 }
 0x55b   :  { %v877_v26 = vsel %vm3936_vm4, %v3047_v8, %v876_v5  ;;  %v881_v39 = vsel %vm3936_vm4, %v876_v5, %v3047_v8  ;;  %v681_v42 = vsel %vm328_vm6, %v3062_v19, %v677_v54  ;;  %v684_v41 = vsel %vm328_vm6, %v677_v54, %v3062_v19 }
 0x55c   :  { %3992 = vst [vmem:[#allocation42_spill] sm:$0xff] %v3344_v52  ;;  %3993 = vst [vmem:[#allocation43_spill] sm:$0xff] %v3348_v11  ;;  %v3367_v36 = vmul.f32 %v3302_v31, %v877_v26  ;;  %v3370_v16 = vmul.f32 %v3306_v10, %v881_v39  ;;  %v3373_v27 = vmul.f32 %v3310_v57, %v684_v41  ;;  %vm3944_vm7 = vcmask 900096  }
 0x55d   :  { %v3376_v61 = vmul.f32 %v3314_v58, %v681_v42  ;;  %v1107_v8 = vmax.f32 %v2929_v59, %v1102_v0  ;;  %v1108_v5 = vmax.f32 %v2926_v56, %v1106_v22  ;;  %v3382_v19 = vrot.slane %v3235_v3, %v3140_v15 }
 0x55e   :  { %v897_v54 = vpop.permute.xlu1 %896  ;;  %v698_v26 = vpop.permute.xlu0 %697  ;;  %v3386_v39 = vrot.slane %v3248_v63, %v3140_v15  ;;  %vm3947_vm4 = vcmask 113664   ;;  %v3390_v41 = vrot.slane %v3123_v6, %v3088_v37  ;;  %v3394_v59 = vrot.slane %v3138_v14, %v3088_v37 }
 0x55f   :  { %3994 = vst [vmem:[#allocation44_spill] sm:$0xff] %v3382_v19  ;;  %v899_v56 = vsel %vm3942_vm5, %v3051_v9, %v897_v54  ;;  %v903_v42 = vsel %vm3942_vm5, %v897_v54, %v3051_v9  ;;  %v703_v0 = vsel %vm702_vm2, %v3078_v25, %v698_v26  ;;  %v706_v22 = vsel %vm702_vm2, %v698_v26, %v3078_v25 }
 0x560   :  { %3995 = vst [vmem:[#allocation45_spill] sm:$0xff] %v3386_v39  ;;  %v3405_v10 = vmul.f32 %v3344_v52, %v899_v56  ;;  %v3408_v31 = vmul.f32 %v3348_v11, %v903_v42  ;;  %v3411_v37 = vmul.f32 %v3352_v1, %v706_v22  ;;  %v3414_v58 = vmul.f32 %v3356_v40, %v703_v0 }
 0x561   :  { %v1124_v57 = vmul.f32 0.0625, %v1123_v35  ;;  %v1122_v29 = vmax.f32 %v1107_v8, %v1108_v5  ;;  %vm942_vm5 = vcmask 801792   ;;  %v3418_v25 = vrot.slane %v3235_v3, %v3150_v45 }
 0x562   :  { %v919_v9 = vpop.permute.xlu1 %918  ;;  %v720_v54 = vpop.permute.xlu0 %719  ;;  %v3422_v26 = vrot.slane %v3248_v63, %v3150_v45 }
 0x563   :  { %3996 = vst [vmem:[#allocation46_spill] sm:$0xff] %v3418_v25  ;;  %v921_v56 = vsel %vm3944_vm7, %v3055_v17, %v919_v9  ;;  %v925_v42 = vsel %vm3944_vm7, %v919_v9, %v3055_v17  ;;  %v725_v35 = vsel %vm3947_vm4, %v3090_v38, %v720_v54  ;;  %v728_v8 = vsel %vm3947_vm4, %v720_v54, %v3090_v38 }
 0x564   :  { %3997 = vst [vmem:[#allocation47_spill] sm:$0xff] %v3422_v26  ;;  %v3433_v5 = vmul.f32 %v3382_v19, %v921_v56  ;;  %v3436_v0 = vmul.f32 %v3386_v39, %v925_v42  ;;  %v737_v45 = vmul.f32 %v3390_v41, %v728_v8  ;;  %v738_v22 = vmul.f32 %v3394_v59, %v725_v35 }
 0x565   :  { %v3442_v17 = vrot.slane %v3123_v6, %v3094_v44  ;;  %v3446_v9 = vrot.slane %v3138_v14, %v3094_v44  ;;  %v1125_v38 = vadd.f32 %v1124_v57, %v1122_v29  ;;  %vm964_vm7 = vcmask 793600  }
 0x566   :  { %v1360_v54 = vpop.f32.mrb[2].mxu0  ;;  %v941_v56 = vpop.permute.xlu1 %940  ;;  %v3450_v42 = vrot.slane %v3235_v3, %v3112_v62  ;;  %v3454_v35 = vrot.slane %v3248_v63, %v3112_v62  ;;  %vm768_vm4 = vcmask 7168   ;;  %v3462_v29 = vrot.slane %v3123_v6, %v3140_v15 }
 0x567   :  { %v943_v8 = vsel %vm942_vm5, %v3060_v18, %v941_v56  ;;  %v947_v39 = vsel %vm942_vm5, %v941_v56, %v3060_v18  ;;  %v742_v44 = vpop.permute.xlu0 %741  ;;  %v1362_v19 = vpop.f32.mrb[3].mxu0  ;;  %v3476_v6 = vrot.slane %v3138_v14, %v3140_v15  ;;  %v1365_v3 = vmul.f32 %v1360_v54, %v1125_v38 }
 0x568   :  { %v3465_v57 = vmul.f32 %v3418_v25, %v943_v8  ;;  %v957_v11 = vmul.f32 %v3422_v26, %v947_v39  ;;  %v747_v62 = vsel %vm746_vm14, %v3110_v55, %v742_v44  ;;  %v750_v63 = vsel %vm746_vm14, %v742_v44, %v3110_v55 }
 0x569   :  { %v759_v18 = vmul.f32 %v3442_v17, %v750_v63  ;;  %v760_v56 = vmul.f32 %v3446_v9, %v747_v62  ;;  %v1366_v52 = vmul.f32 %v1362_v19, %v1125_v38  ;;  %v2296_v55 = vpack.c.bf16 %v3129_v12, %v3100_v50 }
 0x56a   :  { %v963_v8 = vpop.permute.xlu1 %962  ;;  %v2298_v63 = vpack.c.bf16 %v3126_v7, %v3097_v47  ;;  %v2300_v47 = vpack.c.bf16 %v3208_v33, %v3162_v60  ;;  %v2302_v50 = vpack.c.bf16 %v3205_v32, %v3159_v43  ;;  %v2304_v7 = vpack.c.bf16 %v3298_v13, %v3260_v46  ;;  %v3998_v60 = vld [vmem:[#allocation9_spill] sm:$0xff] }
 0x56b   :  { %1367 = vmatprep.subr.mxu0 %v1366_v52  ;;  %v965_v39 = vsel %vm964_vm7, %v3076_v24, %v963_v8  ;;  %v969_v26 = vsel %vm964_vm7, %v963_v8, %v3076_v24  ;;  %v764_v25 = vpop.permute.xlu0 %763  ;;  %v2306_v12 = vpack.c.bf16 %v3295_v20, %v3257_v34  ;;  %v2310_v33 = vpack.c.bf16 %v3373_v27, %v3331_v30  ;;  %v3999_v34 = vld [vmem:[#allocation27_spill] sm:$0xff] }
 0x56c   :  { %v978_v19 = vmul.f32 %v3450_v42, %v965_v39  ;;  %v979_v14 = vmul.f32 %v3454_v35, %v969_v26  ;;  %v769_v15 = vsel %vm768_vm4, %v3144_v21, %v764_v25  ;;  %v772_v52 = vsel %vm768_vm4, %v764_v25, %v3144_v21  ;;  %1368 = vmatpush1.msra.mxu0 %v1365_v3  ;;  %v4001_v3 = vld [vmem:[#allocation26_spill] sm:$0xff] }
 0x56d   :  { %v781_v24 = vmul.f32 %v3462_v29, %v772_v52  ;;  %v782_v38 = vmul.f32 %v3476_v6, %v769_v15  ;;  %2143 = vmatmul.mubr.msk.f32.vlgmr.msra.gmra.mrb[4].mxu0 %vm405_vm8, %v2887_v48  ;;  %2297 = vmatprep.subr.bf16.mxu0 %v2296_v55  ;;  %v2308_v48 = vpack.c.bf16 %v3376_v61, %v3334_v49  ;;  %v4000_v49 = vld [vmem:[#allocation8_spill] sm:$0xff]  ;;  %v4002_v61 = vld [vmem:[#allocation33_spill] sm:$0xff] }
 0x56e   :  { %2299 = vmatpush1.bf16.msra.mxu0 %v2298_v63  ;;  %v2312_v21 = vpack.c.bf16 %v738_v22, %v3414_v58  ;;  %v2314_v32 = vpack.c.bf16 %v737_v45, %v3411_v37  ;;  %v2320_v20 = vpack.c.bf16 %v3999_v34, %v3998_v60  ;;  %v2322_v46 = vpack.c.bf16 %v4001_v3, %v4000_v49  ;;  %v4003_v58 = vld [vmem:[#allocation32_spill] sm:$0xff]  ;;  %v4004_v34 = vld [vmem:[#allocation7_spill] sm:$0xff]  ;;  %v4005_v3 = vld [vmem:[#allocation6_spill] sm:$0xff] }
 0x56f   :  { %2301 = vmatprep.subr.bf16.mxu0 %v2300_v47  ;;  %v2316_v13 = vpack.c.bf16 %v782_v38, %v760_v56  ;;  %v2318_v43 = vpack.c.bf16 %v781_v24, %v759_v18  ;;  %v2324_v30 = vpack.c.bf16 %v3292_v2, %v4002_v61  ;;  %v2326_v27 = vpack.c.bf16 %v3289_v51, %v4003_v58 }
 0x570   :  { %v2328_v37 = vpack.c.bf16 %v3370_v16, %v3328_v28  ;;  %v2330_v25 = vpack.c.bf16 %v3367_v36, %v3325_v4  ;;  %v2332_v26 = vpack.c.bf16 %v3436_v0, %v3408_v31  ;;  %v2334_v2 = vpack.c.bf16 %v3433_v5, %v3405_v10 }
 0x571   :  { %v2336_v45 = vpack.c.bf16 %v979_v14, %v957_v11  ;;  %v2338_v51 = vpack.c.bf16 %v978_v19, %v3465_v57  ;;  %v2504_v58 = vmov 1.0  }
 0x572   :  { %2303 = vmatpush1.bf16.msra.mxu0 %v2302_v50 }
 0x573   :  { %2305 = vmatprep.subr.bf16.mxu0 %v2304_v7 }
 0x576   :  { %2307 = vmatpush1.bf16.msra.mxu0 %v2306_v12 }
 0x577   :  { %2309 = vmatprep.subr.bf16.mxu0 %v2308_v48 }
 0x57a   :  { %2311 = vmatpush1.bf16.msra.mxu0 %v2310_v33 }
 0x57b   :  { %2313 = vmatprep.subr.bf16.mxu0 %v2312_v21 }
 0x57e   :  { %2315 = vmatpush1.bf16.msra.mxu0 %v2314_v32 }
 0x57f   :  { %2317 = vmatprep.subr.bf16.mxu0 %v2316_v13 }
 0x582   :  { %2319 = vmatpush1.bf16.msra.mxu0 %v2318_v43 }
 0x583   :  { %2321 = vmatprep.subr.bf16.mxu0 %v2320_v20 }
 0x586   :  { %2323 = vmatpush1.bf16.msra.mxu0 %v2322_v46 }
 0x587   :  { %2325 = vmatprep.subr.bf16.mxu0 %v2324_v30 }
 0x58a   :  { %2327 = vmatpush1.bf16.msra.mxu0 %v2326_v27  ;;  %v1795_v27 = vld [vmem:[%s3899_s5 + $0x8] sm:$0xff] }
 0x58b   :  { %2329 = vmatprep.subr.bf16.mxu0 %v2328_v37 }
 0x58e   :  { %2331 = vmatpush1.bf16.msra.mxu0 %v2330_v25 }
 0x58f   :  { %2333 = vmatprep.subr.bf16.mxu0 %v2332_v26 }
 0x592   :  { %2335 = vmatpush1.bf16.msra.mxu0 %v2334_v2 }
 0x593   :  { %2337 = vmatprep.subr.bf16.mxu0 %v2336_v45 }
 0x596   :  { %2339 = vmatpush1.bf16.msra.mxu0 %v2338_v51 }
 0x640   :  { %v1433_v16 = vpop.f32.mrb[4].mxu0 }
 0x641   :  { %v1438_v28 = vrot.slane %v1433_v16, 4  ;;  %v1435_v22 = vpop.f32.mrb[5].mxu0 }
 0x642   :  { %v1444_v54 = vrot.slane %v1435_v22, 4 }
 0x643   :  { %v1439_v44 = vmax.f32 %v1433_v16, %v1438_v28 }
 0x644   :  { %v1445_v36 = vmax.f32 %v1435_v22, %v1444_v54 }
 0x645   :  { %v1440_v4 = vrot.slane %v1439_v44, 2 }
 0x646   :  { %v1446_v62 = vrot.slane %v1445_v36, 2 }
 0x647   :  { %v1441_v31 = vmax.f32 %v1439_v44, %v1440_v4 }
 0x648   :  { %v1447_v0 = vmax.f32 %v1445_v36, %v1446_v62 }
 0x649   :  { %v1442_v18 = vrot.slane %v1441_v31, 1 }
 0x64a   :  { %v1448_v56 = vrot.slane %v1447_v0, 1 }
 0x64b   :  { %v1443_v8 = vmax.f32 %v1441_v31, %v1442_v18 }
 0x64c   :  { %v1449_v10 = vmax.f32 %v1447_v0, %v1448_v56 }
 0x64d   :  { %v1450_v11 = vsub.f32 %v1433_v16, %v1443_v8 }
 0x64e   :  { %v1451_v5 = vsub.f32 %v1435_v22, %v1449_v10  ;;  %v4007_v10 = vld [vmem:[#allocation10_spill] sm:$0xff] }
 0x64f   :  { %v1452_v39 = vmul.f32 1.442695, %v1450_v11 }
 0x650   :  { %v1454_v55 = vmul.f32 1.442695, %v1451_v5  ;;  %v4008_v5 = vld [vmem:[#allocation11_spill] sm:$0xff] }
 0x651   :  { %2444 = vpow2.f32 %v1452_v39 }
 0x652   :  { %2446 = vpow2.f32 %v1454_v55 }
 0x65b   :  { %v2445_v57 = vpop.eup %2444 }
 0x65c   :  { %v2447_v63 = vpop.eup %2446  ;;  %v1456_v19 = vrot.slane %v2445_v57, 4 }
 0x65d   :  { %v1462_v14 = vrot.slane %v2447_v63, 4 }
 0x65e   :  { %v1457_v15 = vadd.f32 %v2445_v57, %v1456_v19 }
 0x65f   :  { %v1463_v52 = vadd.f32 %v2447_v63, %v1462_v14  ;;  %v4009_v14 = vld [vmem:[#allocation12_spill] sm:$0xff] }
 0x660   :  { %v1458_v24 = vrot.slane %v1457_v15, 2 }
 0x661   :  { %v1464_v38 = vrot.slane %v1463_v52, 2 }
 0x662   :  { %v1459_v47 = vadd.f32 %v1458_v24, %v1457_v15 }
 0x663   :  { %v1465_v50 = vadd.f32 %v1464_v38, %v1463_v52  ;;  %v4010_v52 = vld [vmem:[#allocation13_spill] sm:$0xff] }
 0x664   :  { %v1460_v7 = vrot.slane %v1459_v47, 1 }
 0x665   :  { %v1466_v12 = vrot.slane %v1465_v50, 1 }
 0x666   :  { %v1461_v48 = vadd.f32 %v1460_v7, %v1459_v47 }
 0x667   :  { %v1467_v33 = vadd.f32 %v1466_v12, %v1465_v50 }
 0x668   :  { %2448 = vrcp.f32 %v1461_v48 }
 0x669   :  { %2450 = vrcp.f32 %v1467_v33  ;;  %v4011_v33 = vld [vmem:[#allocation14_spill] sm:$0xff] }
 0x672   :  { %v2449_v21 = vpop.eup %2448 }
 0x673   :  { %v2451_v32 = vpop.eup %2450  ;;  %v1472_v13 = vmul.f32 %v2449_v21, %v2445_v57 }
 0x674   :  { %v1473_v43 = vmul.f32 %v2451_v32, %v2447_v63  ;;  %v4012_v32 = vld [vmem:[#allocation15_spill] sm:$0xff] }
 0x675   :  { %v1474_v20 = vmul.f32 %v1472_v13, %v4004_v34 }
 0x676   :  { %v1475_v46 = vmul.f32 %v1473_v43, %v4005_v3 }
 0x677   :  { %v3530_v61 = vadd.f32 %v1474_v20, %v4004_v34 }
 0x678   :  { %v3533_v30 = vadd.f32 %v1475_v46, %v4005_v3  ;;  %v4013_v46 = vld [vmem:[#allocation19_spill] sm:$0xff] }
 0x679   :  { %1483 = vrot.lane.b32.xlu1 %v3530_v61, %s2484_s2  ;;  %1638 = vrot.lane.b32.xlu0 %v3530_v61, %s2476_s9 }
 0x67d   :  { %1496 = vrot.lane.b32.xlu1 %v3530_v61, %s2485_s13  ;;  %1651 = vrot.lane.b32.xlu0 %v3530_v61, %s2477_s10 }
 0x681   :  { %1509 = vrot.lane.b32.xlu1 %v3530_v61, %s2487_s15  ;;  %1664 = vrot.lane.b32.xlu0 %v3530_v61, %s2486_s14 }
 0x685   :  { %1522 = vrot.lane.b32.xlu1 %v3530_v61, %s2489_s3  ;;  %1677 = vrot.lane.b32.xlu0 %v3530_v61, %s2488_s16 }
 0x689   :  { %1535 = vrot.lane.b32.xlu1 %v3530_v61, %s2490_s17  ;;  %1690 = vrot.lane.b32.xlu0 %v3530_v61, %s2480_s0 }
 0x68d   :  { %1548 = vrot.lane.b32.xlu1 %v3530_v61, %s2492_s19  ;;  %1703 = vrot.lane.b32.xlu0 %v3530_v61, %s2491_s18 }
 0x691   :  { %1561 = vrot.lane.b32.xlu1 %v3530_v61, %s2494_s21  ;;  %1716 = vrot.lane.b32.xlu0 %v3530_v61, %s2493_s20 }
 0x695   :  { %1574 = vrot.lane.b32.xlu1 %v3530_v61, %s2496_s23  ;;  %1729 = vrot.lane.b32.xlu0 %v3530_v61, %s2495_s22 }
 0x699   :  { %1587 = vrot.lane.b32.xlu1 %v3530_v61, %s2498_s25  ;;  %1479 = vrot.lane.b32.xlu0 %v3533_v30, %s2484_s2  ;;  %s2502_s2 = smov 95  }
 0x69d   :  { %1600 = vrot.lane.b32.xlu1 %v3530_v61, %s2499_s26  ;;  %1493 = vrot.lane.b32.xlu0 %v3533_v30, %s2485_s13  ;;  %s2503_s13 = smov 94  }
 0x6a1   :  { %1613 = vrot.lane.b32.xlu1 %v3530_v61, %s2500_s27  ;;  %1506 = vrot.lane.b32.xlu0 %v3533_v30, %s2487_s15 }
 0x6a5   :  { %1626 = vrot.lane.b32.xlu1 %v3530_v61, %s2501_s28  ;;  %1519 = vrot.lane.b32.xlu0 %v3533_v30, %s2489_s3 }
 0x6a9   :  { %984 = vrot.lane.b32.xlu1 %v3998_v60, %s2481_s1  ;;  %1532 = vrot.lane.b32.xlu0 %v3533_v30, %s2490_s17 }
 0x6ad   :  { %1005 = vrot.lane.b32.xlu1 %v3998_v60, %s2502_s2  ;;  %1545 = vrot.lane.b32.xlu0 %v3533_v30, %s2492_s19 }
 0x6b1   :  { %1027 = vrot.lane.b32.xlu1 %v3998_v60, %s2503_s13  ;;  %1558 = vrot.lane.b32.xlu0 %v3533_v30, %s2494_s21  ;;  %v4006_v60 = vlaneseq }
 0x6b3   :  { %vm29_vm8 = vcmp.lt.s32.totalorder %v4006_v60, 512 }
 0x6b4   :  { %32 = vst.msk [vmem:[#allocation2 + $0x320] ss:$8 sm:$0xf] %vm29_vm8, %v2504_v58  ;;  %vm1904_vm8 = vcmask 596992   ;;  %v4014_v58 = vld [vmem:[#allocation20_spill] sm:$0xff] }
 0x6b5   :  { %1640 = vrot.lane.b32.xlu1 %v3533_v30, %s2476_s9  ;;  %1571 = vrot.lane.b32.xlu0 %v3533_v30, %s2496_s23 }
 0x6b6   :  { %2146 = vmatprep.mubr.msk.f32.mxu0 %vm1904_vm8, %v1795_v27  ;;  %2151 = vmatprep.mubr.msk.f32.mxu1 %vm1904_vm8, %v1795_v27 }
 0x6b9   :  { %1653 = vrot.lane.b32.xlu1 %v3533_v30, %s2477_s10  ;;  %1584 = vrot.lane.b32.xlu0 %v3533_v30, %s2498_s25 }
 0x6bd   :  { %1666 = vrot.lane.b32.xlu1 %v3533_v30, %s2486_s14  ;;  %1597 = vrot.lane.b32.xlu0 %v3533_v30, %s2499_s26 }
 0x6c1   :  { %1679 = vrot.lane.b32.xlu1 %v3533_v30, %s2488_s16  ;;  %1610 = vrot.lane.b32.xlu0 %v3533_v30, %s2500_s27 }
 0x6c5   :  { %1692 = vrot.lane.b32.xlu1 %v3533_v30, %s2480_s0  ;;  %1623 = vrot.lane.b32.xlu0 %v3533_v30, %s2501_s28 }
 0x6c9   :  { %1705 = vrot.lane.b32.xlu1 %v3533_v30, %s2491_s18  ;;  %1742 = vrot.lane.b32.xlu0 %v3530_v61, %s2497_s24 }
 0x6cd   :  { %1718 = vrot.lane.b32.xlu1 %v3533_v30, %s2493_s20  ;;  %982 = vrot.lane.b32.xlu0 %v4000_v49, %s2481_s1 }
 0x6d1   :  { %1731 = vrot.lane.b32.xlu1 %v3533_v30, %s2495_s22  ;;  %1003 = vrot.lane.b32.xlu0 %v4000_v49, %s2502_s2 }
 0x6d5   :  { %1744 = vrot.lane.b32.xlu1 %v3533_v30, %s2497_s24  ;;  %1755 = vrot.lane.b32.xlu0 %v3530_v61, %s2481_s1 }
 0x6d9   :  { %1757 = vrot.lane.b32.xlu1 %v3533_v30, %s2481_s1  ;;  %1768 = vrot.lane.b32.xlu0 %v3530_v61, %s2502_s2 }
 0x6dd   :  { %1770 = vrot.lane.b32.xlu1 %v3533_v30, %s2502_s2  ;;  %1025 = vrot.lane.b32.xlu0 %v4000_v49, %s2503_s13 }
 0x6e1   :  { %1783 = vrot.lane.b32.xlu1 %v3533_v30, %s2503_s13  ;;  %1781 = vrot.lane.b32.xlu0 %v3530_v61, %s2503_s13 }
 0x6eb   :  { %v1484_v37 = vpop.permute.xlu1 %1483  ;;  %v3649_v25 = vpop.permute.xlu0 %1638 }
 0x6ef   :  { %v1497_v26 = vpop.permute.xlu1 %1496  ;;  %v3651_v2 = vpop.permute.xlu0 %1651 }
 0x6f3   :  { %v1510_v45 = vpop.permute.xlu1 %1509  ;;  %v3653_v51 = vpop.permute.xlu0 %1664 }
 0x6f7   :  { %v1523_v16 = vpop.permute.xlu1 %1522  ;;  %v3655_v28 = vpop.permute.xlu0 %1677 }
 0x6fb   :  { %v1536_v22 = vpop.permute.xlu1 %1535  ;;  %v3657_v49 = vpop.permute.xlu0 %1690 }
 0x6ff   :  { %v1549_v54 = vpop.permute.xlu1 %1548  ;;  %v3659_v44 = vpop.permute.xlu0 %1703 }
 0x703   :  { %v1562_v36 = vpop.permute.xlu1 %1561  ;;  %v3661_v4 = vpop.permute.xlu0 %1716 }
 0x707   :  { %v1575_v62 = vpop.permute.xlu1 %1574  ;;  %v3663_v31 = vpop.permute.xlu0 %1729 }
 0x70b   :  { %v3665_v0 = vpop.permute.xlu1 %1587  ;;  %v1480_v18 = vpop.permute.xlu0 %1479 }
 0x70c   :  { %v1485_v56 = vsel %vm527_vm9, %v1484_v37, %v1480_v18  ;;  %v1488_v8 = vsel %vm527_vm9, %v1480_v18, %v1484_v37 }
 0x70d   :  { %v1489_v11 = vmul.f32 %v1488_v8, %v4007_v10  ;;  %v1490_v39 = vmul.f32 %v1485_v56, %v4008_v5  ;;  %v4015_v10 = vld [vmem:[#allocation24_spill] sm:$0xff]  ;;  %v4016_v5 = vld [vmem:[#allocation25_spill] sm:$0xff] }
 0x70f   :  { %v3671_v55 = vpop.permute.xlu1 %1600  ;;  %v1494_v57 = vpop.permute.xlu0 %1493 }
 0x710   :  { %v1498_v63 = vsel %vm549_vm10, %v1497_v26, %v1494_v57  ;;  %v1501_v19 = vsel %vm549_vm10, %v1494_v57, %v1497_v26  ;;  %vm4031_vm10 = vcmask 924672  }
 0x711   :  { %v1502_v15 = vmul.f32 %v1501_v19, %v4009_v14  ;;  %v1503_v24 = vmul.f32 %v1498_v63, %v4010_v52 }
 0x713   :  { %v3677_v38 = vpop.permute.xlu1 %1613  ;;  %v1507_v47 = vpop.permute.xlu0 %1506  ;;  %v2350_v50 = vpack.c.bf16 %v1503_v24, %v1490_v39  ;;  %v2352_v7 = vpack.c.bf16 %v1502_v15, %v1489_v11 }
 0x714   :  { %v1511_v12 = vsel %vm571_vm11, %v1510_v45, %v1507_v47  ;;  %v1514_v48 = vsel %vm571_vm11, %v1507_v47, %v1510_v45  ;;  %vm4032_vm11 = vmmov %vm4031_vm10 }
 0x715   :  { %v1515_v21 = vmul.f32 %v1514_v48, %v4011_v33  ;;  %v1516_v13 = vmul.f32 %v1511_v12, %v4012_v32  ;;  %2351 = vmatprep.subr.bf16.mxu1 %v2350_v50  ;;  %v4017_v12 = vld [vmem:[#allocation36_spill] sm:$0xff]  ;;  %v4018_v33 = vld [vmem:[#allocation37_spill] sm:$0xff] }
 0x716   :  { %2353 = vmatpush1.bf16.msra.mxu1 %v2352_v7 }
 0x717   :  { %v3683_v43 = vpop.permute.xlu1 %1626  ;;  %v1520_v34 = vpop.permute.xlu0 %1519 }
 0x718   :  { %v1524_v20 = vsel %vm593_vm12, %v1523_v16, %v1520_v34  ;;  %v1527_v3 = vsel %vm593_vm12, %v1520_v34, %v1523_v16  ;;  %vm4035_vm12 = vcmask 916480  }
 0x719   :  { %v1528_v60 = vmul.f32 %v1527_v3, %v4013_v46  ;;  %v1529_v27 = vmul.f32 %v1524_v20, %v4014_v58  ;;  %v4019_v20 = vld [vmem:[#allocation17_spill] sm:$0xff]  ;;  %v4020_v3 = vld [vmem:[#allocation18_spill] sm:$0xff] }
 0x71b   :  { %v3689_v37 = vpop.permute.xlu1 %984  ;;  %v1533_v26 = vpop.permute.xlu0 %1532  ;;  %v2354_v45 = vpack.c.bf16 %v1529_v27, %v1516_v13  ;;  %v2356_v18 = vpack.c.bf16 %v1528_v60, %v1515_v21  ;;  %v4021_v60 = vld [vmem:[#allocation40_spill] sm:$0xff]  ;;  %v4022_v27 = vld [vmem:[#allocation41_spill] sm:$0xff] }
 0x71c   :  { %v1537_v56 = vsel %vm615_vm13, %v1536_v22, %v1533_v26  ;;  %v1540_v8 = vsel %vm615_vm13, %v1533_v26, %v1536_v22  ;;  %vm4036_vm13 = vmmov %vm4035_vm12 }
 0x71d   :  { %v1541_v11 = vmul.f32 %v1540_v8, %v4015_v10  ;;  %v1542_v39 = vmul.f32 %v1537_v56, %v4016_v5  ;;  %2355 = vmatprep.subr.bf16.mxu1 %v2354_v45  ;;  %v4023_v5 = vld [vmem:[#allocation21_spill] sm:$0xff] }
 0x71e   :  { %2357 = vmatpush1.bf16.msra.mxu1 %v2356_v18 }
 0x71f   :  { %v3695_v16 = vpop.permute.xlu1 %1005  ;;  %v1546_v57 = vpop.permute.xlu0 %1545 }
 0x720   :  { %v1550_v63 = vsel %vm637_vm15, %v1549_v54, %v1546_v57  ;;  %v1553_v19 = vsel %vm637_vm15, %v1546_v57, %v1549_v54  ;;  %v4024_v57 = vld [vmem:[#allocation23_spill] sm:$0xff] }
 0x721   :  { %v1554_v14 = vmul.f32 %v1553_v19, %v3226_v53  ;;  %v1555_v15 = vmul.f32 %v1550_v63, %v3230_v23 }
 0x723   :  { %v3701_v52 = vpop.permute.xlu1 %1027  ;;  %v1559_v22 = vpop.permute.xlu0 %1558  ;;  %v2358_v24 = vpack.c.bf16 %v1555_v15, %v1542_v39  ;;  %v2360_v47 = vpack.c.bf16 %v1554_v14, %v1541_v11 }
 0x724   :  { %v1563_v50 = vsel %vm659_vm3, %v1562_v36, %v1559_v22  ;;  %v1566_v7 = vsel %vm659_vm3, %v1559_v22, %v1562_v36 }
 0x725   :  { %v1567_v48 = vmul.f32 %v1566_v7, %v4017_v12  ;;  %v1568_v21 = vmul.f32 %v1563_v50, %v4018_v33  ;;  %2359 = vmatprep.subr.bf16.mxu1 %v2358_v24  ;;  %v4029_v50 = vld [vmem:[#allocation28_spill] sm:$0xff] }
 0x726   :  { %2361 = vmatpush1.bf16.msra.mxu1 %v2360_v47 }
 0x727   :  { %v1641_v54 = vpop.permute.xlu1 %1640  ;;  %v1572_v32 = vpop.permute.xlu0 %1571 }
 0x728   :  { %v1642_v53 = vsel %vm163_vm0, %v3649_v25, %v1641_v54  ;;  %v1646_v23 = vsel %vm163_vm0, %v1641_v54, %v3649_v25  ;;  %v1576_v13 = vsel %vm328_vm6, %v1575_v62, %v1572_v32  ;;  %v1579_v34 = vsel %vm328_vm6, %v1572_v32, %v1575_v62 }
 0x729   :  { %v3714_v36 = vmul.f32 %v1642_v53, %v4019_v20  ;;  %v3717_v46 = vmul.f32 %v1646_v23, %v4020_v3  ;;  %v1580_v58 = vmul.f32 %v1579_v34, %v4021_v60  ;;  %v1581_v26 = vmul.f32 %v1576_v13, %v4022_v27  ;;  %v4033_v13 = vld [vmem:[#allocation34_spill] sm:$0xff] }
 0x72a   :  { %vm4025_vm0 = vcmask 932864   ;;  %vm4027_vm6 = vcmask 113664  }
 0x72b   :  { %v1654_v45 = vpop.permute.xlu1 %1653  ;;  %v1585_v18 = vpop.permute.xlu0 %1584  ;;  %v2362_v56 = vpack.c.bf16 %v1581_v26, %v1568_v21  ;;  %v2364_v8 = vpack.c.bf16 %v1580_v58, %v1567_v48  ;;  %vm4028_vm9 = vmmov %vm4027_vm6 }
 0x72c   :  { %v1655_v25 = vsel %vm179_vm1, %v3651_v2, %v1654_v45  ;;  %v1659_v62 = vsel %vm179_vm1, %v1654_v45, %v3651_v2  ;;  %v1589_v10 = vsel %vm702_vm2, %v3665_v0, %v1585_v18  ;;  %v1592_v11 = vsel %vm702_vm2, %v1585_v18, %v3665_v0  ;;  %vm4026_vm1 = vmmov %vm4025_vm0  ;;  %v4037_v45 = vld [vmem:[#allocation38_spill] sm:$0xff]  ;;  %v4038_v18 = vld [vmem:[#allocation39_spill] sm:$0xff] }
 0x72d   :  { %v3730_v39 = vmul.f32 %v1655_v25, %v4023_v5  ;;  %v3733_v63 = vmul.f32 %v1659_v62, %v4024_v57  ;;  %v1593_v19 = vmul.f32 %v1592_v11, %v3352_v1  ;;  %v1594_v14 = vmul.f32 %v1589_v10, %v3356_v40  ;;  %2363 = vmatprep.subr.bf16.mxu1 %v2362_v56  ;;  %v4030_v40 = vld [vmem:[#allocation29_spill] sm:$0xff]  ;;  %v4041_v57 = vld [vmem:[#allocation16_spill] sm:$0xff] }
 0x72e   :  { %2365 = vmatpush1.bf16.msra.mxu1 %v2364_v8  ;;  %vm4047_vm2 = vcmask 900096  }
 0x72f   :  { %v1667_v15 = vpop.permute.xlu1 %1666  ;;  %v1598_v2 = vpop.permute.xlu0 %1597  ;;  %vm4048_vm3 = vmmov %vm4047_vm2 }
 0x730   :  { %v1668_v22 = vsel %vm4025_vm0, %v3653_v51, %v1667_v15  ;;  %v1672_v0 = vsel %vm4026_vm1, %v1667_v15, %v3653_v51  ;;  %v1602_v24 = vsel %vm4027_vm6, %v3671_v55, %v1598_v2  ;;  %v1605_v47 = vsel %vm4028_vm9, %v1598_v2, %v3671_v55  ;;  %v4044_v2 = vld [vmem:[#allocation43_spill] sm:$0xff] }
 0x731   :  { %v3746_v1 = vmul.f32 %v1668_v22, %v4029_v50  ;;  %v1674_v7 = vmul.f32 %v1672_v0, %v4030_v40  ;;  %v1606_v12 = vmul.f32 %v1605_v47, %v3390_v41  ;;  %v1607_v48 = vmul.f32 %v1602_v24, %v3394_v59  ;;  %v4034_v59 = vld [vmem:[#allocation35_spill] sm:$0xff] }
 0x732   :  { %v2374_v0 = vpack.c.bf16 %v3717_v46, %v3533_v30  ;;  %vm4049_vm0 = vcmask 785408   ;;  %vm1914_vm9 = vcmask 1040384  }
 0x733   :  { %v1680_v33 = vpop.permute.xlu1 %1679  ;;  %v1611_v21 = vpop.permute.xlu0 %1610  ;;  %v2366_v54 = vpack.c.bf16 %v1607_v48, %v1594_v14  ;;  %v2368_v32 = vpack.c.bf16 %v1606_v12, %v1593_v19  ;;  %v4043_v14 = vld [vmem:[#allocation42_spill] sm:$0xff]  ;;  %v2376_v12 = vpack.c.bf16 %v3714_v36, %v3530_v61  ;;  %v2378_v48 = vpack.c.bf16 %v1674_v7, %v3733_v63  ;;  %vm4050_vm1 = vmmov %vm4049_vm0 }
 0x734   :  { %v1681_v51 = vsel %vm4031_vm10, %v3655_v28, %v1680_v33  ;;  %v1685_v53 = vsel %vm4032_vm11, %v1680_v33, %v3655_v28  ;;  %v1615_v55 = vsel %vm746_vm14, %v3677_v38, %v1611_v21  ;;  %v1618_v23 = vsel %vm746_vm14, %v1611_v21, %v3677_v38  ;;  %vm4056_vm6 = vmmov %vm4049_vm0 }
 0x735   :  { %v3760_v41 = vmul.f32 %v1681_v51, %v4033_v13  ;;  %v1687_v34 = vmul.f32 %v1685_v53, %v4034_v59  ;;  %v1619_v20 = vmul.f32 %v1618_v23, %v3442_v17  ;;  %v1620_v3 = vmul.f32 %v1615_v55, %v3446_v9  ;;  %2367 = vmatprep.subr.bf16.mxu1 %v2366_v54  ;;  %v4051_v54 = vld [vmem:[#allocation44_spill] sm:$0xff]  ;;  %v4052_v51 = vld [vmem:[#allocation45_spill] sm:$0xff] }
 0x736   :  { %2369 = vmatpush1.bf16.msra.mxu1 %v2368_v32  ;;  %vm4039_vm14 = vcmask 908288   ;;  %v2380_v7 = vpack.c.bf16 %v3746_v1, %v3730_v39  ;;  %vm2505_vm10 = vmmov 1  }
 0x737   :  { %v1693_v60 = vpop.permute.xlu1 %1692  ;;  %v1624_v58 = vpop.permute.xlu0 %1623  ;;  %vm4040_vm15 = vmmov %vm4039_vm14 }
 0x738   :  { %v1694_v28 = vsel %vm4035_vm12, %v3657_v49, %v1693_v60  ;;  %v1698_v27 = vsel %vm4036_vm13, %v1693_v60, %v3657_v49  ;;  %v1628_v38 = vsel %vm768_vm4, %v3683_v43, %v1624_v58  ;;  %v1631_v26 = vsel %vm768_vm4, %v1624_v58, %v3683_v43  ;;  %v4042_v43 = vld [vmem:[#allocation30_spill] sm:$0xff]  ;;  %v4054_v60 = vld [vmem:[#allocation47_spill] sm:$0xff]  ;;  %vm3848_vm11 = vmpackc.low %vm1914_vm9, %vm2505_vm10 }
 0x739   :  { %v1699_v17 = vmul.f32 %v1694_v28, %v4037_v45  ;;  %v1700_v9 = vmul.f32 %v1698_v27, %v4038_v18  ;;  %v1632_v56 = vmul.f32 %v1631_v26, %v3462_v29  ;;  %v1633_v8 = vmul.f32 %v1628_v38, %v3476_v6  ;;  %v4045_v6 = vld [vmem:[#allocation31_spill] sm:$0xff] }
 0x73a   :  { %v994_v19 = vrot.slane %v4042_v43, %v4041_v57  ;;  %v998_v22 = vrot.slane %v4045_v6, %v4041_v57  ;;  %vm1007_vm4 = vcmask 777216  }
 0x73b   :  { %v1706_v25 = vpop.permute.xlu1 %1705  ;;  %v1743_v62 = vpop.permute.xlu0 %1742  ;;  %v2370_v10 = vpack.c.bf16 %v1633_v8, %v1620_v3  ;;  %v2372_v11 = vpack.c.bf16 %v1632_v56, %v1619_v20  ;;  %v4053_v20 = vld [vmem:[#allocation46_spill] sm:$0xff] }
 0x73c   :  { %v1707_v49 = vsel %vm4039_vm14, %v3659_v44, %v1706_v25  ;;  %v1711_v5 = vsel %vm4040_vm15, %v1706_v25, %v3659_v44  ;;  %v4046_v44 = vld [vmem:[#allocation22_spill] sm:$0xff] }
 0x73d   :  { %v3784_v15 = vmul.f32 %v1707_v49, %v4043_v14  ;;  %v1713_v29 = vmul.f32 %v1711_v5, %v4044_v2  ;;  %2371 = vmatprep.subr.bf16.mxu1 %v2370_v10  ;;  %v3793_v50 = vrot.slane %v4042_v43, %v4046_v44  ;;  %v3797_v40 = vrot.slane %v4045_v6, %v4046_v44  ;;  %v1901_v2 = vld [vmem:[#allocation2 + $0x328] sm:$0x1] }
 0x73e   :  { %2373 = vmatpush1.bf16.msra.mxu1 %v2372_v11 }
 0x73f   :  { %v1719_v24 = vpop.permute.xlu1 %1718  ;;  %v983_v47 = vpop.permute.xlu0 %982  ;;  %2375 = vmatprep.subr.bf16.mxu1 %v2374_v0 }
 0x740   :  { %v1720_v30 = vsel %vm4047_vm2, %v3661_v4, %v1719_v24  ;;  %v1724_v46 = vsel %vm4048_vm3, %v1719_v24, %v3661_v4  ;;  %v986_v33 = vsel %vm4049_vm0, %v983_v47, %v3689_v37  ;;  %v990_v21 = vsel %vm4050_vm1, %v3689_v37, %v983_v47 }
 0x741   :  { %v1725_v32 = vmul.f32 %v1720_v30, %v4051_v54  ;;  %v1726_v53 = vmul.f32 %v1724_v46, %v4052_v51  ;;  %v999_v55 = vmul.f32 %v994_v19, %v986_v33  ;;  %v1000_v61 = vmul.f32 %v998_v22, %v990_v21  ;;  %v1903_v21 = vld [vmem:[#allocation2 + $0x338] sm:$0x1]  ;;  %v1794_v51 = vld [vmem:[%s3899_s5] sm:$0xff] }
 0x742   :  { %2377 = vmatpush1.bf16.msra.mxu1 %v2376_v12  ;;  %v2382_v4 = vpack.c.bf16 %v1700_v9, %v1687_v34 }
 0x743   :  { %v1732_v36 = vpop.permute.xlu1 %1731  ;;  %v1004_v63 = vpop.permute.xlu0 %1003  ;;  %2379 = vmatprep.subr.bf16.mxu1 %v2378_v48  ;;  %v2386_v9 = vpack.c.bf16 %v1726_v53, %v1713_v29  ;;  %v2388_v11 = vpack.c.bf16 %v1725_v32, %v3784_v15  ;;  %v1900_v29 = vld [vmem:[#allocation2 + $0x320] sm:$0x1] }
 0x744   :  { %v1733_v23 = vsel %vm942_vm5, %v3663_v31, %v1732_v36  ;;  %v1737_v37 = vsel %vm942_vm5, %v1732_v36, %v3663_v31  ;;  %v1008_v13 = vsel %vm1007_vm4, %v1004_v63, %v3695_v16  ;;  %v1012_v59 = vsel %vm1007_vm4, %v3695_v16, %v1004_v63  ;;  %vm4055_vm5 = vmmov %vm4049_vm0  ;;  %v1796_v36 = vld [vmem:[%s3899_s5 + $0x10] sm:$0xff]  ;;  %v1799_v63 = vld [vmem:[%s3899_s5 + $0x28] sm:$0xff] }
 0x745   :  { %v1738_v3 = vmul.f32 %v1733_v23, %v4053_v20  ;;  %v1739_v58 = vmul.f32 %v1737_v37, %v4054_v60  ;;  %v1021_v28 = vmul.f32 %v3793_v50, %v1008_v13  ;;  %v1022_v39 = vmul.f32 %v3797_v40, %v1012_v59 }
 0x746   :  { %2381 = vmatpush1.bf16.msra.mxu1 %v2380_v7  ;;  %v2384_v16 = vpack.c.bf16 %v1699_v17, %v3760_v41  ;;  %v1798_v7 = vld [vmem:[%s3899_s5 + $0x20] sm:$0xff] }
 0x747   :  { %v1745_v1 = vpop.permute.xlu1 %1744  ;;  %v1756_v34 = vpop.permute.xlu0 %1755  ;;  %2383 = vmatprep.subr.bf16.mxu1 %v2382_v4  ;;  %v2340_v27 = vpack.c.bf16 %v1022_v39, %v1000_v61  ;;  %v2342_v31 = vpack.c.bf16 %v1021_v28, %v999_v55  ;;  %v1797_v61 = vld [vmem:[%s3899_s5 + $0x18] sm:$0xff]  ;;  %s2506_s5 = smov [#allocation3]  }
 0x748   :  { %v1746_v38 = vsel %vm964_vm7, %v1743_v62, %v1745_v1  ;;  %v1750_v26 = vsel %vm964_vm7, %v1745_v1, %v1743_v62  ;;  %vm1029_vm7 = vcmask 769024   ;;  %s2123_s25 = sshll.u32 %s2506_s5, 4  ;;  %s2124_s25 = int_to_ptr.vmem [resolvable:$true] %s2123_s25 }
 0x749   :  { %v1751_v45 = vmul.f32 %v1746_v38, %v3450_v42  ;;  %v1752_v18 = vmul.f32 %v1750_v26, %v3454_v35  ;;  %2341 = vmatprep.subr.bf16.mxu0 %v2340_v27  ;;  %v2136_v42 = vld [vmem:[%s3900_s6 + $0x30] ss:$0 sm:$0xff]  ;;  %v2137_v35 = vld [vmem:[%s3900_s6 + $0x38] ss:$0 sm:$0xff]  ;;  %s2452_s26 = scalar_lea.vmem %s2124_s25, 512  ;;  %p2457_p1 = scmp.lt.s32.totalorder %s2124_s25, %s2124_s25 }
 0x74a   :  { %2343 = vmatpush1.bf16.msra.mxu0 %v2342_v31  ;;  %2385 = vmatpush1.bf16.msra.mxu1 %v2384_v16  ;;  %p2453_p0 = scmp.ne.s32.totalorder %s2124_s25, %s2452_s26  ;;  %p2458_p2 = scmp.lt.s32.totalorder %s2452_s26, %s2452_s26 }
 0x74b   :  { %v1758_v56 = vpop.permute.xlu1 %1757  ;;  %v1769_v8 = vpop.permute.xlu0 %1768  ;;  %2387 = vmatprep.subr.bf16.mxu1 %v2386_v9  ;;  %v2390_v41 = vpack.c.bf16 %v1752_v18, %v1739_v58  ;;  %v2392_v57 = vpack.c.bf16 %v1751_v45, %v1738_v3 }
 0x74c   :  { %v1759_v25 = vsel %vm4055_vm5, %v1756_v34, %v1758_v56  ;;  %v1763_v10 = vsel %vm4056_vm6, %v1758_v56, %v1756_v34  ;;  %p2459_p3 = por %p2458_p2, %p2457_p1 }
 0x74d   :  { %v1764_v62 = vmul.f32 %v1759_v25, %v994_v19  ;;  %v1765_v49 = vmul.f32 %v1763_v10, %v998_v22 }
 0x74e   :  { %2389 = vmatpush1.bf16.msra.mxu1 %v2388_v11  ;;  %p2460_p4 = pnand %p2459_p3, %p2453_p0 }
 0x74f   :  { %v1771_v17 = vpop.permute.xlu1 %1770  ;;  %v1026_v5 = vpop.permute.xlu0 %1025  ;;  %2391 = vmatprep.subr.bf16.mxu1 %v2390_v41 }
 0x750   :  { %v1772_v43 = vsel %vm1007_vm4, %v1769_v8, %v1771_v17  ;;  %v1776_v19 = vsel %vm1007_vm4, %v1771_v17, %v1769_v8  ;;  %v1030_v14 = vsel %vm1029_vm7, %v1026_v5, %v3701_v52  ;;  %v1034_v15 = vsel %vm1029_vm7, %v3701_v52, %v1026_v5 }
 0x751   :  { %v1777_v6 = vmul.f32 %v1772_v43, %v3793_v50  ;;  %v1778_v22 = vmul.f32 %v1776_v19, %v3797_v40  ;;  %v1043_v0 = vmul.f32 %v2136_v42, %v1030_v14  ;;  %v1044_v24 = vmul.f32 %v2137_v35, %v1034_v15  ;;  %v1902_v40 = vld [vmem:[#allocation2 + $0x330] sm:$0x1] }
 0x752   :  { %2393 = vmatpush1.bf16.msra.mxu1 %v2392_v57 }
 0x753   :  { %v1784_v44 = vpop.permute.xlu1 %1783  ;;  %v1782_v12 = vpop.permute.xlu0 %1781  ;;  %v2344_v48 = vpack.c.bf16 %v1901_v2, %v1044_v24  ;;  %v2394_v30 = vpack.c.bf16 %v1778_v22, %v1765_v49  ;;  %v2347_v46 = vpack.c.bf16 %v1900_v29, %v1043_v0  ;;  %v2396_v52 = vpack.c.bf16 %v1777_v6, %v1764_v62 }
 0x754   :  { %v1785_v33 = vsel %vm1029_vm7, %v1782_v12, %v1784_v44  ;;  %v1789_v50 = vsel %vm1029_vm7, %v1784_v44, %v1782_v12 }
 0x755   :  { %v1790_v54 = vmul.f32 %v2136_v42, %v1785_v33  ;;  %v1791_v32 = vmul.f32 %v2137_v35, %v1789_v50  ;;  %2346 = vmatprep.subr.msk.bf16.mxu0 %vm3848_vm11, %v2344_v48  ;;  %2395 = vmatprep.subr.bf16.mxu1 %v2394_v30 }
 0x756   :  { %2349 = vmatpush1.bf16.msk.msra.mxu0 %vm3848_vm11, %v2347_v46  ;;  %2397 = vmatpush1.bf16.msra.mxu1 %v2396_v52 }
 0x757   :  { %v2398_v53 = vpack.c.bf16 %v1903_v21, %v1791_v32  ;;  %v2401_v55 = vpack.c.bf16 %v1902_v40, %v1790_v54 }
 0x759   :  { %1992 = vmatmul.mubr.f32.vlgmr.msra.gmra.mrb[6].mxu0 %v1794_v51  ;;  %2400 = vmatprep.subr.msk.bf16.mxu1 %vm3848_vm11, %v2398_v53 }
 0x75a   :  { %2403 = vmatpush1.bf16.msk.msra.mxu1 %vm3848_vm11, %v2401_v55  ;;  %2147 = vmatprep.mubr.msk.f32.mxu0 %vm1904_vm8, %v1797_v61 }
 0x75d   :  { %1998 = vmatmul.mubr.f32.gmra.mrb[8].mxu0 %v1796_v36  ;;  %2075 = vmatmul.mubr.f32.vlgmr.msra.gmra.mrb[6].mxu1 %v1794_v51 }
 0x75e   :  { %2148 = vmatprep.mubr.msk.f32.mxu0 %vm1904_vm8, %v1799_v63  ;;  %2152 = vmatprep.mubr.msk.f32.mxu1 %vm1904_vm8, %v1797_v61 }
 0x761   :  { %2004 = vmatmul.mubr.f32.gmra.mrb[10].mxu0 %v1798_v7  ;;  %2081 = vmatmul.mubr.f32.gmra.mrb[8].mxu1 %v1796_v36 }
 0x762   :  { %2153 = vmatprep.mubr.msk.f32.mxu1 %vm1904_vm8, %v1799_v63 }
 0x765   :  { %2087 = vmatmul.mubr.f32.gmra.mrb[10].mxu1 %v1798_v7 }
 0x82c   :  { %v1993_v4 = vpop.f32.mrb[6].mxu0 }
 0x82d   :  { %v1995_v23 = vpop.f32.mrb[7].mxu0  ;;  %v2093_v37 = vmax.f32 %v1993_v4, 0.0 }
 0x82e   :  { %v2094_v13 = vmax.f32 %v1995_v23, 0.0 }
 0x830   :  { %v1999_v59 = vpop.f32.mrb[8].mxu0  ;;  %v2076_v20 = vpop.f32.mrb[6].mxu1 }
 0x831   :  { %v2097_v3 = vmax.f32 %v1999_v59, 0.0  ;;  %v2001_v60 = vpop.f32.mrb[9].mxu0  ;;  %v2078_v58 = vpop.f32.mrb[7].mxu1  ;;  %v2095_v31 = vmax.f32 %v2076_v20, 0.0 }
 0x832   :  { %v2098_v28 = vmax.f32 %v2001_v60, 0.0  ;;  %v2096_v18 = vmax.f32 %v2078_v58, 0.0 }
 0x833   :  { %v2101_v39 = vadd.f32 %v2097_v3, %v2093_v37 }
 0x834   :  { %v2102_v1 = vadd.f32 %v2098_v28, %v2094_v13  ;;  %v2005_v34 = vpop.f32.mrb[10].mxu0  ;;  %v2082_v27 = vpop.f32.mrb[8].mxu1 }
 0x835   :  { %v2105_v38 = vmax.f32 %v2005_v34, 0.0  ;;  %v2099_v26 = vmax.f32 %v2082_v27, 0.0  ;;  %v2007_v16 = vpop.f32.mrb[11].mxu0  ;;  %v2084_v45 = vpop.f32.mrb[9].mxu1 }
 0x836   :  { %v2106_v9 = vmax.f32 %v2007_v16, 0.0  ;;  %v2100_v56 = vmax.f32 %v2084_v45, 0.0 }
 0x837   :  { %v2109_v8 = vadd.f32 %v2105_v38, %v2101_v39  ;;  %v2103_v25 = vadd.f32 %v2099_v26, %v2095_v31 }
 0x838   :  { %v2110_v10 = vadd.f32 %v2106_v9, %v2102_v1  ;;  %v2104_v11 = vadd.f32 %v2100_v56, %v2096_v18  ;;  %v2088_v62 = vpop.f32.mrb[10].mxu1 }
 0x839   :  { %2113 = vst [vmem:[#allocation3] sm:$0xff] %v2109_v8  ;;  %v2107_v49 = vmax.f32 %v2088_v62, 0.0  ;;  %v2090_v41 = vpop.f32.mrb[11].mxu1 }
 0x83a   :  { %2114 = vst [vmem:[#allocation3 + $0x8] sm:$0xff] %v2110_v10  ;;  %v2108_v42 = vmax.f32 %v2090_v41, 0.0 }
 0x83b   :  { %v2111_v35 = vadd.f32 %v2107_v49, %v2103_v25 }
 0x83c   :  { %v2112_v17 = vadd.f32 %v2108_v42, %v2104_v11 }
 0x83d   :  { %2116 = vst [vmem:[#allocation3 + $0x10] sm:$0xff] %v2111_v35 }
 0x83e   :  { %2117 = vst [vmem:[#allocation3 + $0x18] sm:$0xff] %v2112_v17 }
 0x83f   :  { %2463 = shalt.err (!%p2460_p4)
}
 0x840   :  { %s2464_s29 = scalar_lea.hbm %s3901_s7, 512 }
 0x841   :  { %p2465_p5 = scmp.ne.s32.totalorder %s3901_s7, %s2464_s29  ;;  %p2468_p6 = scmp.lt.u32.totalorder %s2464_s29, %s3901_s7 }
 0x843   :  { %p2470_p7 = pnand %p2468_p6, %p2465_p5 }
 0x845   :  { %2473 = shalt.err (!%p2470_p7)
}
 0x846   :  { %s2507_s12 = smov 256  }
 0x847   :  { %2129 = dma.vmem_to_hbm [thread:$0]  %s2124_s25, 512, %s3901_s7, [#allocation4], %s2507_s12, %s2507_s12, %s2496_s23  }
 0x848   :  { %2474 = dma.done.wait [#allocation4], 512  }
 0x849   :  { %2475 = vsyncadd [#allocation4], 4294966784 }
 0x84a   :  { %2133 = vsyncpa [#allocation4], 1 }

</bundles_post_ra>
